<compile_context>
chip_gen: v7x
topology: tpu7x:2x2x1
jax: 0.10.0
libtpu: 0.0.40
codegen_flags: <defaults>
</compile_context>

<pallas_src>
import jax
import jax.numpy as jnp
from jax.experimental import pallas as pl
from jax.experimental.pallas import tpu as pltpu

# ---------------- config (small, consistent with the module) ----------------
SEQ = 16                 # num_tokens
HIDDEN = 256             # config.hidden_size
NUM_HEADS = 4            # config.num_attention_heads
NUM_KV_HEADS = 2         # config.num_key_value_heads (GQA)
HEAD_DIM = 64            # config.head_dim
HALF = HEAD_DIM // 2
Q_SIZE = NUM_HEADS * HEAD_DIM
KV_SIZE = NUM_KV_HEADS * HEAD_DIM
QKV_SIZE = Q_SIZE + 2 * KV_SIZE
NUM_EXPERTS = 8          # config.num_local_experts
TOP_K = 2                # config.num_experts_per_tok
INTERMEDIATE = 512       # config.moe_intermediate_size
RMS_EPS = 1e-5
ROPE_THETA = 10000.0
ATTN_LOGIT_CAP = 30.0    # config.attn_logit_softcapping
ROUTER_LOGIT_CAP = 30.0  # config.router_logit_softcapping
SCALING = HEAD_DIM ** -0.5
KV_GROUP = NUM_HEADS // NUM_KV_HEADS
NUM_CORE_SPLITS = 2                       # shard MoE expert streaming on v7x megacore
EXPERTS_PER_CORE = NUM_EXPERTS // NUM_CORE_SPLITS


# ------------------- Kernel 1: fused pre-MoE path ----------------------------
def _pre_moe_kernel(x_ref, pre_w_ref, post_w_ref, premoe_w_ref,
                    wqkv_ref, wo_ref, gate_ref, cos_ref, sin_ref,
                    moe_in_ref, resid_ref, dense_ref):
    x = x_ref[...]                                                   # (S, H) f32

    # ---- pre-attn RMSNorm ----
    h = x * jax.lax.rsqrt(jnp.mean(x * x, axis=-1, keepdims=True) + RMS_EPS) * pre_w_ref[...]

    # ---- fused QKV projection (bf16 weights, f32 accumulation) ----
    qkv = jnp.dot(h.astype(jnp.bfloat16), wqkv_ref[...],
                  preferred_element_type=jnp.float32)                # (S, Q+2KV)
    q = qkv[:, :Q_SIZE]
    k = qkv[:, Q_SIZE:Q_SIZE + KV_SIZE]
    v = qkv[:, Q_SIZE + KV_SIZE:]

    cos = cos_ref[...]                                               # (S, HALF)
    sin = sin_ref[...]

    def rope(xh):                                                    # neox-style, per head
        x1 = xh[:, :HALF]
        x2 = xh[:, HALF:]
        return jnp.concatenate([x1 * cos - x2 * sin, x2 * cos + x1 * sin], axis=-1)

    # RoPE K once per KV head (not per query head)
    k_r = [rope(k[:, g * HEAD_DIM:(g + 1) * HEAD_DIM]) for g in range(NUM_KV_HEADS)]

    row = jax.lax.broadcasted_iota(jnp.int32, (SEQ, SEQ), 0)
    col = jax.lax.broadcasted_iota(jnp.int32, (SEQ, SEQ), 1)
    causal = col <= row

    wo = wo_ref[...]                                                 # (Q_SIZE, H) bf16

    # ---- causal softcapped attention, all heads in one invocation;
    #      o_proj accumulated per head so the output stays lane-dense (H) ----
    attn_out = jnp.zeros((SEQ, HIDDEN), jnp.float32)
    for hh in range(NUM_HEADS):
        g = hh // KV_GROUP
        q_h = rope(q[:, hh * HEAD_DIM:(hh + 1) * HEAD_DIM])
        s = jax.lax.dot_general(q_h, k_r[g], (((1,), (1,)), ((), ())),
                                preferred_element_type=jnp.float32) * SCALING
        s = ATTN_LOGIT_CAP * jnp.tanh(s / ATTN_LOGIT_CAP)            # logit softcapping
        s = jnp.where(causal, s, -jnp.inf)                           # causal mask
        m = jnp.max(s, axis=-1, keepdims=True)
        p = jnp.exp(s - m)
        p = p * pl.reciprocal(jnp.sum(p, axis=-1, keepdims=True), approx=False)
        o_h = jnp.dot(p, v[:, g * HEAD_DIM:(g + 1) * HEAD_DIM],
                      preferred_element_type=jnp.float32)            # (S, D)
        # attn @ Wo == sum_h o_h @ Wo[h*D:(h+1)*D, :]
        attn_out = attn_out + jnp.dot(
            o_h.astype(jnp.bfloat16), wo[hh * HEAD_DIM:(hh + 1) * HEAD_DIM, :],
            preferred_element_type=jnp.float32)

    # ---- fused dual residual RMSNorm (post-attn / pre-moe) ----
    n1 = attn_out * jax.lax.rsqrt(
        jnp.mean(attn_out * attn_out, axis=-1, keepdims=True) + RMS_EPS) * post_w_ref[...]
    mid = n1 + x
    moe_in = mid * jax.lax.rsqrt(
        jnp.mean(mid * mid, axis=-1, keepdims=True) + RMS_EPS) * premoe_w_ref[...]
    resid_ref[...] = mid
    moe_in_ref[...] = moe_in

    # ---- router: softcapped softmax + in-kernel top-k (renormalize=False) ----
    logits = jnp.dot(moe_in, gate_ref[...], preferred_element_type=jnp.float32)  # (S, E)
    logits = ROUTER_LOGIT_CAP * jnp.tanh(logits / ROUTER_LOGIT_CAP)
    lm = jnp.max(logits, axis=-1, keepdims=True)
    ex = jnp.exp(logits - lm)
    probs = ex * pl.reciprocal(jnp.sum(ex, axis=-1, keepdims=True), approx=False)

    eidx = jax.lax.broadcasted_iota(jnp.int32, (SEQ, NUM_EXPERTS), 1)
    work = probs
    dense = jnp.zeros((SEQ, NUM_EXPERTS), jnp.float32)
    for _ in range(TOP_K):
        m_k = jnp.max(work, axis=-1, keepdims=True)
        # smallest index among maxima (matches lax.top_k tie-breaking)
        sel = jnp.min(jnp.where(work >= m_k, eidx, NUM_EXPERTS), axis=-1, keepdims=True)
        pick = eidx == sel
        dense = dense + jnp.where(pick, probs, 0.0)
        work = jnp.where(pick, -jnp.inf, work)
    dense_ref[...] = dense


def fused_pre_moe(x, pre_w, post_w, premoe_w, wqkv_t, wo_t, gate_w_t, cos, sin):
    return pl.pallas_call(
        _pre_moe_kernel,
        out_shape=(jax.ShapeDtypeStruct((SEQ, HIDDEN), jnp.float32),      # moe_in
                   jax.ShapeDtypeStruct((SEQ, HIDDEN), jnp.float32),      # residual
                   jax.ShapeDtypeStruct((SEQ, NUM_EXPERTS), jnp.float32)  # dense routing
                   ),
    )(x, pre_w.reshape(1, -1), post_w.reshape(1, -1), premoe_w.reshape(1, -1),
      wqkv_t, wo_t, gate_w_t, cos, sin)


# ------------------- Kernel 2: MoE experts -----------------------------------
def _moe_kernel(ids_ref, nact_ref, x_ref, dense_ref, wg_ref, wu_ref, wd_ref, o_ref):
    c = pl.program_id(0)                       # core-half (parallel)
    e = pl.program_id(1)                       # compacted expert slot (arbitrary)
    slot = c * EXPERTS_PER_CORE + e

    @pl.when(e == 0)
    def _():
        o_ref[...] = jnp.zeros_like(o_ref)

    @pl.when(slot < nact_ref[0])               # skip padded (inactive) slots
    def _():
        eid = ids_ref[slot]
        x = x_ref[...].astype(jnp.bfloat16)                                   # (S, H)
        g = jnp.dot(x, wg_ref[0], preferred_element_type=jnp.float32)         # (S, I)
        u = jnp.dot(x, wu_ref[0], preferred_element_type=jnp.float32)         # (S, I)
        # TODO(synk): FusedMoE 'gelu' uses tanh-approx gelu; exact-erf gelu differs at ~1e-3.
        hact = jax.nn.gelu(g, approximate=True) * u
        y = jnp.dot(hact.astype(jnp.bfloat16), wd_ref[0],
                    preferred_element_type=jnp.float32)                       # (S, H)
        # pick this expert's routing column from the resident (S, E) dense block
        lane = jax.lax.broadcasted_iota(jnp.int32, (SEQ, NUM_EXPERTS), 1)
        rw = jnp.sum(jnp.where(lane == eid, dense_ref[...], 0.0),
                     axis=-1, keepdims=True)                                  # (S, 1)
        o_ref[0] += rw * y


def moe_experts(x, dense, expert_ids, n_active, w_gate_t, w_up_t, w_down_t):
    partial = pl.pallas_call(
        _moe_kernel,
        grid_spec=pltpu.PrefetchScalarGridSpec(
            num_scalar_prefetch=2,
            grid=(NUM_CORE_SPLITS, EXPERTS_PER_CORE),
            in_specs=[
                pl.BlockSpec((SEQ, HIDDEN), lambda c, e, ids, n: (0, 0)),
                pl.BlockSpec((SEQ, NUM_EXPERTS), lambda c, e, ids, n: (0, 0)),
                pl.BlockSpec((1, HIDDEN, INTERMEDIATE),
                             lambda c, e, ids, n: (ids[c * EXPERTS_PER_CORE + e], 0, 0)),
                pl.BlockSpec((1, HIDDEN, INTERMEDIATE),
                             lambda c, e, ids, n: (ids[c * EXPERTS_PER_CORE + e], 0, 0)),
                pl.BlockSpec((1, INTERMEDIATE, HIDDEN),
                             lambda c, e, ids, n: (ids[c * EXPERTS_PER_CORE + e], 0, 0)),
            ],
            out_specs=pl.BlockSpec((1, SEQ, HIDDEN), lambda c, e, ids, n: (c, 0, 0)),
        ),
        out_shape=jax.ShapeDtypeStruct((NUM_CORE_SPLITS, SEQ, HIDDEN), jnp.float32),
        compiler_params=pltpu.CompilerParams(
            dimension_semantics=("parallel", "arbitrary")),
    )(expert_ids, n_active, x, dense, w_gate_t, w_up_t, w_down_t)
    return partial[0] + partial[1]


# ----------------------------- layer wrapper ---------------------------------
def rope_tables(positions):
    inv_freq = 1.0 / (ROPE_THETA ** (jnp.arange(0, HEAD_DIM, 2, dtype=jnp.float32) / HEAD_DIM))
    angles = positions.astype(jnp.float32)[:, None] * inv_freq[None, :]
    return jnp.cos(angles), jnp.sin(angles)


def compact_experts(dense):
    # compacted list of active expert ids (tail padded with the last active id so
    # padded grid steps re-use the same weight block -> no extra DMA)
    active = jnp.any(dense > 0.0, axis=0)                               # (E,)
    n_active = jnp.sum(active.astype(jnp.int32))
    order = jnp.argsort(jnp.logical_not(active)).astype(jnp.int32)      # active ids first
    pad = jnp.minimum(jnp.arange(NUM_EXPERTS, dtype=jnp.int32),
                      jnp.maximum(n_active - 1, 0))
    expert_ids = order[pad]
    return expert_ids, jnp.reshape(n_active, (1,))


def grok1_decoder_layer(positions, hidden_states, params):
    cos, sin = rope_tables(positions)
    # fused: pre-attn norm + qkv + RoPE + attention + o_proj + dual rmsnorm + router
    moe_in, residual, dense = fused_pre_moe(
        hidden_states, params["pre_attn_norm_w"], params["post_attn_norm_w"],
        params["pre_moe_norm_w"], params["wqkv_t"], params["wo_t"],
        params["gate_w_t"], cos, sin)

    expert_ids, n_active = compact_experts(dense)
    h = moe_experts(moe_in, dense, expert_ids, n_active,
                    params["w_gate_t"], params["w_up_t"], params["w_down_t"])

    # post_moe_norm is deferred (returned, not applied) as in the torch module
    return h, residual


# ---------------------------- pure-JAX reference -----------------------------
def reference_layer(positions, x, p):
    def rms(v, w):
        return v * jax.lax.rsqrt(jnp.mean(v * v, -1, keepdims=True) + RMS_EPS) * w

    def bf16_matmul(a, b):  # mirror kernel numerics: bf16 operands, f32 accumulation
        return jnp.dot(a.astype(jnp.bfloat16), b, preferred_element_type=jnp.float32)

    residual = x
    h = rms(x, p["pre_attn_norm_w"])
    qkv = bf16_matmul(h, p["wqkv_t"])
    q = qkv[:, :Q_SIZE].reshape(SEQ, NUM_HEADS, HEAD_DIM)
    k = qkv[:, Q_SIZE:Q_SIZE + KV_SIZE].reshape(SEQ, NUM_KV_HEADS, HEAD_DIM)
    v = qkv[:, Q_SIZE + KV_SIZE:].reshape(SEQ, NUM_KV_HEADS, HEAD_DIM)
    cos, sin = rope_tables(positions)

    def rope(t):
        t1, t2 = t[..., :HALF], t[..., HALF:]
        return jnp.concatenate([t1 * cos[:, None] - t2 * sin[:, None],
                                t2 * cos[:, None] + t1 * sin[:, None]], -1)

    q, k = rope(q), rope(k)
    k_r = jnp.repeat(k, KV_GROUP, axis=1)
    v_r = jnp.repeat(v, KV_GROUP, axis=1)
    s = jnp.einsum("qhd,khd->hqk", q, k_r) * SCALING
    s = ATTN_LOGIT_CAP * jnp.tanh(s / ATTN_LOGIT_CAP)
    mask = jnp.tril(jnp.ones((SEQ, SEQ), bool))
    s = jnp.where(mask[None], s, -jnp.inf)
    patt = jax.nn.softmax(s, -1)
    o = jnp.einsum("hqk,khd->qhd", patt, v_r).reshape(SEQ, Q_SIZE)
    h = bf16_matmul(o, p["wo_t"])

    mid = rms(h, p["post_attn_norm_w"]) + residual
    h = rms(mid, p["pre_moe_norm_w"])

    logits = h @ p["gate_w_t"]
    logits = ROUTER_LOGIT_CAP * jnp.tanh(logits / ROUTER_LOGIT_CAP)
    probs = jax.nn.softmax(logits, -1)
    tw, ti = jax.lax.top_k(probs, TOP_K)
    dense = jnp.sum(jax.nn.one_hot(ti, NUM_EXPERTS) * tw[..., None], 1)
    out = jnp.zeros((SEQ, HIDDEN), jnp.float32)
    for e in range(NUM_EXPERTS):
        g = bf16_matmul(h, p["w_gate_t"][e])
        u = bf16_matmul(h, p["w_up_t"][e])
        y = bf16_matmul(jax.nn.gelu(g, approximate=True) * u, p["w_down_t"][e])
        out = out + dense[:, e:e + 1] * y
    return out, mid


# --------------------------------- main --------------------------------------
def make_params(key):
    ks = jax.random.split(key, 8)
    s = 0.02
    return {
        "pre_attn_norm_w": jnp.ones((HIDDEN,), jnp.float32),
        "post_attn_norm_w": jnp.ones((HIDDEN,), jnp.float32),
        "pre_moe_norm_w": jnp.ones((HIDDEN,), jnp.float32),
        "post_moe_norm_w": jnp.ones((HIDDEN,), jnp.float32),   # deferred norm weight
        # bf16 weights (halves HBM->VMEM bytes); matmuls accumulate in f32
        "wqkv_t": (jax.random.normal(ks[0], (HIDDEN, QKV_SIZE), jnp.float32) * s
                   ).astype(jnp.bfloat16),
        "wo_t": (jax.random.normal(ks[1], (Q_SIZE, HIDDEN), jnp.float32) * s
                 ).astype(jnp.bfloat16),
        "gate_w_t": jax.random.normal(ks[2], (HIDDEN, NUM_EXPERTS), jnp.float32) * s,
        "w_gate_t": (jax.random.normal(ks[3], (NUM_EXPERTS, HIDDEN, INTERMEDIATE),
                                       jnp.float32) * s).astype(jnp.bfloat16),
        "w_up_t": (jax.random.normal(ks[4], (NUM_EXPERTS, HIDDEN, INTERMEDIATE),
                                     jnp.float32) * s).astype(jnp.bfloat16),
        "w_down_t": (jax.random.normal(ks[5], (NUM_EXPERTS, INTERMEDIATE, HIDDEN),
                                       jnp.float32) * s).astype(jnp.bfloat16),
    }


if __name__ == "__main__":
    key = jax.random.PRNGKey(0)
    pkey, xkey = jax.random.split(key)
    params = make_params(pkey)
    hidden_states = jax.random.normal(xkey, (SEQ, HIDDEN), jnp.float32)
    positions = jnp.arange(SEQ, dtype=jnp.int32)

    out, residual = jax.jit(grok1_decoder_layer)(positions, hidden_states, params)
    out = jax.block_until_ready(out)
    residual = jax.block_until_ready(residual)

    ref_out, ref_res = reference_layer(positions, hidden_states, params)
    assert jnp.all(jnp.isfinite(out)) and jnp.all(jnp.isfinite(residual))
    assert jnp.allclose(out, ref_out, rtol=2e-2, atol=2e-2), "MoE output mismatch"
    assert jnp.allclose(residual, ref_res, rtol=2e-2, atol=2e-2), "residual mismatch"

    print("KERNEL_OK")
</pallas_src>

<mosaic_0001>
module attributes {stable_mosaic.version = 11 : i64} {
  func.func @_pre_moe_kernel(%arg0: memref<16x256xf32, #tpu.memory_space<vmem>>, %arg1: memref<1x256xf32, #tpu.memory_space<vmem>>, %arg2: memref<1x256xf32, #tpu.memory_space<vmem>>, %arg3: memref<1x256xf32, #tpu.memory_space<vmem>>, %arg4: memref<256x512xbf16, #tpu.memory_space<vmem>>, %arg5: memref<256x256xbf16, #tpu.memory_space<vmem>>, %arg6: memref<256x8xf32, #tpu.memory_space<vmem>>, %arg7: memref<16x32xf32, #tpu.memory_space<vmem>>, %arg8: memref<16x32xf32, #tpu.memory_space<vmem>>, %arg9: memref<16x256xf32, #tpu.memory_space<vmem>>, %arg10: memref<16x256xf32, #tpu.memory_space<vmem>>, %arg11: memref<16x8xf32, #tpu.memory_space<vmem>>) attributes {dimension_semantics = [], scalar_prefetch = 0 : i64, scratch_operands = 0 : i64, tpu.core_type = #tpu.core_type<tc>} {
    %c0 = arith.constant 0 : index
    %c0_0 = arith.constant 0 : index
    %0 = vector.load %arg0[%c0, %c0_0] : memref<16x256xf32, #tpu.memory_space<vmem>>, vector<16x256xf32>
    %1 = arith.mulf %0, %0 : vector<16x256xf32>
    %cst = arith.constant dense<0.000000e+00> : vector<16xf32>
    %2 = vector.multi_reduction <add>, %1, %cst [1] : vector<16x256xf32> to vector<16xf32>
    %3 = vector.shape_cast %2 : vector<16xf32> to vector<16x1xf32>
    %cst_1 = arith.constant 2.560000e+02 : f32
    %4 = vector.broadcast %cst_1 : f32 to vector<16x1xf32>
    %5 = arith.divf %3, %4 : vector<16x1xf32>
    %cst_2 = arith.constant 9.99999974E-6 : f32
    %6 = vector.broadcast %cst_2 : f32 to vector<16x1xf32>
    %7 = arith.addf %5, %6 : vector<16x1xf32>
    %8 = math.rsqrt %7 : vector<16x1xf32>
    %9 = vector.broadcast %8 : vector<16x1xf32> to vector<16x256xf32>
    %10 = arith.mulf %0, %9 : vector<16x256xf32>
    %c0_3 = arith.constant 0 : index
    %c0_4 = arith.constant 0 : index
    %11 = vector.load %arg1[%c0_3, %c0_4] : memref<1x256xf32, #tpu.memory_space<vmem>>, vector<1x256xf32>
    %12 = vector.broadcast %11 : vector<1x256xf32> to vector<16x256xf32>
    %13 = arith.mulf %10, %12 : vector<16x256xf32>
    %14 = arith.truncf %13 : vector<16x256xf32> to vector<16x256xbf16>
    %c0_5 = arith.constant 0 : index
    %c0_6 = arith.constant 0 : index
    %15 = vector.load %arg4[%c0_5, %c0_6] : memref<256x512xbf16, #tpu.memory_space<vmem>>, vector<256x512xbf16>
    %cst_7 = arith.constant dense<0.000000e+00> : vector<16x512xf32>
    %16 = tpu.matmul %14, %15, %cst_7 {dimension_numbers = #tpu.dot_dimension_numbers<[1], [0], [0], [1], [0, 0, 1, 1], [], []>} : vector<16x256xbf16>, vector<256x512xbf16>, vector<16x512xf32> -> vector<16x512xf32>
    %17 = vector.extract_strided_slice %16 {offsets = [0, 0], sizes = [16, 256], strides = [1, 1]} : vector<16x512xf32> to vector<16x256xf32>
    %18 = vector.extract_strided_slice %16 {offsets = [0, 256], sizes = [16, 128], strides = [1, 1]} : vector<16x512xf32> to vector<16x128xf32>
    %19 = vector.extract_strided_slice %16 {offsets = [0, 384], sizes = [16, 128], strides = [1, 1]} : vector<16x512xf32> to vector<16x128xf32>
    %c0_8 = arith.constant 0 : index
    %c0_9 = arith.constant 0 : index
    %20 = vector.load %arg7[%c0_8, %c0_9] : memref<16x32xf32, #tpu.memory_space<vmem>>, vector<16x32xf32>
    %c0_10 = arith.constant 0 : index
    %c0_11 = arith.constant 0 : index
    %21 = vector.load %arg8[%c0_10, %c0_11] : memref<16x32xf32, #tpu.memory_space<vmem>>, vector<16x32xf32>
    %22 = vector.extract_strided_slice %18 {offsets = [0, 0], sizes = [16, 64], strides = [1, 1]} : vector<16x128xf32> to vector<16x64xf32>
    %23 = vector.extract_strided_slice %22 {offsets = [0, 0], sizes = [16, 32], strides = [1, 1]} : vector<16x64xf32> to vector<16x32xf32>
    %24 = vector.extract_strided_slice %22 {offsets = [0, 32], sizes = [16, 32], strides = [1, 1]} : vector<16x64xf32> to vector<16x32xf32>
    %25 = arith.mulf %23, %20 : vector<16x32xf32>
    %26 = arith.mulf %24, %21 : vector<16x32xf32>
    %27 = arith.subf %25, %26 : vector<16x32xf32>
    %28 = arith.mulf %24, %20 : vector<16x32xf32>
    %29 = arith.mulf %23, %21 : vector<16x32xf32>
    %30 = arith.addf %28, %29 : vector<16x32xf32>
    %31 = tpu.concatenate %27, %30 in 1 : vector<16x32xf32>, vector<16x32xf32> -> vector<16x64xf32>
    %32 = vector.extract_strided_slice %18 {offsets = [0, 64], sizes = [16, 64], strides = [1, 1]} : vector<16x128xf32> to vector<16x64xf32>
    %33 = vector.extract_strided_slice %32 {offsets = [0, 0], sizes = [16, 32], strides = [1, 1]} : vector<16x64xf32> to vector<16x32xf32>
    %34 = vector.extract_strided_slice %32 {offsets = [0, 32], sizes = [16, 32], strides = [1, 1]} : vector<16x64xf32> to vector<16x32xf32>
    %35 = arith.mulf %33, %20 : vector<16x32xf32>
    %36 = arith.mulf %34, %21 : vector<16x32xf32>
    %37 = arith.subf %35, %36 : vector<16x32xf32>
    %38 = arith.mulf %34, %20 : vector<16x32xf32>
    %39 = arith.mulf %33, %21 : vector<16x32xf32>
    %40 = arith.addf %38, %39 : vector<16x32xf32>
    %41 = tpu.concatenate %37, %40 in 1 : vector<16x32xf32>, vector<16x32xf32> -> vector<16x64xf32>
    %42 = tpu.iota {dimensions = array<i32: 0>} : vector<16x16xi32>
    %43 = tpu.iota {dimensions = array<i32: 1>} : vector<16x16xi32>
    %44 = arith.cmpi sle, %43, %42 : vector<16x16xi32>
    %c0_12 = arith.constant 0 : index
    %c0_13 = arith.constant 0 : index
    %45 = vector.load %arg5[%c0_12, %c0_13] : memref<256x256xbf16, #tpu.memory_space<vmem>>, vector<256x256xbf16>
    %cst_14 = arith.constant 0.000000e+00 : f32
    %46 = vector.broadcast %cst_14 : f32 to vector<16x256xf32>
    %47 = vector.extract_strided_slice %17 {offsets = [0, 0], sizes = [16, 64], strides = [1, 1]} : vector<16x256xf32> to vector<16x64xf32>
    %48 = vector.extract_strided_slice %47 {offsets = [0, 0], sizes = [16, 32], strides = [1, 1]} : vector<16x64xf32> to vector<16x32xf32>
    %49 = vector.extract_strided_slice %47 {offsets = [0, 32], sizes = [16, 32], strides = [1, 1]} : vector<16x64xf32> to vector<16x32xf32>
    %50 = arith.mulf %48, %20 : vector<16x32xf32>
    %51 = arith.mulf %49, %21 : vector<16x32xf32>
    %52 = arith.subf %50, %51 : vector<16x32xf32>
    %53 = arith.mulf %49, %20 : vector<16x32xf32>
    %54 = arith.mulf %48, %21 : vector<16x32xf32>
    %55 = arith.addf %53, %54 : vector<16x32xf32>
    %56 = tpu.concatenate %52, %55 in 1 : vector<16x32xf32>, vector<16x32xf32> -> vector<16x64xf32>
    %cst_15 = arith.constant dense<0.000000e+00> : vector<16x16xf32>
    %57 = tpu.matmul %56, %31, %cst_15 {dimension_numbers = #tpu.dot_dimension_numbers<[1], [1], [0], [0], [0, 0, 1, 0], [], []>} : vector<16x64xf32>, vector<16x64xf32>, vector<16x16xf32> -> vector<16x16xf32>
    %cst_16 = arith.constant 1.250000e-01 : f32
    %58 = vector.broadcast %cst_16 : f32 to vector<16x16xf32>
    %59 = arith.mulf %57, %58 : vector<16x16xf32>
    %cst_17 = arith.constant 3.000000e+01 : f32
    %60 = vector.broadcast %cst_17 : f32 to vector<16x16xf32>
    %61 = arith.divf %59, %60 : vector<16x16xf32>
    %62 = math.tanh %61 : vector<16x16xf32>
    %cst_18 = arith.constant 3.000000e+01 : f32
    %63 = vector.broadcast %cst_18 : f32 to vector<16x16xf32>
    %64 = arith.mulf %63, %62 : vector<16x16xf32>
    %cst_19 = arith.constant 0xFF800000 : f32
    %65 = vector.broadcast %cst_19 : f32 to vector<16x16xf32>
    %66 = arith.select %44, %64, %65 : vector<16x16xi1>, vector<16x16xf32>
    %cst_20 = arith.constant dense<0xFF800000> : vector<16xf32>
    %67 = vector.multi_reduction <maximumf>, %66, %cst_20 [1] : vector<16x16xf32> to vector<16xf32>
    %68 = vector.shape_cast %67 : vector<16xf32> to vector<16x1xf32>
    %69 = vector.broadcast %68 : vector<16x1xf32> to vector<16x16xf32>
    %70 = arith.subf %66, %69 : vector<16x16xf32>
    %71 = math.exp %70 : vector<16x16xf32>
    %cst_21 = arith.constant dense<0.000000e+00> : vector<16xf32>
    %72 = vector.multi_reduction <add>, %71, %cst_21 [1] : vector<16x16xf32> to vector<16xf32>
    %73 = vector.shape_cast %72 : vector<16xf32> to vector<16x1xf32>
    %74 = tpu.reciprocal %73 : vector<16x1xf32> -> vector<16x1xf32>
    %75 = vector.broadcast %74 : vector<16x1xf32> to vector<16x16xf32>
    %76 = arith.mulf %71, %75 : vector<16x16xf32>
    %77 = vector.extract_strided_slice %19 {offsets = [0, 0], sizes = [16, 64], strides = [1, 1]} : vector<16x128xf32> to vector<16x64xf32>
    %cst_22 = arith.constant dense<0.000000e+00> : vector<16x64xf32>
    %78 = tpu.matmul %76, %77, %cst_22 {dimension_numbers = #tpu.dot_dimension_numbers<[1], [0], [0], [1], [0, 0, 1, 1], [], []>} : vector<16x16xf32>, vector<16x64xf32>, vector<16x64xf32> -> vector<16x64xf32>
    %79 = arith.truncf %78 : vector<16x64xf32> to vector<16x64xbf16>
    %80 = vector.extract_strided_slice %45 {offsets = [0, 0], sizes = [64, 256], strides = [1, 1]} : vector<256x256xbf16> to vector<64x256xbf16>
    %cst_23 = arith.constant dense<0.000000e+00> : vector<16x256xf32>
    %81 = tpu.matmul %79, %80, %cst_23 {dimension_numbers = #tpu.dot_dimension_numbers<[1], [0], [0], [1], [0, 0, 1, 1], [], []>} : vector<16x64xbf16>, vector<64x256xbf16>, vector<16x256xf32> -> vector<16x256xf32>
    %82 = arith.addf %46, %81 : vector<16x256xf32>
    %83 = vector.extract_strided_slice %17 {offsets = [0, 64], sizes = [16, 64], strides = [1, 1]} : vector<16x256xf32> to vector<16x64xf32>
    %84 = vector.extract_strided_slice %83 {offsets = [0, 0], sizes = [16, 32], strides = [1, 1]} : vector<16x64xf32> to vector<16x32xf32>
    %85 = vector.extract_strided_slice %83 {offsets = [0, 32], sizes = [16, 32], strides = [1, 1]} : vector<16x64xf32> to vector<16x32xf32>
    %86 = arith.mulf %84, %20 : vector<16x32xf32>
    %87 = arith.mulf %85, %21 : vector<16x32xf32>
    %88 = arith.subf %86, %87 : vector<16x32xf32>
    %89 = arith.mulf %85, %20 : vector<16x32xf32>
    %90 = arith.mulf %84, %21 : vector<16x32xf32>
    %91 = arith.addf %89, %90 : vector<16x32xf32>
    %92 = tpu.concatenate %88, %91 in 1 : vector<16x32xf32>, vector<16x32xf32> -> vector<16x64xf32>
    %cst_24 = arith.constant dense<0.000000e+00> : vector<16x16xf32>
    %93 = tpu.matmul %92, %31, %cst_24 {dimension_numbers = #tpu.dot_dimension_numbers<[1], [1], [0], [0], [0, 0, 1, 0], [], []>} : vector<16x64xf32>, vector<16x64xf32>, vector<16x16xf32> -> vector<16x16xf32>
    %cst_25 = arith.constant 1.250000e-01 : f32
    %94 = vector.broadcast %cst_25 : f32 to vector<16x16xf32>
    %95 = arith.mulf %93, %94 : vector<16x16xf32>
    %cst_26 = arith.constant 3.000000e+01 : f32
    %96 = vector.broadcast %cst_26 : f32 to vector<16x16xf32>
    %97 = arith.divf %95, %96 : vector<16x16xf32>
    %98 = math.tanh %97 : vector<16x16xf32>
    %cst_27 = arith.constant 3.000000e+01 : f32
    %99 = vector.broadcast %cst_27 : f32 to vector<16x16xf32>
    %100 = arith.mulf %99, %98 : vector<16x16xf32>
    %cst_28 = arith.constant 0xFF800000 : f32
    %101 = vector.broadcast %cst_28 : f32 to vector<16x16xf32>
    %102 = arith.select %44, %100, %101 : vector<16x16xi1>, vector<16x16xf32>
    %cst_29 = arith.constant dense<0xFF800000> : vector<16xf32>
    %103 = vector.multi_reduction <maximumf>, %102, %cst_29 [1] : vector<16x16xf32> to vector<16xf32>
    %104 = vector.shape_cast %103 : vector<16xf32> to vector<16x1xf32>
    %105 = vector.broadcast %104 : vector<16x1xf32> to vector<16x16xf32>
    %106 = arith.subf %102, %105 : vector<16x16xf32>
    %107 = math.exp %106 : vector<16x16xf32>
    %cst_30 = arith.constant dense<0.000000e+00> : vector<16xf32>
    %108 = vector.multi_reduction <add>, %107, %cst_30 [1] : vector<16x16xf32> to vector<16xf32>
    %109 = vector.shape_cast %108 : vector<16xf32> to vector<16x1xf32>
    %110 = tpu.reciprocal %109 : vector<16x1xf32> -> vector<16x1xf32>
    %111 = vector.broadcast %110 : vector<16x1xf32> to vector<16x16xf32>
    %112 = arith.mulf %107, %111 : vector<16x16xf32>
    %113 = vector.extract_strided_slice %19 {offsets = [0, 0], sizes = [16, 64], strides = [1, 1]} : vector<16x128xf32> to vector<16x64xf32>
    %cst_31 = arith.constant dense<0.000000e+00> : vector<16x64xf32>
    %114 = tpu.matmul %112, %113, %cst_31 {dimension_numbers = #tpu.dot_dimension_numbers<[1], [0], [0], [1], [0, 0, 1, 1], [], []>} : vector<16x16xf32>, vector<16x64xf32>, vector<16x64xf32> -> vector<16x64xf32>
    %115 = arith.truncf %114 : vector<16x64xf32> to vector<16x64xbf16>
    %116 = vector.extract_strided_slice %45 {offsets = [64, 0], sizes = [64, 256], strides = [1, 1]} : vector<256x256xbf16> to vector<64x256xbf16>
    %cst_32 = arith.constant dense<0.000000e+00> : vector<16x256xf32>
    %117 = tpu.matmul %115, %116, %cst_32 {dimension_numbers = #tpu.dot_dimension_numbers<[1], [0], [0], [1], [0, 0, 1, 1], [], []>} : vector<16x64xbf16>, vector<64x256xbf16>, vector<16x256xf32> -> vector<16x256xf32>
    %118 = arith.addf %82, %117 : vector<16x256xf32>
    %119 = vector.extract_strided_slice %17 {offsets = [0, 128], sizes = [16, 64], strides = [1, 1]} : vector<16x256xf32> to vector<16x64xf32>
    %120 = vector.extract_strided_slice %119 {offsets = [0, 0], sizes = [16, 32], strides = [1, 1]} : vector<16x64xf32> to vector<16x32xf32>
    %121 = vector.extract_strided_slice %119 {offsets = [0, 32], sizes = [16, 32], strides = [1, 1]} : vector<16x64xf32> to vector<16x32xf32>
    %122 = arith.mulf %120, %20 : vector<16x32xf32>
    %123 = arith.mulf %121, %21 : vector<16x32xf32>
    %124 = arith.subf %122, %123 : vector<16x32xf32>
    %125 = arith.mulf %121, %20 : vector<16x32xf32>
    %126 = arith.mulf %120, %21 : vector<16x32xf32>
    %127 = arith.addf %125, %126 : vector<16x32xf32>
    %128 = tpu.concatenate %124, %127 in 1 : vector<16x32xf32>, vector<16x32xf32> -> vector<16x64xf32>
    %cst_33 = arith.constant dense<0.000000e+00> : vector<16x16xf32>
    %129 = tpu.matmul %128, %41, %cst_33 {dimension_numbers = #tpu.dot_dimension_numbers<[1], [1], [0], [0], [0, 0, 1, 0], [], []>} : vector<16x64xf32>, vector<16x64xf32>, vector<16x16xf32> -> vector<16x16xf32>
    %cst_34 = arith.constant 1.250000e-01 : f32
    %130 = vector.broadcast %cst_34 : f32 to vector<16x16xf32>
    %131 = arith.mulf %129, %130 : vector<16x16xf32>
    %cst_35 = arith.constant 3.000000e+01 : f32
    %132 = vector.broadcast %cst_35 : f32 to vector<16x16xf32>
    %133 = arith.divf %131, %132 : vector<16x16xf32>
    %134 = math.tanh %133 : vector<16x16xf32>
    %cst_36 = arith.constant 3.000000e+01 : f32
    %135 = vector.broadcast %cst_36 : f32 to vector<16x16xf32>
    %136 = arith.mulf %135, %134 : vector<16x16xf32>
    %cst_37 = arith.constant 0xFF800000 : f32
    %137 = vector.broadcast %cst_37 : f32 to vector<16x16xf32>
    %138 = arith.select %44, %136, %137 : vector<16x16xi1>, vector<16x16xf32>
    %cst_38 = arith.constant dense<0xFF800000> : vector<16xf32>
    %139 = vector.multi_reduction <maximumf>, %138, %cst_38 [1] : vector<16x16xf32> to vector<16xf32>
    %140 = vector.shape_cast %139 : vector<16xf32> to vector<16x1xf32>
    %141 = vector.broadcast %140 : vector<16x1xf32> to vector<16x16xf32>
    %142 = arith.subf %138, %141 : vector<16x16xf32>
    %143 = math.exp %142 : vector<16x16xf32>
    %cst_39 = arith.constant dense<0.000000e+00> : vector<16xf32>
    %144 = vector.multi_reduction <add>, %143, %cst_39 [1] : vector<16x16xf32> to vector<16xf32>
    %145 = vector.shape_cast %144 : vector<16xf32> to vector<16x1xf32>
    %146 = tpu.reciprocal %145 : vector<16x1xf32> -> vector<16x1xf32>
    %147 = vector.broadcast %146 : vector<16x1xf32> to vector<16x16xf32>
    %148 = arith.mulf %143, %147 : vector<16x16xf32>
    %149 = vector.extract_strided_slice %19 {offsets = [0, 64], sizes = [16, 64], strides = [1, 1]} : vector<16x128xf32> to vector<16x64xf32>
    %cst_40 = arith.constant dense<0.000000e+00> : vector<16x64xf32>
    %150 = tpu.matmul %148, %149, %cst_40 {dimension_numbers = #tpu.dot_dimension_numbers<[1], [0], [0], [1], [0, 0, 1, 1], [], []>} : vector<16x16xf32>, vector<16x64xf32>, vector<16x64xf32> -> vector<16x64xf32>
    %151 = arith.truncf %150 : vector<16x64xf32> to vector<16x64xbf16>
    %152 = vector.extract_strided_slice %45 {offsets = [128, 0], sizes = [64, 256], strides = [1, 1]} : vector<256x256xbf16> to vector<64x256xbf16>
    %cst_41 = arith.constant dense<0.000000e+00> : vector<16x256xf32>
    %153 = tpu.matmul %151, %152, %cst_41 {dimension_numbers = #tpu.dot_dimension_numbers<[1], [0], [0], [1], [0, 0, 1, 1], [], []>} : vector<16x64xbf16>, vector<64x256xbf16>, vector<16x256xf32> -> vector<16x256xf32>
    %154 = arith.addf %118, %153 : vector<16x256xf32>
    %155 = vector.extract_strided_slice %17 {offsets = [0, 192], sizes = [16, 64], strides = [1, 1]} : vector<16x256xf32> to vector<16x64xf32>
    %156 = vector.extract_strided_slice %155 {offsets = [0, 0], sizes = [16, 32], strides = [1, 1]} : vector<16x64xf32> to vector<16x32xf32>
    %157 = vector.extract_strided_slice %155 {offsets = [0, 32], sizes = [16, 32], strides = [1, 1]} : vector<16x64xf32> to vector<16x32xf32>
    %158 = arith.mulf %156, %20 : vector<16x32xf32>
    %159 = arith.mulf %157, %21 : vector<16x32xf32>
    %160 = arith.subf %158, %159 : vector<16x32xf32>
    %161 = arith.mulf %157, %20 : vector<16x32xf32>
    %162 = arith.mulf %156, %21 : vector<16x32xf32>
    %163 = arith.addf %161, %162 : vector<16x32xf32>
    %164 = tpu.concatenate %160, %163 in 1 : vector<16x32xf32>, vector<16x32xf32> -> vector<16x64xf32>
    %cst_42 = arith.constant dense<0.000000e+00> : vector<16x16xf32>
    %165 = tpu.matmul %164, %41, %cst_42 {dimension_numbers = #tpu.dot_dimension_numbers<[1], [1], [0], [0], [0, 0, 1, 0], [], []>} : vector<16x64xf32>, vector<16x64xf32>, vector<16x16xf32> -> vector<16x16xf32>
    %cst_43 = arith.constant 1.250000e-01 : f32
    %166 = vector.broadcast %cst_43 : f32 to vector<16x16xf32>
    %167 = arith.mulf %165, %166 : vector<16x16xf32>
    %cst_44 = arith.constant 3.000000e+01 : f32
    %168 = vector.broadcast %cst_44 : f32 to vector<16x16xf32>
    %169 = arith.divf %167, %168 : vector<16x16xf32>
    %170 = math.tanh %169 : vector<16x16xf32>
    %cst_45 = arith.constant 3.000000e+01 : f32
    %171 = vector.broadcast %cst_45 : f32 to vector<16x16xf32>
    %172 = arith.mulf %171, %170 : vector<16x16xf32>
    %cst_46 = arith.constant 0xFF800000 : f32
    %173 = vector.broadcast %cst_46 : f32 to vector<16x16xf32>
    %174 = arith.select %44, %172, %173 : vector<16x16xi1>, vector<16x16xf32>
    %cst_47 = arith.constant dense<0xFF800000> : vector<16xf32>
    %175 = vector.multi_reduction <maximumf>, %174, %cst_47 [1] : vector<16x16xf32> to vector<16xf32>
    %176 = vector.shape_cast %175 : vector<16xf32> to vector<16x1xf32>
    %177 = vector.broadcast %176 : vector<16x1xf32> to vector<16x16xf32>
    %178 = arith.subf %174, %177 : vector<16x16xf32>
    %179 = math.exp %178 : vector<16x16xf32>
    %cst_48 = arith.constant dense<0.000000e+00> : vector<16xf32>
    %180 = vector.multi_reduction <add>, %179, %cst_48 [1] : vector<16x16xf32> to vector<16xf32>
    %181 = vector.shape_cast %180 : vector<16xf32> to vector<16x1xf32>
    %182 = tpu.reciprocal %181 : vector<16x1xf32> -> vector<16x1xf32>
    %183 = vector.broadcast %182 : vector<16x1xf32> to vector<16x16xf32>
    %184 = arith.mulf %179, %183 : vector<16x16xf32>
    %185 = vector.extract_strided_slice %19 {offsets = [0, 64], sizes = [16, 64], strides = [1, 1]} : vector<16x128xf32> to vector<16x64xf32>
    %cst_49 = arith.constant dense<0.000000e+00> : vector<16x64xf32>
    %186 = tpu.matmul %184, %185, %cst_49 {dimension_numbers = #tpu.dot_dimension_numbers<[1], [0], [0], [1], [0, 0, 1, 1], [], []>} : vector<16x16xf32>, vector<16x64xf32>, vector<16x64xf32> -> vector<16x64xf32>
    %187 = arith.truncf %186 : vector<16x64xf32> to vector<16x64xbf16>
    %188 = vector.extract_strided_slice %45 {offsets = [192, 0], sizes = [64, 256], strides = [1, 1]} : vector<256x256xbf16> to vector<64x256xbf16>
    %cst_50 = arith.constant dense<0.000000e+00> : vector<16x256xf32>
    %189 = tpu.matmul %187, %188, %cst_50 {dimension_numbers = #tpu.dot_dimension_numbers<[1], [0], [0], [1], [0, 0, 1, 1], [], []>} : vector<16x64xbf16>, vector<64x256xbf16>, vector<16x256xf32> -> vector<16x256xf32>
    %190 = arith.addf %154, %189 : vector<16x256xf32>
    %191 = arith.mulf %190, %190 : vector<16x256xf32>
    %cst_51 = arith.constant dense<0.000000e+00> : vector<16xf32>
    %192 = vector.multi_reduction <add>, %191, %cst_51 [1] : vector<16x256xf32> to vector<16xf32>
    %193 = vector.shape_cast %192 : vector<16xf32> to vector<16x1xf32>
    %cst_52 = arith.constant 2.560000e+02 : f32
    %194 = vector.broadcast %cst_52 : f32 to vector<16x1xf32>
    %195 = arith.divf %193, %194 : vector<16x1xf32>
    %cst_53 = arith.constant 9.99999974E-6 : f32
    %196 = vector.broadcast %cst_53 : f32 to vector<16x1xf32>
    %197 = arith.addf %195, %196 : vector<16x1xf32>
    %198 = math.rsqrt %197 : vector<16x1xf32>
    %199 = vector.broadcast %198 : vector<16x1xf32> to vector<16x256xf32>
    %200 = arith.mulf %190, %199 : vector<16x256xf32>
    %c0_54 = arith.constant 0 : index
    %c0_55 = arith.constant 0 : index
    %201 = vector.load %arg2[%c0_54, %c0_55] : memref<1x256xf32, #tpu.memory_space<vmem>>, vector<1x256xf32>
    %202 = vector.broadcast %201 : vector<1x256xf32> to vector<16x256xf32>
    %203 = arith.mulf %200, %202 : vector<16x256xf32>
    %204 = arith.addf %203, %0 : vector<16x256xf32>
    %205 = arith.mulf %204, %204 : vector<16x256xf32>
    %cst_56 = arith.constant dense<0.000000e+00> : vector<16xf32>
    %206 = vector.multi_reduction <add>, %205, %cst_56 [1] : vector<16x256xf32> to vector<16xf32>
    %207 = vector.shape_cast %206 : vector<16xf32> to vector<16x1xf32>
    %cst_57 = arith.constant 2.560000e+02 : f32
    %208 = vector.broadcast %cst_57 : f32 to vector<16x1xf32>
    %209 = arith.divf %207, %208 : vector<16x1xf32>
    %cst_58 = arith.constant 9.99999974E-6 : f32
    %210 = vector.broadcast %cst_58 : f32 to vector<16x1xf32>
    %211 = arith.addf %209, %210 : vector<16x1xf32>
    %212 = math.rsqrt %211 : vector<16x1xf32>
    %213 = vector.broadcast %212 : vector<16x1xf32> to vector<16x256xf32>
    %214 = arith.mulf %204, %213 : vector<16x256xf32>
    %c0_59 = arith.constant 0 : index
    %c0_60 = arith.constant 0 : index
    %215 = vector.load %arg3[%c0_59, %c0_60] : memref<1x256xf32, #tpu.memory_space<vmem>>, vector<1x256xf32>
    %216 = vector.broadcast %215 : vector<1x256xf32> to vector<16x256xf32>
    %217 = arith.mulf %214, %216 : vector<16x256xf32>
    %c0_61 = arith.constant 0 : index
    %c0_62 = arith.constant 0 : index
    %218 = vector.load %arg10[%c0_61, %c0_62] : memref<16x256xf32, #tpu.memory_space<vmem>>, vector<16x256xf32>
    tpu.vector_store %arg10[%c0_61, %c0_62], %204 {strides = array<i32>} : memref<16x256xf32, #tpu.memory_space<vmem>>, vector<16x256xf32>,
    %c0_63 = arith.constant 0 : index
    %c0_64 = arith.constant 0 : index
    %219 = vector.load %arg9[%c0_63, %c0_64] : memref<16x256xf32, #tpu.memory_space<vmem>>, vector<16x256xf32>
    tpu.vector_store %arg9[%c0_63, %c0_64], %217 {strides = array<i32>} : memref<16x256xf32, #tpu.memory_space<vmem>>, vector<16x256xf32>,
    %c0_65 = arith.constant 0 : index
    %c0_66 = arith.constant 0 : index
    %220 = vector.load %arg6[%c0_65, %c0_66] : memref<256x8xf32, #tpu.memory_space<vmem>>, vector<256x8xf32>
    %cst_67 = arith.constant dense<0.000000e+00> : vector<16x8xf32>
    %221 = tpu.matmul %217, %220, %cst_67 {dimension_numbers = #tpu.dot_dimension_numbers<[1], [0], [0], [1], [0, 0, 1, 1], [], []>} : vector<16x256xf32>, vector<256x8xf32>, vector<16x8xf32> -> vector<16x8xf32>
    %cst_68 = arith.constant 3.000000e+01 : f32
    %222 = vector.broadcast %cst_68 : f32 to vector<16x8xf32>
    %223 = arith.divf %221, %222 : vector<16x8xf32>
    %224 = math.tanh %223 : vector<16x8xf32>
    %cst_69 = arith.constant 3.000000e+01 : f32
    %225 = vector.broadcast %cst_69 : f32 to vector<16x8xf32>
    %226 = arith.mulf %225, %224 : vector<16x8xf32>
    %cst_70 = arith.constant dense<0xFF800000> : vector<16xf32>
    %227 = vector.multi_reduction <maximumf>, %226, %cst_70 [1] : vector<16x8xf32> to vector<16xf32>
    %228 = vector.shape_cast %227 : vector<16xf32> to vector<16x1xf32>
    %229 = vector.broadcast %228 : vector<16x1xf32> to vector<16x8xf32>
    %230 = arith.subf %226, %229 : vector<16x8xf32>
    %231 = math.exp %230 : vector<16x8xf32>
    %cst_71 = arith.constant dense<0.000000e+00> : vector<16xf32>
    %232 = vector.multi_reduction <add>, %231, %cst_71 [1] : vector<16x8xf32> to vector<16xf32>
    %233 = vector.shape_cast %232 : vector<16xf32> to vector<16x1xf32>
    %234 = tpu.reciprocal %233 : vector<16x1xf32> -> vector<16x1xf32>
    %235 = vector.broadcast %234 : vector<16x1xf32> to vector<16x8xf32>
    %236 = arith.mulf %231, %235 : vector<16x8xf32>
    %237 = tpu.iota {dimensions = array<i32: 1>} : vector<16x8xi32>
    %cst_72 = arith.constant 0.000000e+00 : f32
    %238 = vector.broadcast %cst_72 : f32 to vector<16x8xf32>
    %cst_73 = arith.constant dense<0xFF800000> : vector<16xf32>
    %239 = vector.multi_reduction <maximumf>, %236, %cst_73 [1] : vector<16x8xf32> to vector<16xf32>
    %240 = vector.shape_cast %239 : vector<16xf32> to vector<16x1xf32>
    %241 = vector.broadcast %240 : vector<16x1xf32> to vector<16x8xf32>
    %242 = arith.cmpf oge, %236, %241 : vector<16x8xf32>
    %c8_i32 = arith.constant 8 : i32
    %243 = vector.broadcast %c8_i32 : i32 to vector<16x8xi32>
    %244 = arith.select %242, %237, %243 : vector<16x8xi1>, vector<16x8xi32>
    %cst_74 = arith.constant dense<2147483647> : vector<16xi32>
    %245 = vector.multi_reduction <minsi>, %244, %cst_74 [1] : vector<16x8xi32> to vector<16xi32>
    %246 = vector.shape_cast %245 : vector<16xi32> to vector<16x1xi32>
    %247 = vector.broadcast %246 : vector<16x1xi32> to vector<16x8xi32>
    %248 = arith.cmpi eq, %237, %247 : vector<16x8xi32>
    %cst_75 = arith.constant 0.000000e+00 : f32
    %249 = vector.broadcast %cst_75 : f32 to vector<16x8xf32>
    %250 = arith.select %248, %236, %249 : vector<16x8xi1>, vector<16x8xf32>
    %251 = arith.addf %238, %250 : vector<16x8xf32>
    %cst_76 = arith.constant 0xFF800000 : f32
    %252 = vector.broadcast %cst_76 : f32 to vector<16x8xf32>
    %253 = arith.select %248, %252, %236 : vector<16x8xi1>, vector<16x8xf32>
    %cst_77 = arith.constant dense<0xFF800000> : vector<16xf32>
    %254 = vector.multi_reduction <maximumf>, %253, %cst_77 [1] : vector<16x8xf32> to vector<16xf32>
    %255 = vector.shape_cast %254 : vector<16xf32> to vector<16x1xf32>
    %256 = vector.broadcast %255 : vector<16x1xf32> to vector<16x8xf32>
    %257 = arith.cmpf oge, %253, %256 : vector<16x8xf32>
    %c8_i32_78 = arith.constant 8 : i32
    %258 = vector.broadcast %c8_i32_78 : i32 to vector<16x8xi32>
    %259 = arith.select %257, %237, %258 : vector<16x8xi1>, vector<16x8xi32>
    %cst_79 = arith.constant dense<2147483647> : vector<16xi32>
    %260 = vector.multi_reduction <minsi>, %259, %cst_79 [1] : vector<16x8xi32> to vector<16xi32>
    %261 = vector.shape_cast %260 : vector<16xi32> to vector<16x1xi32>
    %262 = vector.broadcast %261 : vector<16x1xi32> to vector<16x8xi32>
    %263 = arith.cmpi eq, %237, %262 : vector<16x8xi32>
    %cst_80 = arith.constant 0.000000e+00 : f32
    %264 = vector.broadcast %cst_80 : f32 to vector<16x8xf32>
    %265 = arith.select %263, %236, %264 : vector<16x8xi1>, vector<16x8xf32>
    %266 = arith.addf %251, %265 : vector<16x8xf32>
    %c0_81 = arith.constant 0 : index
    %c0_82 = arith.constant 0 : index
    %267 = vector.load %arg11[%c0_81, %c0_82] : memref<16x8xf32, #tpu.memory_space<vmem>>, vector<16x8xf32>
    tpu.vector_store %arg11[%c0_81, %c0_82], %266 {strides = array<i32>} : memref<16x8xf32, #tpu.memory_space<vmem>>, vector<16x8xf32>,
    return
  }
}

module attributes {stable_mosaic.version = 11 : i64} {
  func.func @_moe_kernel(%arg0: i32, %arg1: i32, %arg2: memref<8xi32, #tpu.memory_space<smem>>, %arg3: memref<1xi32, #tpu.memory_space<smem>>, %arg4: memref<16x256xf32, #tpu.memory_space<vmem>>, %arg5: memref<16x8xf32, #tpu.memory_space<vmem>>, %arg6: memref<1x256x512xbf16, #tpu.memory_space<vmem>>, %arg7: memref<1x256x512xbf16, #tpu.memory_space<vmem>>, %arg8: memref<1x512x256xbf16, #tpu.memory_space<vmem>>, %arg9: memref<1x16x256xf32, #tpu.memory_space<vmem>>) attributes {dimension_semantics = [#tpu.dimension_semantics<parallel>, #tpu.dimension_semantics<arbitrary>], iteration_bounds = array<i64: 2, 4>, scalar_prefetch = 2 : i64, scratch_operands = 0 : i64, tpu.core_type = #tpu.core_type<tc>, window_params = [{pipeline_mode = #tpu.pipeline_mode<synchronous>, transform_indices = @transform_0, window_bounds = array<i64: 16, 256>}, {pipeline_mode = #tpu.pipeline_mode<synchronous>, transform_indices = @transform_1, window_bounds = array<i64: 16, 8>}, {transform_indices = @transform_2, window_bounds = array<i64: 1, 256, 512>}, {transform_indices = @transform_3, window_bounds = array<i64: 1, 256, 512>}, {transform_indices = @transform_4, window_bounds = array<i64: 1, 512, 256>}, {transform_indices = @transform_5, window_bounds = array<i64: 1, 16, 256>}]} {
    %c4_i32 = arith.constant 4 : i32
    %0 = arith.muli %arg0, %c4_i32 : i32
    %1 = arith.addi %0, %arg1 : i32
    %c0_i32 = arith.constant 0 : i32
    %2 = arith.cmpi eq, %arg1, %c0_i32 : i32
    %3 = arith.extui %2 : i1 to i32
    %c0_i32_0 = arith.constant 0 : i32
    %4 = arith.cmpi ne, %3, %c0_i32_0 : i32
    scf.if %4 {
      %cst = arith.constant 0.000000e+00 : f32
      %9 = vector.broadcast %cst : f32 to vector<1x16x256xf32>
      %c0_2 = arith.constant 0 : index
      %c0_3 = arith.constant 0 : index
      %c0_4 = arith.constant 0 : index
      %10 = vector.load %arg9[%c0_2, %c0_3, %c0_4] : memref<1x16x256xf32, #tpu.memory_space<vmem>>, vector<1x16x256xf32>
      tpu.vector_store %arg9[%c0_2, %c0_3, %c0_4], %9 {strides = array<i32>} : memref<1x16x256xf32, #tpu.memory_space<vmem>>, vector<1x16x256xf32>,
    } else {
    }
    %c0 = arith.constant 0 : index
    %5 = memref.load %arg3[%c0] : memref<1xi32, #tpu.memory_space<smem>>
    %6 = arith.cmpi slt, %1, %5 : i32
    %7 = arith.extui %6 : i1 to i32
    %c0_i32_1 = arith.constant 0 : i32
    %8 = arith.cmpi ne, %7, %c0_i32_1 : i32
    scf.if %8 {
      %9 = arith.index_cast %1 : i32 to index
      %10 = memref.load %arg2[%9] : memref<8xi32, #tpu.memory_space<smem>>
      %c0_2 = arith.constant 0 : index
      %c0_3 = arith.constant 0 : index
      %11 = vector.load %arg4[%c0_2, %c0_3] : memref<16x256xf32, #tpu.memory_space<vmem>>, vector<16x256xf32>
      %12 = arith.truncf %11 : vector<16x256xf32> to vector<16x256xbf16>
      %c0_4 = arith.constant 0 : index
      %c0_5 = arith.constant 0 : index
      %c0_6 = arith.constant 0 : index
      %13 = vector.load %arg6[%c0_4, %c0_5, %c0_6] : memref<1x256x512xbf16, #tpu.memory_space<vmem>>, vector<1x256x512xbf16>
      %14 = vector.shape_cast %13 : vector<1x256x512xbf16> to vector<256x512xbf16>
      %cst = arith.constant dense<0.000000e+00> : vector<16x512xf32>
      %15 = tpu.matmul %12, %14, %cst {dimension_numbers = #tpu.dot_dimension_numbers<[1], [0], [0], [1], [0, 0, 1, 1], [], []>} : vector<16x256xbf16>, vector<256x512xbf16>, vector<16x512xf32> -> vector<16x512xf32>
      %c0_7 = arith.constant 0 : index
      %c0_8 = arith.constant 0 : index
      %c0_9 = arith.constant 0 : index
      %16 = vector.load %arg7[%c0_7, %c0_8, %c0_9] : memref<1x256x512xbf16, #tpu.memory_space<vmem>>, vector<1x256x512xbf16>
      %17 = vector.shape_cast %16 : vector<1x256x512xbf16> to vector<256x512xbf16>
      %cst_10 = arith.constant dense<0.000000e+00> : vector<16x512xf32>
      %18 = tpu.matmul %12, %17, %cst_10 {dimension_numbers = #tpu.dot_dimension_numbers<[1], [0], [0], [1], [0, 0, 1, 1], [], []>} : vector<16x256xbf16>, vector<256x512xbf16>, vector<16x512xf32> -> vector<16x512xf32>
      %19 = arith.mulf %15, %15 : vector<16x512xf32>
      %20 = arith.mulf %15, %19 : vector<16x512xf32>
      %cst_11 = arith.constant 4.471500e-02 : f32
      %21 = vector.broadcast %cst_11 : f32 to vector<16x512xf32>
      %22 = arith.mulf %21, %20 : vector<16x512xf32>
      %23 = arith.addf %15, %22 : vector<16x512xf32>
      %cst_12 = arith.constant 0.797884583 : f32
      %24 = vector.broadcast %cst_12 : f32 to vector<16x512xf32>
      %25 = arith.mulf %24, %23 : vector<16x512xf32>
      %26 = math.tanh %25 : vector<16x512xf32>
      %cst_13 = arith.constant 1.000000e+00 : f32
      %27 = vector.broadcast %cst_13 : f32 to vector<16x512xf32>
      %28 = arith.addf %27, %26 : vector<16x512xf32>
      %cst_14 = arith.constant 5.000000e-01 : f32
      %29 = vector.broadcast %cst_14 : f32 to vector<16x512xf32>
      %30 = arith.mulf %29, %28 : vector<16x512xf32>
      %31 = arith.mulf %15, %30 : vector<16x512xf32>
      %32 = arith.mulf %31, %18 : vector<16x512xf32>
      %33 = arith.truncf %32 : vector<16x512xf32> to vector<16x512xbf16>
      %c0_15 = arith.constant 0 : index
      %c0_16 = arith.constant 0 : index
      %c0_17 = arith.constant 0 : index
      %34 = vector.load %arg8[%c0_15, %c0_16, %c0_17] : memref<1x512x256xbf16, #tpu.memory_space<vmem>>, vector<1x512x256xbf16>
      %35 = vector.shape_cast %34 : vector<1x512x256xbf16> to vector<512x256xbf16>
      %cst_18 = arith.constant dense<0.000000e+00> : vector<16x256xf32>
      %36 = tpu.matmul %33, %35, %cst_18 {dimension_numbers = #tpu.dot_dimension_numbers<[1], [0], [0], [1], [0, 0, 1, 1], [], []>} : vector<16x512xbf16>, vector<512x256xbf16>, vector<16x256xf32> -> vector<16x256xf32>
      %37 = tpu.iota {dimensions = array<i32: 1>} : vector<16x8xi32>
      %38 = vector.broadcast %10 : i32 to vector<16x8xi32>
      %39 = arith.cmpi eq, %37, %38 : vector<16x8xi32>
      %c0_19 = arith.constant 0 : index
      %c0_20 = arith.constant 0 : index
      %40 = vector.load %arg5[%c0_19, %c0_20] : memref<16x8xf32, #tpu.memory_space<vmem>>, vector<16x8xf32>
      %cst_21 = arith.constant 0.000000e+00 : f32
      %41 = vector.broadcast %cst_21 : f32 to vector<16x8xf32>
      %42 = arith.select %39, %40, %41 : vector<16x8xi1>, vector<16x8xf32>
      %cst_22 = arith.constant dense<0.000000e+00> : vector<16xf32>
      %43 = vector.multi_reduction <add>, %42, %cst_22 [1] : vector<16x8xf32> to vector<16xf32>
      %44 = vector.shape_cast %43 : vector<16xf32> to vector<16x1xf32>
      %c0_23 = arith.constant 0 : index
      %c0_24 = arith.constant 0 : index
      %c0_25 = arith.constant 0 : index
      %45 = vector.load %arg9[%c0_23, %c0_24, %c0_25] : memref<1x16x256xf32, #tpu.memory_space<vmem>>, vector<1x16x256xf32>
      %46 = vector.shape_cast %45 : vector<1x16x256xf32> to vector<16x256xf32>
      %47 = vector.broadcast %44 : vector<16x1xf32> to vector<16x256xf32>
      %48 = arith.mulf %47, %36 : vector<16x256xf32>
      %49 = arith.addf %46, %48 : vector<16x256xf32>
      %c0_26 = arith.constant 0 : index
      %c0_27 = arith.constant 0 : index
      %c0_28 = arith.constant 0 : index
      %50 = vector.load %arg9[%c0_26, %c0_27, %c0_28] : memref<1x16x256xf32, #tpu.memory_space<vmem>>, vector<1x16x256xf32>
      %51 = vector.shape_cast %50 : vector<1x16x256xf32> to vector<16x256xf32>
      %52 = vector.shape_cast %49 : vector<16x256xf32> to vector<1x16x256xf32>
      tpu.vector_store %arg9[%c0_26, %c0_27, %c0_28], %52 {strides = array<i32>} : memref<1x16x256xf32, #tpu.memory_space<vmem>>, vector<1x16x256xf32>,
    } else {
    }
    return
  }
  func.func @transform_0(%arg0: i32, %arg1: i32, %arg2: memref<8xi32, #tpu.memory_space<smem>>, %arg3: memref<1xi32, #tpu.memory_space<smem>>) -> (i32, i32) {
    %c0_i32 = arith.constant 0 : i32
    %c0_i32_0 = arith.constant 0 : i32
    %c0_i32_1 = arith.constant 0 : i32
    return %c0_i32, %c0_i32_0 : i32, i32
  }
  func.func @transform_1(%arg0: i32, %arg1: i32, %arg2: memref<8xi32, #tpu.memory_space<smem>>, %arg3: memref<1xi32, #tpu.memory_space<smem>>) -> (i32, i32) {
    %c0_i32 = arith.constant 0 : i32
    %c0_i32_0 = arith.constant 0 : i32
    %c0_i32_1 = arith.constant 0 : i32
    return %c0_i32, %c0_i32_0 : i32, i32
  }
  func.func @transform_2(%arg0: i32, %arg1: i32, %arg2: memref<8xi32, #tpu.memory_space<smem>>, %arg3: memref<1xi32, #tpu.memory_space<smem>>) -> (i32, i32, i32) {
    %c4_i32 = arith.constant 4 : i32
    %0 = arith.muli %arg0, %c4_i32 : i32
    %1 = arith.addi %0, %arg1 : i32
    %2 = arith.index_cast %1 : i32 to index
    %3 = memref.load %arg2[%2] : memref<8xi32, #tpu.memory_space<smem>>
    %c0_i32 = arith.constant 0 : i32
    %c0_i32_0 = arith.constant 0 : i32
    %c0_i32_1 = arith.constant 0 : i32
    return %3, %c0_i32, %c0_i32_0 : i32, i32, i32
  }
  func.func @transform_3(%arg0: i32, %arg1: i32, %arg2: memref<8xi32, #tpu.memory_space<smem>>, %arg3: memref<1xi32, #tpu.memory_space<smem>>) -> (i32, i32, i32) {
    %c4_i32 = arith.constant 4 : i32
    %0 = arith.muli %arg0, %c4_i32 : i32
    %1 = arith.addi %0, %arg1 : i32
    %2 = arith.index_cast %1 : i32 to index
    %3 = memref.load %arg2[%2] : memref<8xi32, #tpu.memory_space<smem>>
    %c0_i32 = arith.constant 0 : i32
    %c0_i32_0 = arith.constant 0 : i32
    %c0_i32_1 = arith.constant 0 : i32
    return %3, %c0_i32, %c0_i32_0 : i32, i32, i32
  }
  func.func @transform_4(%arg0: i32, %arg1: i32, %arg2: memref<8xi32, #tpu.memory_space<smem>>, %arg3: memref<1xi32, #tpu.memory_space<smem>>) -> (i32, i32, i32) {
    %c4_i32 = arith.constant 4 : i32
    %0 = arith.muli %arg0, %c4_i32 : i32
    %1 = arith.addi %0, %arg1 : i32
    %2 = arith.index_cast %1 : i32 to index
    %3 = memref.load %arg2[%2] : memref<8xi32, #tpu.memory_space<smem>>
    %c0_i32 = arith.constant 0 : i32
    %c0_i32_0 = arith.constant 0 : i32
    %c0_i32_1 = arith.constant 0 : i32
    return %3, %c0_i32, %c0_i32_0 : i32, i32, i32
  }
  func.func @transform_5(%arg0: i32, %arg1: i32, %arg2: memref<8xi32, #tpu.memory_space<smem>>, %arg3: memref<1xi32, #tpu.memory_space<smem>>) -> (i32, i32, i32) {
    %c0_i32 = arith.constant 0 : i32
    %c0_i32_0 = arith.constant 0 : i32
    %c0_i32_1 = arith.constant 0 : i32
    return %arg0, %c0_i32, %c0_i32_0 : i32, i32, i32
  }
}

</mosaic_0001>

<bundles_post_ra>
// kernel: grok1_decoder_layer.2
= control target key start
LH: loop header
LB: loop body
LE: loop exit
PB: predicated region body
PF: predicated region fallthrough
CT: control target
= control target key end

     0   :  { %17 = vsyncpa [#allocation3], 0  ;;  %s3941_s0 = inlined_call_operand.hbm [shape: f32[16,256], index: 0, kind: input, shape index: {}]   ;;  %s3942_s1 = inlined_call_operand.hbm [shape: f32[1,256], index: 1, kind: input, shape index: {}]   ;;  %s3943_s2 = inlined_call_operand.hbm [shape: f32[1,256], index: 2, kind: input, shape index: {}]   ;;  %s3944_s3 = inlined_call_operand.hbm [shape: f32[1,256], index: 3, kind: input, shape index: {}]   ;;  %s3945_s4 = inlined_call_operand.hbm [shape: bf16[256,512], index: 4, kind: input, shape index: {}]   ;;  %s3946_s5 = inlined_call_operand.hbm [shape: bf16[256,256], index: 5, kind: input, shape index: {}]   ;;  %s3947_s6 = inlined_call_operand.vmem [shape: f32[256,8], index: 6, kind: input, shape index: {}]   ;;  %s3948_s7 = inlined_call_operand.vmem [shape: f32[16,32], index: 7, kind: input, shape index: {}]   ;;  %s3949_s8 = inlined_call_operand.vmem [shape: f32[16,32], index: 8, kind: input, shape index: {}]   ;;  %s3950_s9 = inlined_call_operand.vmem [shape: f32[16,256], index: 9, kind: output, shape index: {0}]   ;;  %s3951_s10 = inlined_call_operand.hbm [shape: f32[16,256], index: 10, kind: output, shape index: {1}]   ;;  %s3952_s11 = inlined_call_operand.vmem [shape: f32[16,8], index: 11, kind: output, shape index: {2}]  }
   0x1   :  { %18 = vsyncpa [#allocation6], 0 }
   0x2   :  { %19 = vsyncpa [#allocation9], 0 }
   0x3   :  { %20 = vsyncpa [#allocation12], 0 }
   0x4   :  { %21 = vsyncpa [#allocation4], 0  ;;  %s3185_s17 = smov [#allocation5]   ;;  %s3186_s19 = smov [#allocation8]  }
   0x5   :  { %s40_s18 = sshll.u32 %s3185_s17, 4  ;;  %s60_s20 = sshll.u32 %s3186_s19, 4  ;;  %s41_s18 = int_to_ptr.vmem [resolvable:$true] %s40_s18  ;;  %s61_s20 = int_to_ptr.vmem [resolvable:$true] %s60_s20 }
   0x6   :  { %s3021_s23 = scalar_lea.hbm %s3942_s1, 32 }
   0x7   :  { %p3022_p0 = scmp.ne.s32.totalorder %s3942_s1, %s3021_s23  ;;  %p3025_p1 = scmp.lt.u32.totalorder %s3021_s23, %s3942_s1 }
   0x9   :  { %p3027_p2 = pnand %p3025_p1, %p3022_p0 }
   0xb   :  { %3030 = shalt.err (!%p3027_p2)
}
   0xc   :  { %s3031_s28 = scalar_lea.vmem %s41_s18, 32  ;;  %p3036_p4 = scmp.lt.s32.totalorder %s41_s18, %s41_s18 }
   0xd   :  { %p3032_p3 = scmp.ne.s32.totalorder %s41_s18, %s3031_s28  ;;  %p3037_p5 = scmp.lt.s32.totalorder %s3031_s28, %s3031_s28 }
   0xf   :  { %p3038_p6 = por %p3037_p5, %p3036_p4 }
  0x11   :  { %p3039_p7 = pnand %p3038_p6, %p3032_p3 }
  0x13   :  { %3042 = shalt.err (!%p3039_p7)
}
  0x14   :  { %43 = dma.hbm_to_vmem [thread:$0]  %s3942_s1, 32, %s41_s18, [#allocation6]  }
  0x15   :  { %s3043_s14 = scalar_lea.hbm %s3944_s3, 32 }
  0x16   :  { %p3044_p8 = scmp.ne.s32.totalorder %s3944_s3, %s3043_s14  ;;  %p3047_p9 = scmp.lt.u32.totalorder %s3043_s14, %s3944_s3 }
  0x18   :  { %p3049_p10 = pnand %p3047_p9, %p3044_p8 }
  0x1a   :  { %3052 = shalt.err (!%p3049_p10)
}
  0x1b   :  { %s3053_s21 = scalar_lea.vmem %s61_s20, 32  ;;  %p3058_p12 = scmp.lt.s32.totalorder %s61_s20, %s61_s20 }
  0x1c   :  { %p3054_p11 = scmp.ne.s32.totalorder %s61_s20, %s3053_s21  ;;  %p3059_p13 = scmp.lt.s32.totalorder %s3053_s21, %s3053_s21 }
  0x1e   :  { %p3060_p0 = por %p3059_p13, %p3058_p12 }
  0x20   :  { %p3061_p1 = pnand %p3060_p0, %p3054_p11 }
  0x22   :  { %3064 = shalt.err (!%p3061_p1)
}
  0x23   :  { %63 = dma.hbm_to_vmem [thread:$0]  %s3944_s3, 32, %s61_s20, [#allocation9]  }
  0x24   :  { %s3187_s22 = smov [#allocation2]   ;;  %s3065_s26 = scalar_lea.hbm %s3941_s0, 512 }
  0x25   :  { %s27_s23 = sshll.u32 %s3187_s22, 4  ;;  %p3066_p2 = scmp.ne.s32.totalorder %s3941_s0, %s3065_s26  ;;  %s28_s23 = int_to_ptr.vmem [resolvable:$true] %s27_s23 }
  0x26   :  { %p3069_p3 = scmp.lt.u32.totalorder %s3065_s26, %s3941_s0 }
  0x28   :  { %p3071_p4 = pnand %p3069_p3, %p3066_p2 }
  0x2a   :  { %3074 = shalt.err (!%p3071_p4)
}
  0x2b   :  { %s3075_s12 = scalar_lea.vmem %s28_s23, 512  ;;  %p3080_p6 = scmp.lt.s32.totalorder %s28_s23, %s28_s23 }
  0x2c   :  { %p3076_p5 = scmp.ne.s32.totalorder %s28_s23, %s3075_s12  ;;  %p3081_p7 = scmp.lt.s32.totalorder %s3075_s12, %s3075_s12 }
  0x2e   :  { %p3082_p8 = por %p3081_p7, %p3080_p6 }
  0x30   :  { %p3083_p9 = pnand %p3082_p8, %p3076_p5 }
  0x32   :  { %3086 = shalt.err (!%p3083_p9)
}
  0x33   :  { %s3188_s3 = smov 256   ;;  %s3189_s20 = smov 16  }
  0x34   :  { %33 = dma.hbm_to_vmem [thread:$0]  %s3941_s0, 512, %s28_s23, [#allocation3], %s3188_s3, %s3188_s3, %s3189_s20  }
  0x35   :  { %s3190_s15 = smov [#allocation7]   ;;  %s3191_s17 = smov [#allocation10]  }
  0x36   :  { %s50_s16 = sshll.u32 %s3190_s15, 4  ;;  %s69_s19 = sshll.u32 %s3191_s17, 4  ;;  %s51_s16 = int_to_ptr.vmem [resolvable:$true] %s50_s16  ;;  %s70_s19 = int_to_ptr.vmem [resolvable:$true] %s69_s19 }
  0x37   :  { %s3087_s18 = scalar_lea.hbm %s3943_s2, 32 }
  0x38   :  { %p3088_p10 = scmp.ne.s32.totalorder %s3943_s2, %s3087_s18  ;;  %p3091_p11 = scmp.lt.u32.totalorder %s3087_s18, %s3943_s2 }
  0x3a   :  { %p3093_p12 = pnand %p3091_p11, %p3088_p10 }
  0x3c   :  { %3096 = shalt.err (!%p3093_p12)
}
  0x3d   :  { %s3097_s0 = scalar_lea.vmem %s51_s16, 32  ;;  %p3102_p0 = scmp.lt.s32.totalorder %s51_s16, %s51_s16 }
  0x3e   :  { %p3098_p13 = scmp.ne.s32.totalorder %s51_s16, %s3097_s0  ;;  %p3103_p1 = scmp.lt.s32.totalorder %s3097_s0, %s3097_s0 }
  0x40   :  { %p3104_p2 = por %p3103_p1, %p3102_p0 }
  0x42   :  { %p3105_p3 = pnand %p3104_p2, %p3098_p13 }
  0x44   :  { %3108 = shalt.err (!%p3105_p3)
}
  0x45   :  { %53 = dma.hbm_to_vmem [thread:$0]  %s3943_s2, 32, %s51_s16, [#allocation6]  }
  0x46   :  { %s3109_s30 = scalar_lea.hbm %s3945_s4, 8192 }
  0x47   :  { %p3110_p4 = scmp.ne.s32.totalorder %s3945_s4, %s3109_s30  ;;  %p3113_p5 = scmp.lt.u32.totalorder %s3109_s30, %s3945_s4 }
  0x49   :  { %p3115_p6 = pnand %p3113_p5, %p3110_p4 }
  0x4b   :  { %3118 = shalt.err (!%p3115_p6)
}
  0x4c   :  { %s3119_s17 = scalar_lea.vmem %s70_s19, 8192  ;;  %p3124_p8 = scmp.lt.s32.totalorder %s70_s19, %s70_s19 }
  0x4d   :  { %p3120_p7 = scmp.ne.s32.totalorder %s70_s19, %s3119_s17  ;;  %p3125_p9 = scmp.lt.s32.totalorder %s3119_s17, %s3119_s17 }
  0x4f   :  { %p3126_p10 = por %p3125_p9, %p3124_p8 }
  0x51   :  { %p3127_p11 = pnand %p3126_p10, %p3120_p7 }
  0x53   :  { %3130 = shalt.err (!%p3127_p11)
}
  0x54   :  { %75 = dma.hbm_to_vmem [thread:$0]  %s3945_s4, 8192, %s70_s19, [#allocation9], %s3188_s3, %s3188_s3, %s3189_s20  }
  0x55   :  { %s3192_s21 = smov [#allocation11]   ;;  %s3131_s24 = scalar_lea.hbm %s3946_s5, 4096 }
  0x56   :  { %s81_s1 = sshll.u32 %s3192_s21, 4  ;;  %p3132_p12 = scmp.ne.s32.totalorder %s3946_s5, %s3131_s24  ;;  %s82_s1 = int_to_ptr.vmem [resolvable:$true] %s81_s1 }
  0x57   :  { %p3135_p13 = scmp.lt.u32.totalorder %s3131_s24, %s3946_s5 }
  0x59   :  { %p3137_p0 = pnand %p3135_p13, %p3132_p12 }
  0x5b   :  { %3140 = shalt.err (!%p3137_p0)
}
  0x5c   :  { %s3141_s27 = scalar_lea.vmem %s82_s1, 4096  ;;  %p3146_p2 = scmp.lt.s32.totalorder %s82_s1, %s82_s1 }
  0x5d   :  { %p3142_p1 = scmp.ne.s32.totalorder %s82_s1, %s3141_s27  ;;  %p3147_p3 = scmp.lt.s32.totalorder %s3141_s27, %s3141_s27 }
  0x5f   :  { %p3148_p4 = por %p3147_p3, %p3146_p2 }
  0x61   :  { %p3149_p5 = pnand %p3148_p4, %p3142_p1 }
  0x63   :  { %3152 = shalt.err (!%p3149_p5)
}
  0x64   :  { %s3193_s4 = smov 128   ;;  %s3194_s19 = smov 8  }
  0x65   :  { %87 = dma.hbm_to_vmem [thread:$0]  %s3946_s5, 4096, %s82_s1, [#allocation12], %s3193_s4, %s3193_s4, %s3194_s19  }
  0x66   :  { %3175 = dma.done.wait [#allocation3], 512  }
  0x67   :  { %3176 = vsyncadd [#allocation3], 4294966784 }
  0x68   :  { %3177 = dma.done.wait [#allocation6], 64  }
  0x69   :  { %3178 = vsyncadd [#allocation6], 4294967232 }
  0x6a   :  { %3179 = dma.done.wait [#allocation9], 8224  }
  0x6b   :  { %3180 = vsyncadd [#allocation9], 4294959072 }
  0x6c   :  { %3181 = dma.done.wait [#allocation12], 4096  }
  0x6d   :  { %3182 = vsyncadd [#allocation12], 4294963200  ;;  %v3338_v0 = vld [vmem:[#allocation2] sm:$0xff]  ;;  %v3340_v1 = vld [vmem:[#allocation2 + $0x8] sm:$0xff]  ;;  %s3195_s14 = smov 96   ;;  %s3196_s15 = smov 64  }
  0x6e   :  { %v3342_v2 = vld [vmem:[#allocation2 + $0x10] sm:$0xff]  ;;  %v117_v3 = vmul.f32 %v3338_v0, %v3338_v0  ;;  %v118_v4 = vmul.f32 %v3340_v1, %v3340_v1  ;;  %v3348_v5 = vld [vmem:[#allocation2 + $0x18] sm:$0xff]  ;;  %v3357_v59 = vld [vmem:[%s3949_s8] sm:$0xff]  ;;  %vm674_vm0 = vcmask 261120   ;;  %vm816_vm1 = vcmask 523264  }
  0x6f   :  { %v119_v6 = vmul.f32 %v3342_v2, %v3342_v2  ;;  %v120_v7 = vmul.f32 %v3348_v5, %v3348_v5  ;;  %v2801_v8 = vld [vmem:[#allocation10 + $0x4] ss:$16 sps:$4 sm:$0xff]   ;;  %v2803_v10 = vld [vmem:[#allocation10 + $0xc] ss:$16 sps:$4 sm:$0xff]   ;;  %v2805_v11 = vld [vmem:[#allocation10] ss:$16 sps:$4 sm:$0xff]   ;;  %685 = vrot.lane.b32.xlu1 %v3357_v59, %s3195_s14 }
  0x70   :  { %v121_v9 = vadd.f32 %v118_v4, %v117_v3  ;;  %v2806_v12 = vld [vmem:[#allocation10 + $0x8] ss:$16 sps:$4 sm:$0xff]   ;;  %540 = vmatprep.subr.bf16.mxu0 %v2801_v8  ;;  %v2807_v13 = vld [vmem:[#allocation10 + $0x24] ss:$16 sps:$4 sm:$0xff]   ;;  %583 = vmatprep.subr.bf16.mxu1 %v2803_v10  ;;  %v2809_v15 = vld [vmem:[#allocation10 + $0x2c] ss:$16 sps:$4 sm:$0xff]  }
  0x71   :  { %v124_v14 = vadd.f32 %v120_v7, %v119_v6  ;;  %541 = vmatpush1.bf16.msra.mxu0 %v2805_v11  ;;  %584 = vmatpush1.bf16.msra.mxu1 %v2806_v12  ;;  %v2811_v16 = vld [vmem:[#allocation10 + $0x20] ss:$16 sps:$4 sm:$0xff]   ;;  %v2812_v17 = vld [vmem:[#allocation10 + $0x28] ss:$16 sps:$4 sm:$0xff]   ;;  %v2813_v18 = vld [vmem:[#allocation10 + $0x44] ss:$16 sps:$4 sm:$0xff]  }
  0x72   :  { %122 = vadd.xlane.f32.xlu0 %v121_v9  ;;  %542 = vmatprep.subr.bf16.mxu0 %v2807_v13  ;;  %v2815_v19 = vld [vmem:[#allocation10 + $0x4c] ss:$16 sps:$4 sm:$0xff]   ;;  %v2817_v20 = vld [vmem:[#allocation10 + $0x40] ss:$16 sps:$4 sm:$0xff]   ;;  %v2818_v21 = vld [vmem:[#allocation10 + $0x48] ss:$16 sps:$4 sm:$0xff]  }
  0x73   :  { %585 = vmatprep.subr.bf16.mxu1 %v2809_v15  ;;  %v2819_v22 = vld [vmem:[#allocation10 + $0x64] ss:$16 sps:$4 sm:$0xff]   ;;  %v2821_v23 = vld [vmem:[#allocation10 + $0x6c] ss:$16 sps:$4 sm:$0xff]   ;;  %v2823_v24 = vld [vmem:[#allocation10 + $0x60] ss:$16 sps:$4 sm:$0xff]  }
  0x74   :  { %v2824_v25 = vld [vmem:[#allocation10 + $0x68] ss:$16 sps:$4 sm:$0xff]   ;;  %v2825_v26 = vld [vmem:[#allocation10 + $0x84] ss:$16 sps:$4 sm:$0xff]   ;;  %v2827_v27 = vld [vmem:[#allocation10 + $0x8c] ss:$16 sps:$4 sm:$0xff]  }
  0x75   :  { %543 = vmatpush1.bf16.msra.mxu0 %v2811_v16  ;;  %586 = vmatpush1.bf16.msra.mxu1 %v2812_v17  ;;  %v2829_v28 = vld [vmem:[#allocation10 + $0x80] ss:$16 sps:$4 sm:$0xff]   ;;  %v2830_v29 = vld [vmem:[#allocation10 + $0x88] ss:$16 sps:$4 sm:$0xff]   ;;  %v2831_v30 = vld [vmem:[#allocation10 + $0xa4] ss:$16 sps:$4 sm:$0xff]  }
  0x76   :  { %125 = vadd.xlane.f32.xlu0 %v124_v14  ;;  %544 = vmatprep.subr.bf16.mxu0 %v2813_v18  ;;  %v2833_v31 = vld [vmem:[#allocation10 + $0xac] ss:$16 sps:$4 sm:$0xff]   ;;  %v2835_v32 = vld [vmem:[#allocation10 + $0xa0] ss:$16 sps:$4 sm:$0xff]   ;;  %v2836_v33 = vld [vmem:[#allocation10 + $0xa8] ss:$16 sps:$4 sm:$0xff]  }
  0x77   :  { %587 = vmatprep.subr.bf16.mxu1 %v2815_v19  ;;  %v2837_v34 = vld [vmem:[#allocation10 + $0xc4] ss:$16 sps:$4 sm:$0xff]   ;;  %v2839_v35 = vld [vmem:[#allocation10 + $0xcc] ss:$16 sps:$4 sm:$0xff]   ;;  %v2841_v36 = vld [vmem:[#allocation10 + $0xc0] ss:$16 sps:$4 sm:$0xff]  }
  0x78   :  { %v2842_v37 = vld [vmem:[#allocation10 + $0xc8] ss:$16 sps:$4 sm:$0xff]   ;;  %v2843_v38 = vld [vmem:[#allocation10 + $0xe4] ss:$16 sps:$4 sm:$0xff]   ;;  %v2845_v39 = vld [vmem:[#allocation10 + $0xec] ss:$16 sps:$4 sm:$0xff]  }
  0x79   :  { %545 = vmatpush1.bf16.msra.mxu0 %v2817_v20  ;;  %588 = vmatpush1.bf16.msra.mxu1 %v2818_v21  ;;  %v2847_v40 = vld [vmem:[#allocation10 + $0xe0] ss:$16 sps:$4 sm:$0xff]   ;;  %v2848_v41 = vld [vmem:[#allocation10 + $0xe8] ss:$16 sps:$4 sm:$0xff]   ;;  %v2849_v42 = vld [vmem:[#allocation10 + $0x104] ss:$16 sps:$4 sm:$0xff]  }
  0x7a   :  { %546 = vmatprep.subr.bf16.mxu0 %v2819_v22  ;;  %589 = vmatprep.subr.bf16.mxu1 %v2821_v23  ;;  %v2851_v43 = vld [vmem:[#allocation10 + $0x10c] ss:$16 sps:$4 sm:$0xff]   ;;  %v2853_v44 = vld [vmem:[#allocation10 + $0x100] ss:$16 sps:$4 sm:$0xff]   ;;  %v2854_v45 = vld [vmem:[#allocation10 + $0x108] ss:$16 sps:$4 sm:$0xff]   ;;  %v140_v23 = vlaneseq }
  0x7b   :  { %v2855_v46 = vld [vmem:[#allocation10 + $0x124] ss:$16 sps:$4 sm:$0xff]   ;;  %v2857_v47 = vld [vmem:[#allocation10 + $0x12c] ss:$16 sps:$4 sm:$0xff]   ;;  %v2859_v48 = vld [vmem:[#allocation10 + $0x120] ss:$16 sps:$4 sm:$0xff]  }
  0x7c   :  { %v2860_v49 = vld [vmem:[#allocation10 + $0x128] ss:$16 sps:$4 sm:$0xff]   ;;  %v2861_v50 = vld [vmem:[#allocation10 + $0x144] ss:$16 sps:$4 sm:$0xff]   ;;  %v2863_v51 = vld [vmem:[#allocation10 + $0x14c] ss:$16 sps:$4 sm:$0xff]  }
  0x7d   :  { %547 = vmatpush1.bf16.msra.mxu0 %v2823_v24  ;;  %590 = vmatpush1.bf16.msra.mxu1 %v2824_v25  ;;  %v2865_v52 = vld [vmem:[#allocation10 + $0x140] ss:$16 sps:$4 sm:$0xff]   ;;  %v2866_v53 = vld [vmem:[#allocation10 + $0x148] ss:$16 sps:$4 sm:$0xff]   ;;  %v2867_v54 = vld [vmem:[#allocation10 + $0x164] ss:$16 sps:$4 sm:$0xff]  }
  0x7e   :  { %548 = vmatprep.subr.bf16.mxu0 %v2825_v26  ;;  %591 = vmatprep.subr.bf16.mxu1 %v2827_v27  ;;  %v2869_v55 = vld [vmem:[#allocation10 + $0x16c] ss:$16 sps:$4 sm:$0xff]   ;;  %v2871_v56 = vld [vmem:[#allocation10 + $0x160] ss:$16 sps:$4 sm:$0xff]   ;;  %v2872_v57 = vld [vmem:[#allocation10 + $0x168] ss:$16 sps:$4 sm:$0xff]  }
  0x7f   :  { %v2873_v58 = vld [vmem:[#allocation10 + $0x184] ss:$16 sps:$4 sm:$0xff]   ;;  %v2875_v60 = vld [vmem:[#allocation10 + $0x18c] ss:$16 sps:$4 sm:$0xff]   ;;  %v2877_v62 = vld [vmem:[#allocation10 + $0x180] ss:$16 sps:$4 sm:$0xff]  }
  0x80   :  { %v3362_v61 = vld [vmem:[%s3949_s8 + $0x8] sm:$0xff]  ;;  %v2881_v4 = vld [vmem:[#allocation10 + $0x1ac] ss:$16 sps:$4 sm:$0xff]   ;;  %s3197_s8 = smov 32   ;;  %v3395_v25 = vshrl.u32 %v140_v23, 7  ;;  %vm3559_vm2 = vmpackc.low %vm816_vm1, %vm816_vm1  ;;  %vm915_vm4 = vcmask 130048  }
  0x81   :  { %549 = vmatpush1.bf16.msra.mxu0 %v2829_v28  ;;  %592 = vmatpush1.bf16.msra.mxu1 %v2830_v29  ;;  %v2878_v63 = vld [vmem:[#allocation10 + $0x188] ss:$16 sps:$4 sm:$0xff]   ;;  %v2879_v3 = vld [vmem:[#allocation10 + $0x1a4] ss:$16 sps:$4 sm:$0xff]   ;;  %v2883_v7 = vld [vmem:[#allocation10 + $0x1a0] ss:$16 sps:$4 sm:$0xff]  }
  0x82   :  { %550 = vmatprep.subr.bf16.mxu0 %v2831_v30  ;;  %593 = vmatprep.subr.bf16.mxu1 %v2833_v31  ;;  %v3371_v6 = vld [vmem:[%s3948_s7 + $0x8] sm:$0xff]  ;;  %v2887_v10 = vld [vmem:[#allocation10 + $0x1cc] ss:$16 sps:$4 sm:$0xff]   ;;  %v3398_v26 = vsub.s32 0, %v3395_v25  ;;  %v3401_v27 = vsub.s32 1, %v3395_v25  ;;  %vm2290_vm6 = vcmask 64512  }
  0x83   :  { %v2884_v8 = vld [vmem:[#allocation10 + $0x1a8] ss:$16 sps:$4 sm:$0xff]   ;;  %687 = vrot.lane.b32.xlu1 %v3362_v61, %s3195_s14  ;;  %v2885_v9 = vld [vmem:[#allocation10 + $0x1c4] ss:$16 sps:$4 sm:$0xff]   ;;  %v2889_v11 = vld [vmem:[#allocation10 + $0x1c0] ss:$16 sps:$4 sm:$0xff]  }
  0x84   :  { %v2890_v12 = vld [vmem:[#allocation10 + $0x1c8] ss:$16 sps:$4 sm:$0xff]   ;;  %v2891_v13 = vld [vmem:[#allocation10 + $0x1e4] ss:$16 sps:$4 sm:$0xff]   ;;  %v2893_v14 = vld [vmem:[#allocation10 + $0x1ec] ss:$16 sps:$4 sm:$0xff]  }
  0x85   :  { %551 = vmatpush1.bf16.msra.mxu0 %v2835_v32  ;;  %594 = vmatpush1.bf16.msra.mxu1 %v2836_v33  ;;  %v2895_v15 = vld [vmem:[#allocation10 + $0x1e0] ss:$16 sps:$4 sm:$0xff]   ;;  %v2896_v16 = vld [vmem:[#allocation10 + $0x1e8] ss:$16 sps:$4 sm:$0xff]  }
  0x86   :  { %552 = vmatprep.subr.bf16.mxu0 %v2837_v34  ;;  %595 = vmatprep.subr.bf16.mxu1 %v2839_v35  ;;  %v3386_v17 = vld [vmem:[%s3948_s7] sm:$0xff] }
  0x87   :  { %713 = vrot.lane.b32.xlu1 %v3362_v61, %s3196_s15  ;;  %v138_v29 = vld [vmem:[#allocation5] sm:$0x3] }
  0x88   :  { %v143_v31 = vrot.slane %v138_v29, %v3398_v26  ;;  %v147_v32 = vrot.slane %v138_v29, %v3401_v27 }
  0x89   :  { %553 = vmatpush1.bf16.msra.mxu0 %v2841_v36  ;;  %596 = vmatpush1.bf16.msra.mxu1 %v2842_v37 }
  0x8a   :  { %554 = vmatprep.subr.bf16.mxu0 %v2843_v38  ;;  %597 = vmatprep.subr.bf16.mxu1 %v2845_v39 }
  0x8b   :  { %634 = vrot.lane.b32.xlu1 %v3357_v59, %s3197_s8 }
  0x8c   :  { %711 = vrot.lane.b32.xlu0 %v3357_v59, %s3196_s15 }
  0x8d   :  { %555 = vmatpush1.bf16.msra.mxu0 %v2847_v40  ;;  %598 = vmatpush1.bf16.msra.mxu1 %v2848_v41 }
  0x8e   :  { %556 = vmatprep.subr.bf16.mxu0 %v2849_v42  ;;  %599 = vmatprep.subr.bf16.mxu1 %v2851_v43 }
  0x8f   :  { %636 = vrot.lane.b32.xlu1 %v3362_v61, %s3197_s8 }
  0x90   :  { %705 = vrot.lane.b32.xlu0 %v3371_v6, %s3195_s14 }
  0x91   :  { %557 = vmatpush1.bf16.msra.mxu0 %v2853_v44  ;;  %600 = vmatpush1.bf16.msra.mxu1 %v2854_v45 }
  0x92   :  { %558 = vmatprep.subr.bf16.mxu0 %v2855_v46  ;;  %601 = vmatprep.subr.bf16.mxu1 %v2857_v47 }
  0x93   :  { %677 = vrot.lane.b32.xlu1 %v3386_v17, %s3196_s15 }
  0x95   :  { %559 = vmatpush1.bf16.msra.mxu0 %v2859_v48  ;;  %602 = vmatpush1.bf16.msra.mxu1 %v2860_v49 }
  0x96   :  { %560 = vmatprep.subr.bf16.mxu0 %v2861_v50  ;;  %603 = vmatprep.subr.bf16.mxu1 %v2863_v51 }
  0x97   :  { %679 = vrot.lane.b32.xlu1 %v3371_v6, %s3196_s15 }
  0x99   :  { %561 = vmatpush1.bf16.msra.mxu0 %v2865_v52  ;;  %604 = vmatpush1.bf16.msra.mxu1 %v2866_v53 }
  0x9a   :  { %562 = vmatprep.subr.bf16.mxu0 %v2867_v54  ;;  %605 = vmatprep.subr.bf16.mxu1 %v2869_v55 }
  0x9b   :  { %703 = vrot.lane.b32.xlu1 %v3386_v17, %s3195_s14 }
  0x9d   :  { %563 = vmatpush1.bf16.msra.mxu0 %v2871_v56  ;;  %606 = vmatpush1.bf16.msra.mxu1 %v2872_v57 }
  0x9e   :  { %564 = vmatprep.subr.bf16.mxu0 %v2873_v58  ;;  %607 = vmatprep.subr.bf16.mxu1 %v2875_v60 }
  0xa1   :  { %565 = vmatpush1.bf16.msra.mxu0 %v2877_v62  ;;  %608 = vmatpush1.bf16.msra.mxu1 %v2878_v63 }
  0xa2   :  { %566 = vmatprep.subr.bf16.mxu0 %v2879_v3  ;;  %609 = vmatprep.subr.bf16.mxu1 %v2881_v4 }
  0xa5   :  { %567 = vmatpush1.bf16.msra.mxu0 %v2883_v7  ;;  %610 = vmatpush1.bf16.msra.mxu1 %v2884_v8 }
  0xa6   :  { %568 = vmatprep.subr.bf16.mxu0 %v2885_v9  ;;  %611 = vmatprep.subr.bf16.mxu1 %v2887_v10 }
  0xa9   :  { %569 = vmatpush1.bf16.msra.mxu0 %v2889_v11  ;;  %612 = vmatpush1.bf16.msra.mxu1 %v2890_v12 }
  0xaa   :  { %570 = vmatprep.subr.bf16.mxu0 %v2891_v13  ;;  %613 = vmatprep.subr.bf16.mxu1 %v2893_v14 }
  0xad   :  { %571 = vmatpush1.bf16.msra.mxu0 %v2895_v15  ;;  %614 = vmatpush1.bf16.msra.mxu1 %v2896_v16 }
  0xff   :  { %v123_v18 = vpop.xlane.xlu0 %122 }
 0x100   :  { %v128_v19 = vmul.f32 0.00390625, %v123_v18 }
 0x102   :  { %v130_v20 = vadd.f32 1e-05, %v128_v19 }
 0x103   :  { %v126_v21 = vpop.xlane.xlu0 %125 }
 0x104   :  { %2945 = vrsqrt.f32 %v130_v20  ;;  %v129_v22 = vmul.f32 0.00390625, %v126_v21 }
 0x106   :  { %v131_v24 = vadd.f32 1e-05, %v129_v22 }
 0x108   :  { %2947 = vrsqrt.f32 %v131_v24 }
 0x10e   :  { %v2946_v28 = vpop.eup %2945 }
 0x10f   :  { %v135_v30 = vmul.f32 %v2946_v28, %v3340_v1  ;;  %v134_v33 = vmul.f32 %v2946_v28, %v3338_v0  ;;  %v3409_v1 = vpop.permute.xlu1 %685  ;;  %v3413_v0 = vpop.permute.xlu0 %711 }
 0x111   :  { %v151_v37 = vmul.f32 %v147_v32, %v135_v30  ;;  %v150_v39 = vmul.f32 %v143_v31, %v134_v33 }
 0x112   :  { %v2948_v34 = vpop.eup %2947 }
 0x113   :  { %v137_v35 = vmul.f32 %v2948_v34, %v3348_v5  ;;  %v136_v36 = vmul.f32 %v2948_v34, %v3342_v2  ;;  %v3411_v43 = vpop.permute.xlu1 %687  ;;  %v3504_v18 = vpop.permute.xlu0 %705 }
 0x115   :  { %v153_v38 = vmul.f32 %v147_v32, %v137_v35  ;;  %v152_v40 = vmul.f32 %v143_v31, %v136_v36 }
 0x117   :  { %v155_v41 = vpack.c.bf16 %v153_v38, %v151_v37  ;;  %v154_v42 = vpack.c.bf16 %v152_v40, %v150_v39  ;;  %v3450_v56 = vpop.permute.xlu1 %713 }
 0x119   :  { %572 = vmatprep.mubr.bf16.mxu0 %v155_v41  ;;  %615 = vmatprep.mubr.bf16.mxu1 %v155_v41 }
 0x11a   :  { %573 = vmatmul.mubr.bf16.vlgmr.msra.gmra.mrb[0].mxu0 %v154_v42  ;;  %616 = vmatmul.mubr.bf16.vlgmr.msra.gmra.mrb[0].mxu1 %v154_v42 }
 0x11b   :  { %v3462_v62 = vpop.permute.xlu1 %634 }
 0x11f   :  { %v3470_v3 = vpop.permute.xlu1 %636 }
 0x123   :  { %v3498_v14 = vpop.permute.xlu1 %677 }
 0x127   :  { %v3500_v15 = vpop.permute.xlu1 %679 }
 0x12b   :  { %v3502_v16 = vpop.permute.xlu1 %703 }
 0x1ed   :  { %v3415_v44 = vpop.f32.mrb[0].mxu0  ;;  %v3417_v5 = vpop.f32.mrb[0].mxu1 }
 0x1ee   :  { %v3419_v2 = vpop.f32.mrb[1].mxu0  ;;  %v3421_v45 = vpop.f32.mrb[1].mxu1  ;;  %v691_v46 = vmul.f32 %v3409_v1, %v3417_v5  ;;  %v1036_v47 = vmul.f32 %v3413_v0, %v3415_v44  ;;  %v717_v55 = vmul.f32 %v3413_v0, %v3417_v5  ;;  %v1022_v58 = vmul.f32 %v3409_v1, %v3415_v44 }
 0x1ef   :  { %v3427_v48 = vpop.f32.mrb[2].mxu0  ;;  %v3429_v49 = vpop.f32.mrb[2].mxu1  ;;  %v640_v7 = vmul.f32 %v3462_v62, %v3417_v5  ;;  %v662_v9 = vmul.f32 %v3357_v59, %v3417_v5  ;;  %v802_v10 = vmul.f32 %v3357_v59, %v3415_v44  ;;  %v788_v11 = vmul.f32 %v3462_v62, %v3415_v44 }
 0x1f0   :  { %695 = vrot.lane.b32.xlu1 %v691_v46, %s3195_s14  ;;  %v3432_v50 = vpop.f32.mrb[3].mxu0  ;;  %v3434_v51 = vpop.f32.mrb[3].mxu1  ;;  %1040 = vrot.lane.b32.xlu0 %v1036_v47, %s3197_s8  ;;  %v692_v54 = vmul.f32 %v3411_v43, %v3429_v49  ;;  %v718_v57 = vmul.f32 %v3450_v56, %v3429_v49  ;;  %v1037_v60 = vmul.f32 %v3450_v56, %v3427_v48 }
 0x1f1   :  { %v2796_v52 = vpack.i.bf16 %v3434_v51, %v3421_v45  ;;  %v3441_v53 = vpack.c.bf16 %v3434_v51, %v3421_v45  ;;  %v1023_v63 = vmul.f32 %v3411_v43, %v3427_v48  ;;  %v641_v4 = vmul.f32 %v3470_v3, %v3429_v49 }
 0x1f2   :  { %v663_v8 = vmul.f32 %v3362_v61, %v3429_v49  ;;  %v803_v12 = vmul.f32 %v3362_v61, %v3427_v48  ;;  %v789_v13 = vmul.f32 %v3470_v3, %v3427_v48  ;;  %v1034_v19 = vmul.f32 %v3502_v16, %v3415_v44 }
 0x1f3   :  { %2694 = vmatprep.subr.bf16.mxu1 %v3441_v53  ;;  %v683_v24 = vmul.f32 %v3498_v14, %v3417_v5  ;;  %v684_v28 = vmul.f32 %v3500_v15, %v3429_v49  ;;  %v709_v33 = vmul.f32 %v3502_v16, %v3417_v5  ;;  %v710_v35 = vmul.f32 %v3504_v18, %v3429_v49 }
 0x1f4   :  { %2696 = vmatpush3.bf16.msra.mxu1 %v3441_v53  ;;  %697 = vrot.lane.b32.xlu0 %v692_v54, %s3195_s14  ;;  %v1020_v36 = vmul.f32 %v3498_v14, %v3415_v44  ;;  %v1035_v54 = vmul.f32 %v3504_v18, %v3427_v48  ;;  %v1777_v45 = vmul.f32 %v3504_v18, %v3432_v50 }
 0x1f5   :  { %721 = vrot.lane.b32.xlu1 %v717_v55, %s3197_s8  ;;  %2704 = vmatprep.subr.bf16.mxu1 %v3441_v53 }
 0x1f8   :  { %723 = vrot.lane.b32.xlu0 %v718_v57, %s3197_s8  ;;  %v1021_v57 = vmul.f32 %v3500_v15, %v3427_v48 }
 0x1f9   :  { %1026 = vrot.lane.b32.xlu1 %v1022_v58, %s3195_s14 }
 0x1fc   :  { %1042 = vrot.lane.b32.xlu0 %v1037_v60, %s3197_s8 }
 0x1fd   :  { %1028 = vrot.lane.b32.xlu1 %v1023_v63, %s3195_s14 }
 0x200   :  { %656 = vrot.lane.b32.xlu0 %v3371_v6, %s3197_s8 }
 0x201   :  { %654 = vrot.lane.b32.xlu1 %v3386_v17, %s3197_s8 }
 0x204   :  { %646 = vrot.lane.b32.xlu0 %v641_v4, %s3195_s14 }
 0x205   :  { %644 = vrot.lane.b32.xlu1 %v640_v7, %s3195_s14 }
 0x208   :  { %668 = vrot.lane.b32.xlu0 %v663_v8, %s3197_s8  ;;  %v1449_v8 = vmul.f32 %v3357_v59, %v3419_v2  ;;  %v630_v59 = vmul.f32 %v3386_v17, %v3417_v5 }
 0x209   :  { %666 = vrot.lane.b32.xlu1 %v662_v9, %s3197_s8 }
 0x20c   :  { %806 = vrot.lane.b32.xlu0 %v802_v10, %s3197_s8 }
 0x20d   :  { %792 = vrot.lane.b32.xlu1 %v788_v11, %s3195_s14  ;;  %v1435_v11 = vmul.f32 %v3462_v62, %v3419_v2 }
 0x210   :  { %808 = vrot.lane.b32.xlu0 %v803_v12, %s3197_s8  ;;  %v631_v12 = vmul.f32 %v3371_v6, %v3429_v49 }
 0x211   :  { %794 = vrot.lane.b32.xlu1 %v789_v13, %s3195_s14 }
 0x262   :  { %v696_v20 = vpop.permute.xlu1 %695  ;;  %v1041_v21 = vpop.permute.xlu0 %1040 }
 0x263   :  { %v1046_v22 = vadd.f32 %v1041_v21, %v1034_v19  ;;  %v701_v30 = vsub.f32 %v683_v24, %v696_v20  ;;  %v1450_v19 = vmul.f32 %v3362_v61, %v3432_v50  ;;  %v1436_v61 = vmul.f32 %v3470_v3, %v3432_v50 }
 0x265   :  { %1058 = vrot.lane.b32.xlu0 %v1046_v22, %s3196_s15 }
 0x266   :  { %v698_v29 = vpop.permute.xlu0 %697 }
 0x267   :  { %v722_v31 = vpop.permute.xlu1 %721  ;;  %v702_v32 = vsub.f32 %v684_v28, %v698_v29 }
 0x268   :  { %v727_v38 = vadd.f32 %v722_v31, %v709_v33 }
 0x269   :  { %v2786_v34 = vpack.i.bf16 %v702_v32, %v701_v30 }
 0x26a   :  { %v724_v37 = vpop.permute.xlu0 %723 }
 0x26b   :  { %v1027_v39 = vpop.permute.xlu1 %1026  ;;  %v728_v40 = vadd.f32 %v724_v37, %v710_v35 }
 0x26c   :  { %v1032_v41 = vsub.f32 %v1020_v36, %v1027_v39 }
 0x26d   :  { %v2791_v42 = vpack.i.bf16 %v728_v40, %v727_v38 }
 0x26e   :  { %1050 = vrot.lane.b32.xlu1 %v1032_v41, %s3196_s15  ;;  %v1043_v46 = vpop.permute.xlu0 %1042 }
 0x26f   :  { %v1029_v47 = vpop.permute.xlu1 %1028  ;;  %2792 = vrot.lane.b32.xlu0 %v2791_v42, %s3196_s15  ;;  %v1047_v55 = vadd.f32 %v1043_v46, %v1035_v54 }
 0x270   :  { %v1033_v4 = vsub.f32 %v1021_v57, %v1029_v47 }
 0x272   :  { %2787 = vrot.lane.b32.xlu1 %v2786_v34, %s3196_s15  ;;  %v657_v58 = vpop.permute.xlu0 %656 }
 0x273   :  { %v655_v60 = vpop.permute.xlu1 %654  ;;  %1060 = vrot.lane.b32.xlu0 %v1047_v55, %s3196_s15  ;;  %v3528_v63 = vmul.f32 %v657_v58, %v3432_v50  ;;  %v661_v13 = vmul.f32 %v657_v58, %v3429_v49  ;;  %v801_v38 = vmul.f32 %v657_v58, %v3427_v48 }
 0x274   :  { %v3531_v7 = vmul.f32 %v655_v60, %v3419_v2  ;;  %v660_v20 = vmul.f32 %v655_v60, %v3417_v5  ;;  %v800_v30 = vmul.f32 %v655_v60, %v3415_v44  ;;  %v786_v5 = vmul.f32 %v3386_v17, %v3415_v44 }
 0x275   :  { %v787_v44 = vmul.f32 %v3371_v6, %v3427_v48 }
 0x276   :  { %1052 = vrot.lane.b32.xlu1 %v1033_v4, %s3196_s15  ;;  %v647_v9 = vpop.permute.xlu0 %646 }
 0x277   :  { %v645_v10 = vpop.permute.xlu1 %644  ;;  %1453 = vrot.lane.b32.xlu0 %v1449_v8, %s3197_s8  ;;  %v651_v22 = vsub.f32 %v631_v12, %v647_v9 }
 0x278   :  { %v650_v28 = vsub.f32 %v630_v59, %v645_v10 }
 0x27a   :  { %1439 = vrot.lane.b32.xlu1 %v1435_v11, %s3195_s14  ;;  %v669_v21 = vpop.permute.xlu0 %668 }
 0x27b   :  { %v667_v24 = vpop.permute.xlu1 %666  ;;  %v673_v62 = vadd.f32 %v669_v21, %v661_v13  ;;  %1455 = vrot.lane.b32.xlu0 %v1450_v19, %s3197_s8 }
 0x27c   :  { %v672_v49 = vadd.f32 %v667_v24, %v660_v20  ;;  %v1433_v20 = vmul.f32 %v3386_v17, %v3419_v2 }
 0x27d   :  { %v676_v29 = vsel %vm674_vm0, %v651_v22, %v673_v62 }
 0x27e   :  { %v675_v31 = vsel %vm674_vm0, %v650_v28, %v672_v49  ;;  %1441 = vrot.lane.b32.xlu1 %v1436_v61, %s3195_s14  ;;  %v807_v32 = vpop.permute.xlu0 %806  ;;  %v1434_v28 = vmul.f32 %v3371_v6, %v3432_v50 }
 0x27f   :  { %v2687_v34 = vpack.c.bf16 %v676_v29, %v675_v31  ;;  %v793_v3 = vpop.permute.xlu1 %792  ;;  %v812_v35 = vadd.f32 %v807_v32, %v800_v30 }
 0x280   :  { %v798_v36 = vsub.f32 %v786_v5, %v793_v3 }
 0x281   :  { %2689 = vmatprep.subr.msk.bf16.mxu0 %vm3559_vm2, %v2687_v34 }
 0x282   :  { %2692 = vmatpush3.bf16.xpose.msk.msra.mxu0 %vm3559_vm2, %v2687_v34  ;;  %v814_v37 = vsel %vm674_vm0, %v798_v36, %v812_v35  ;;  %v809_v39 = vpop.permute.xlu0 %808 }
 0x283   :  { %v795_v40 = vpop.permute.xlu1 %794  ;;  %2635 = vmatprep.mubr.msk.f32.mxu0 %vm816_vm1, %v814_v37  ;;  %2699 = vmatprep.subr.msk.bf16.mxu0 %vm3559_vm2, %v2687_v34  ;;  %v813_v42 = vadd.f32 %v809_v39, %v801_v38  ;;  %v3610_v37 = vadd.s32 8, %v3395_v25 }
 0x284   :  { %v799_v41 = vsub.f32 %v787_v44, %v795_v40 }
 0x286   :  { %v815_v46 = vsel %vm674_vm0, %v799_v41, %v813_v42 }
 0x289   :  { %2636 = vmatmul.mubr.msk.f32.vlgmr.msra.gmra.mrb[4].mxu0 %vm816_vm1, %v815_v46 }
 0x28a   :  { %2702 = vmatpush3.bf16.xpose.msk.msra.mxu0 %vm3559_vm2, %v2687_v34 }
 0x2d7   :  { %v1059_v47 = vpop.permute.xlu0 %1058 }
 0x2e0   :  { %v1051_v54 = vpop.permute.xlu1 %1050 }
 0x2e1   :  { %v1064_v48 = vsel %vm674_vm0, %v1051_v54, %v1059_v47  ;;  %v2793_v55 = vpop.permute.xlu0 %2792  ;;  %v1778_v54 = vmul.f32 %v3413_v0, %v3419_v2 }
 0x2e2   :  { %2649 = vmatprep.mubr.msk.f32.mxu0 %vm816_vm1, %v1064_v48  ;;  %v2795_v58 = vunpack.i.h.bf16 %v2793_v55  ;;  %v2794_v60 = vunpack.i.l.bf16 %v2793_v55  ;;  %v1764_v48 = vmul.f32 %v3409_v1, %v3419_v2  ;;  %v1765_v55 = vmul.f32 %v3411_v43, %v3432_v50 }
 0x2e4   :  { %v2788_v57 = vpop.permute.xlu1 %2787 }
 0x2e5   :  { %v2790_v4 = vunpack.i.h.bf16 %v2788_v57  ;;  %v2789_v8 = vunpack.i.l.bf16 %v2788_v57  ;;  %v1061_v9 = vpop.permute.xlu0 %1060  ;;  %v1779_v57 = vmul.f32 %v3450_v56, %v3432_v50 }
 0x2e7   :  { %v745_v10 = vsel %vm674_vm0, %v2789_v8, %v2794_v60  ;;  %v746_v11 = vsel %vm674_vm0, %v2790_v4, %v2795_v58  ;;  %v1762_v8 = vmul.f32 %v3498_v14, %v3419_v2 }
 0x2e8   :  { %v3582_v12 = vpack.c.bf16 %v746_v11, %v745_v10  ;;  %v1053_v13 = vpop.permute.xlu1 %1052  ;;  %v1776_v10 = vmul.f32 %v3502_v16, %v3419_v2 }
 0x2e9   :  { %v1065_v19 = vsel %vm674_vm0, %v1053_v13, %v1061_v9  ;;  %v1454_v59 = vpop.permute.xlu0 %1453 }
 0x2ea   :  { %2650 = vmatmul.mubr.msk.f32.vlgmr.msra.gmra.mrb[6].mxu0 %vm816_vm1, %v1065_v19  ;;  %2709 = vmatprep.subr.msk.bf16.mxu0 %vm3559_vm2, %v3582_v12  ;;  %v1459_v22 = vadd.f32 %v1454_v59, %v3531_v7 }
 0x2eb   :  { %2712 = vmatpush3.bf16.xpose.msk.msra.mxu0 %vm3559_vm2, %v3582_v12 }
 0x2ec   :  { %v1440_v21 = vpop.permute.xlu1 %1439 }
 0x2ed   :  { %v1445_v24 = vsub.f32 %v1433_v20, %v1440_v21  ;;  %v1456_v62 = vpop.permute.xlu0 %1455  ;;  %v1763_v20 = vmul.f32 %v3500_v15, %v3432_v50 }
 0x2ee   :  { %v1460_v29 = vadd.f32 %v1456_v62, %v3528_v63  ;;  %v3607_v63 = vand.u32 127, %v140_v23 }
 0x2ef   :  { %v1461_v49 = vsel %vm674_vm0, %v1445_v24, %v1459_v22 }
 0x2f0   :  { %v1442_v61 = vpop.permute.xlu1 %1441  ;;  %2663 = vmatprep.mubr.msk.f32.mxu0 %vm816_vm1, %v1461_v49  ;;  %vm753_vm3 = vcmp.le.s32.totalorder %v3607_v63, %v3610_v37  ;;  %vm752_vm5 = vcmp.le.s32.totalorder %v3607_v63, %v3395_v25 }
 0x2f1   :  { %v1446_v30 = vsub.f32 %v1434_v28, %v1442_v61 }
 0x2f3   :  { %v1462_v31 = vsel %vm674_vm0, %v1446_v30, %v1460_v29 }
 0x2f4   :  { %2664 = vmatmul.mubr.msk.f32.vlgmr.msra.gmra.mrb[8].mxu0 %vm816_vm1, %v1462_v31 }
 0x35c   :  { %v3602_v17 = vpop.f32.mrb[4].mxu0 }
 0x35d   :  { %v895_v7 = vpop.f32.mrb[5].mxu0 }
 0x35e   :  { %v904_v21 = vmul.f32 0.125, %v895_v7 }
 0x360   :  { %v907_v24 = vmul.f32 0.033333335, %v904_v21 }
 0x3bd   :  { %v3604_v5 = vpop.f32.mrb[6].mxu0 }
 0x3be   :  { %v1138_v32 = vpop.f32.mrb[7].mxu0  ;;  %v1148_v28 = vmul.f32 0.125, %v3604_v5 }
 0x3bf   :  { %v1147_v62 = vmul.f32 0.125, %v1138_v32  ;;  %v905_v32 = vmul.f32 0.125, %v3602_v17 }
 0x3c0   :  { %v1150_v15 = vmul.f32 0.033333335, %v1148_v28 }
 0x3c1   :  { %v1149_v49 = vmul.f32 0.033333335, %v1147_v62 }
 0x3c7   :  { %v2665_v34 = vpop.f32.mrb[8].mxu0 }
 0x3c8   :  { %v1551_v6 = vmul.f32 0.125, %v2665_v34  ;;  %v1541_v3 = vpop.f32.mrb[9].mxu0 }
 0x3c9   :  { %v1550_v35 = vmul.f32 0.125, %v1541_v3 }
 0x3ca   :  { %v1553_v36 = vmul.f32 0.033333335, %v1551_v6  ;;  %v908_v6 = vmul.f32 0.033333335, %v905_v32 }
 0x3cb   :  { %v1552_v44 = vmul.f32 0.033333335, %v1550_v35 }
 0x3cc   :  { %2949 = vtanh.f32 %v1553_v36 }
 0x3cd   :  { %2951 = vtanh.f32 %v1552_v44 }
 0x3d6   :  { %v2950_v38 = vpop.eup %2949 }
 0x3d7   :  { %v2952_v39 = vpop.eup %2951  ;;  %v1557_v40 = vmul.f32 30.0, %v2950_v38 }
 0x3d8   :  { %v1556_v41 = vmul.f32 30.0, %v2952_v39 }
 0x3d9   :  { %v1559_v42 = vsel %vm753_vm3, %v1557_v40, -inf }
 0x3da   :  { %v1563_v23 = vsel %vm915_vm4, %v1559_v42, -inf  ;;  %v1558_v46 = vsel %vm752_vm5, %v1556_v41, -inf }
 0x3db   :  { %1564 = vmax.xlane.f32.xlu0 %v1563_v23  ;;  %v1560_v47 = vsel %vm915_vm4, %v1558_v46, -inf }
 0x3dc   :  { %1561 = vmax.xlane.f32.xlu1 %v1560_v47 }
 0x3ed   :  { %1782 = vrot.lane.b32.xlu1 %v1778_v54, %s3197_s8 }
 0x3f1   :  { %1768 = vrot.lane.b32.xlu0 %v1764_v48, %s3195_s14  ;;  %1770 = vrot.lane.b32.xlu1 %v1765_v55, %s3195_s14 }
 0x3f5   :  { %1784 = vrot.lane.b32.xlu0 %v1779_v57, %s3197_s8 }
 0x468   :  { %v1565_v58 = vpop.xlane.xlu0 %1564 }
 0x469   :  { %v1567_v60 = vsub.f32 %v1559_v42, %v1565_v58  ;;  %v1562_v0 = vpop.xlane.xlu1 %1561 }
 0x46a   :  { %v1566_v19 = vsub.f32 %v1558_v46, %v1562_v0 }
 0x46b   :  { %v1570_v4 = vmul.f32 1.442695, %v1567_v60 }
 0x46c   :  { %v1769_v1 = vpop.permute.xlu0 %1768  ;;  %v1568_v14 = vmul.f32 1.442695, %v1566_v19 }
 0x46d   :  { %2953 = vpow2.f32 %v1570_v4  ;;  %v1774_v9 = vsub.f32 %v1762_v8, %v1769_v1  ;;  %v1783_v43 = vpop.permute.xlu1 %1782 }
 0x46e   :  { %v1788_v11 = vadd.f32 %v1783_v43, %v1776_v10  ;;  %2955 = vpow2.f32 %v1568_v14 }
 0x46f   :  { %1792 = vrot.lane.b32.xlu1 %v1774_v9, %s3196_s15  ;;  %2957 = vtanh.f32 %v907_v24 }
 0x470   :  { %2959 = vtanh.f32 %v1149_v49  ;;  %v1785_v61 = vpop.permute.xlu0 %1784 }
 0x471   :  { %v1771_v59 = vpop.permute.xlu1 %1770  ;;  %2961 = vtanh.f32 %v1150_v15  ;;  %v1789_v51 = vadd.f32 %v1785_v61, %v1777_v45 }
 0x472   :  { %v1775_v2 = vsub.f32 %v1763_v20, %v1771_v59  ;;  %2963 = vtanh.f32 %v908_v6 }
 0x473   :  { %1800 = vrot.lane.b32.xlu1 %v1788_v11, %s3196_s15 }
 0x477   :  { %v3642_v56 = vpop.eup %2953 }
 0x478   :  { %v1575_v13 = vsel %vm915_vm4, %v3642_v56, 0.0  ;;  %v2956_v16 = vpop.eup %2955 }
 0x479   :  { %1576 = vadd.xlane.f32.xlu0 %v1575_v13  ;;  %v1572_v22 = vsel %vm915_vm4, %v2956_v16, 0.0 }
 0x48f   :  { %2797 = vrot.lane.b32.xlu0 %v2796_v52, %s3196_s15  ;;  %v2958_v52 = vpop.eup %2957 }
 0x490   :  { %v911_v29 = vmul.f32 30.0, %v2958_v52  ;;  %v2960_v30 = vpop.eup %2959 }
 0x491   :  { %v1153_v7 = vmul.f32 30.0, %v2960_v30  ;;  %v2962_v5 = vpop.eup %2961 }
 0x492   :  { %v3661_v31 = vsel %vm752_vm5, %v911_v29, -inf  ;;  %v1154_v18 = vmul.f32 30.0, %v2962_v5  ;;  %v2964_v36 = vpop.eup %2963 }
 0x493   :  { %1794 = vrot.lane.b32.xlu0 %v1775_v2, %s3196_s15  ;;  %v916_v34 = vsel %vm915_vm4, %v3661_v31, -inf  ;;  %v3669_v50 = vsel %vm752_vm5, %v1153_v7, -inf  ;;  %v912_v44 = vmul.f32 30.0, %v2964_v36 }
 0x494   :  { %v1157_v3 = vsel %vm915_vm4, %v3669_v50, -inf  ;;  %v1156_v35 = vsel %vm753_vm3, %v1154_v18, -inf }
 0x495   :  { %v1160_v17 = vsel %vm915_vm4, %v1156_v35, -inf  ;;  %v914_v38 = vsel %vm753_vm3, %v912_v44, -inf }
 0x496   :  { %v919_v39 = vsel %vm915_vm4, %v914_v38, -inf }
 0x497   :  { %1573 = vadd.xlane.f32.xlu1 %v1572_v22 }
 0x4a8   :  { %1802 = vrot.lane.b32.xlu1 %v1789_v51, %s3196_s15 }
 0x4b2   :  { %917 = vmax.xlane.f32.xlu0 %v916_v34 }
 0x4b6   :  { %1158 = vmax.xlane.f32.xlu0 %v1157_v3 }
 0x4ba   :  { %1161 = vmax.xlane.f32.xlu0 %v1160_v17 }
 0x4cc   :  { %920 = vmax.xlane.f32.xlu1 %v919_v39 }
 0x4e1   :  { %v1793_v47 = vpop.permute.xlu1 %1792 }
 0x4e5   :  { %v1801_v54 = vpop.permute.xlu1 %1800 }
 0x4e6   :  { %v1806_v0 = vsel %vm674_vm0, %v1793_v47, %v1801_v54 }
 0x506   :  { %v1577_v40 = vpop.xlane.xlu0 %1576 }
 0x507   :  { %2965 = vrcp.f32 %v1577_v40 }
 0x50a   :  { %v2798_v41 = vpop.permute.xlu0 %2797 }
 0x50b   :  { %v2800_v42 = vunpack.i.h.bf16 %v2798_v41  ;;  %v2799_v23 = vunpack.i.l.bf16 %v2798_v41 }
 0x50d   :  { %v2713_v46 = vpack.c.bf16 %v2800_v42, %v2799_v23 }
 0x50e   :  { %v1795_v8 = vpop.permute.xlu0 %1794 }
 0x50f   :  { %2714 = vmatprep.subr.bf16.mxu0 %v2713_v46 }
 0x510   :  { %2716 = vmatpush3.bf16.msra.mxu0 %v2713_v46 }
 0x511   :  { %2719 = vmatprep.subr.msk.bf16.mxu0 %vm3559_vm2, %v3582_v12  ;;  %v2966_v55 = vpop.eup %2965 }
 0x512   :  { %v1581_v60 = vmul.f32 %v2966_v55, %v3642_v56 }
 0x524   :  { %v1574_v48 = vpop.xlane.xlu1 %1573 }
 0x525   :  { %2967 = vrcp.f32 %v1574_v48 }
 0x528   :  { %v1803_v4 = vpop.permute.xlu1 %1802 }
 0x529   :  { %v1807_v1 = vsel %vm674_vm0, %v1795_v8, %v1803_v4 }
 0x52f   :  { %v2968_v57 = vpop.eup %2967 }
 0x530   :  { %v1580_v58 = vmul.f32 %v2968_v57, %v2956_v16 }
 0x532   :  { %2670 = vmatprep.mubr.msk.f32.mxu0 %vm915_vm4, %v1580_v58 }
 0x533   :  { %2671 = vmatmul.mubr.msk.f32.vlgmr.msra.gmra.mrb[10].mxu0 %vm915_vm4, %v1581_v60 }
 0x534   :  { %2722 = vmatpush3.bf16.xpose.msk.msra.mxu0 %vm3559_vm2, %v3582_v12  ;;  %2677 = vmatprep.mubr.msk.f32.mxu0 %vm816_vm1, %v1806_v0 }
 0x535   :  { %2724 = vmatprep.subr.bf16.mxu0 %v2713_v46 }
 0x53b   :  { %2678 = vmatmul.mubr.msk.f32.vlgmr.msra.gmra.mrb[12].mxu0 %vm816_vm1, %v1807_v1  ;;  %v2897_v1 = vld [vmem:[#allocation11 + $0x40] ss:$8 sps:$4 sm:$0xff]  }
 0x53c   :  { %2726 = vmatpush3.bf16.msra.mxu0 %v2713_v46 }
 0x53f   :  { %v918_v9 = vpop.xlane.xlu0 %917 }
 0x540   :  { %v922_v20 = vsub.f32 %v3661_v31, %v918_v9  ;;  %v2899_v9 = vld [vmem:[#allocation11 + $0x44] ss:$8 sps:$4 sm:$0xff]  }
 0x542   :  { %v924_v62 = vmul.f32 1.442695, %v922_v20 }
 0x543   :  { %v1159_v33 = vpop.xlane.xlu0 %1158 }
 0x544   :  { %v1163_v28 = vsub.f32 %v3669_v50, %v1159_v33  ;;  %v2902_v33 = vld [vmem:[#allocation11 + $0x54] ss:$8 sps:$4 sm:$0xff]  }
 0x546   :  { %v1165_v15 = vmul.f32 1.442695, %v1163_v28 }
 0x547   :  { %v1162_v2 = vpop.xlane.xlu0 %1161 }
 0x548   :  { %v1164_v22 = vsub.f32 %v1156_v35, %v1162_v2 }
 0x54a   :  { %v1167_v49 = vmul.f32 1.442695, %v1164_v22 }
 0x559   :  { %v921_v12 = vpop.xlane.xlu1 %920 }
 0x55a   :  { %v923_v14 = vsub.f32 %v914_v38, %v921_v12  ;;  %v2900_v12 = vld [vmem:[#allocation11 + $0x50] ss:$8 sps:$4 sm:$0xff]  }
 0x55c   :  { %v926_v24 = vmul.f32 1.442695, %v923_v14  ;;  %v2908_v14 = vld [vmem:[#allocation11 + $0x74] ss:$8 sps:$4 sm:$0xff]  }
 0x606   :  { %v3694_v43 = vpop.f32.mrb[10].mxu0 }
 0x607   :  { %v3696_v10 = vpop.f32.mrb[11].mxu0 }
 0x608   :  { %v1671_v11 = vpack.c.bf16 %v3694_v43, %v3696_v10 }
 0x60e   :  { %v2679_v56 = vpop.f32.mrb[12].mxu0 }
 0x60f   :  { %v1890_v13 = vmul.f32 0.125, %v2679_v56  ;;  %v1880_v19 = vpop.f32.mrb[13].mxu0  ;;  %v2905_v56 = vld [vmem:[#allocation11 + $0x64] ss:$8 sps:$4 sm:$0xff]  }
 0x610   :  { %v1889_v59 = vmul.f32 0.125, %v1880_v19  ;;  %v2906_v19 = vld [vmem:[#allocation11 + $0x70] ss:$8 sps:$4 sm:$0xff]  }
 0x611   :  { %v1892_v16 = vmul.f32 0.033333335, %v1890_v13  ;;  %v2903_v13 = vld [vmem:[#allocation11 + $0x60] ss:$8 sps:$4 sm:$0xff]  }
 0x612   :  { %v1891_v21 = vmul.f32 0.033333335, %v1889_v59  ;;  %v3198_v59 = vmov 0  }
 0x613   :  { %2969 = vtanh.f32 %v1892_v16 }
 0x614   :  { %2971 = vtanh.f32 %v1891_v21 }
 0x615   :  { %2973 = vpow2.f32 %v926_v24 }
 0x616   :  { %2975 = vpow2.f32 %v924_v62 }
 0x617   :  { %2977 = vpow2.f32 %v1167_v49 }
 0x618   :  { %2979 = vpow2.f32 %v1165_v15 }
 0x61d   :  { %v2970_v61 = vpop.eup %2969 }
 0x61e   :  { %v2972_v45 = vpop.eup %2971  ;;  %v1896_v51 = vmul.f32 30.0, %v2970_v61 }
 0x61f   :  { %v1895_v52 = vmul.f32 30.0, %v2972_v45  ;;  %v2974_v7 = vpop.eup %2973  ;;  %v2909_v45 = vld [vmem:[#allocation11] ss:$8 sps:$4 sm:$0xff]  }
 0x620   :  { %v1898_v29 = vsel %vm753_vm3, %v1896_v51, -inf  ;;  %v2976_v32 = vpop.eup %2975  ;;  %v931_v34 = vsel %vm915_vm4, %v2974_v7, 0.0 }
 0x621   :  { %v1902_v30 = vsel %vm915_vm4, %v1898_v29, -inf  ;;  %v1897_v31 = vsel %vm752_vm5, %v1895_v52, -inf  ;;  %v2978_v50 = vpop.eup %2977  ;;  %v928_v18 = vsel %vm915_vm4, %v2976_v32, 0.0  ;;  %v2914_v52 = vld [vmem:[#allocation11 + $0x14] ss:$8 sps:$4 sm:$0xff]  }
 0x622   :  { %1903 = vmax.xlane.f32.xlu0 %v1902_v30  ;;  %v1899_v5 = vsel %vm915_vm4, %v1897_v31, -inf  ;;  %v2980_v37 = vpop.eup %2979  ;;  %v1172_v6 = vsel %vm915_vm4, %v2978_v50, 0.0  ;;  %v2917_v30 = vld [vmem:[#allocation11 + $0x24] ss:$8 sps:$4 sm:$0xff]  }
 0x623   :  { %1900 = vmax.xlane.f32.xlu1 %v1899_v5  ;;  %v1169_v25 = vsel %vm915_vm4, %v2980_v37, 0.0  ;;  %v2918_v5 = vld [vmem:[#allocation11 + $0x30] ss:$8 sps:$4 sm:$0xff]  }
 0x626   :  { %932 = vadd.xlane.f32.xlu0 %v931_v34  ;;  %v2921_v34 = vld [vmem:[#allocation11 + $0x80] ss:$8 sps:$4 sm:$0xff]  }
 0x627   :  { %929 = vadd.xlane.f32.xlu1 %v928_v18  ;;  %v2924_v18 = vld [vmem:[#allocation11 + $0x90] ss:$8 sps:$4 sm:$0xff]  }
 0x62a   :  { %1173 = vadd.xlane.f32.xlu0 %v1172_v6  ;;  %v2927_v6 = vld [vmem:[#allocation11 + $0xa0] ss:$8 sps:$4 sm:$0xff]  }
 0x62b   :  { %1170 = vadd.xlane.f32.xlu1 %v1169_v25  ;;  %v2932_v25 = vld [vmem:[#allocation11 + $0xb4] ss:$8 sps:$4 sm:$0xff]  }
 0x6af   :  { %v1904_v3 = vpop.xlane.xlu0 %1903 }
 0x6b0   :  { %v1906_v35 = vsub.f32 %v1898_v29, %v1904_v3  ;;  %v1901_v17 = vpop.xlane.xlu1 %1900  ;;  %v2912_v29 = vld [vmem:[#allocation11 + $0x10] ss:$8 sps:$4 sm:$0xff]  }
 0x6b1   :  { %v1905_v36 = vsub.f32 %v1897_v31, %v1901_v17  ;;  %v2915_v31 = vld [vmem:[#allocation11 + $0x20] ss:$8 sps:$4 sm:$0xff]   ;;  %v2930_v3 = vld [vmem:[#allocation11 + $0xb0] ss:$8 sps:$4 sm:$0xff]  }
 0x6b2   :  { %v1909_v44 = vmul.f32 1.442695, %v1906_v35  ;;  %v2935_v35 = vld [vmem:[#allocation11 + $0xc4] ss:$8 sps:$4 sm:$0xff]   ;;  %v2933_v17 = vld [vmem:[#allocation11 + $0xc0] ss:$8 sps:$4 sm:$0xff]  }
 0x6b3   :  { %v1907_v38 = vmul.f32 1.442695, %v1905_v36  ;;  %v933_v39 = vpop.xlane.xlu0 %932  ;;  %v2938_v36 = vld [vmem:[#allocation11 + $0xd4] ss:$8 sps:$4 sm:$0xff]  }
 0x6b4   :  { %2981 = vpow2.f32 %v1909_v44  ;;  %v930_v40 = vpop.xlane.xlu1 %929  ;;  %v2936_v44 = vld [vmem:[#allocation11 + $0xd0] ss:$8 sps:$4 sm:$0xff]  }
 0x6b5   :  { %2983 = vpow2.f32 %v1907_v38  ;;  %v2941_v38 = vld [vmem:[#allocation11 + $0xe4] ss:$8 sps:$4 sm:$0xff]  }
 0x6b6   :  { %2985 = vrcp.f32 %v933_v39  ;;  %v2939_v39 = vld [vmem:[#allocation11 + $0xe0] ss:$8 sps:$4 sm:$0xff]  }
 0x6b7   :  { %2987 = vrcp.f32 %v930_v40  ;;  %v1174_v41 = vpop.xlane.xlu0 %1173  ;;  %v2944_v40 = vld [vmem:[#allocation11 + $0xf4] ss:$8 sps:$4 sm:$0xff]  }
 0x6b8   :  { %v1171_v42 = vpop.xlane.xlu1 %1170 }
 0x6b9   :  { %2989 = vrcp.f32 %v1171_v42 }
 0x6ba   :  { %2991 = vrcp.f32 %v1174_v41  ;;  %v2942_v41 = vld [vmem:[#allocation11 + $0xf0] ss:$8 sps:$4 sm:$0xff]  }
 0x6be   :  { %v2982_v23 = vpop.eup %2981 }
 0x6bf   :  { %v2984_v46 = vpop.eup %2983  ;;  %v1914_v47 = vsel %vm915_vm4, %v2982_v23, 0.0 }
 0x6c0   :  { %v2986_v54 = vpop.eup %2985  ;;  %1915 = vadd.xlane.f32.xlu0 %v1914_v47  ;;  %v1911_v48 = vsel %vm915_vm4, %v2984_v46, 0.0 }
 0x6c1   :  { %v2988_v55 = vpop.eup %2987  ;;  %1912 = vadd.xlane.f32.xlu1 %v1911_v48  ;;  %v937_v60 = vmul.f32 %v2986_v54, %v2974_v7  ;;  %v2920_v7 = vld [vmem:[#allocation11 + $0x34] ss:$8 sps:$4 sm:$0xff]  }
 0x6c2   :  { %v936_v57 = vmul.f32 %v2988_v55, %v2976_v32  ;;  %v2923_v32 = vld [vmem:[#allocation11 + $0x84] ss:$8 sps:$4 sm:$0xff]  }
 0x6c3   :  { %v2990_v58 = vpop.eup %2989 }
 0x6c4   :  { %v2992_v0 = vpop.eup %2991  ;;  %2642 = vmatprep.mubr.msk.f32.mxu1 %vm915_vm4, %v936_v57  ;;  %v1177_v4 = vmul.f32 %v2990_v58, %v2980_v37  ;;  %v2929_v37 = vld [vmem:[#allocation11 + $0xa4] ss:$8 sps:$4 sm:$0xff]  }
 0x6c5   :  { %2643 = vmatmul.mubr.msk.f32.vlgmr.msra.gmra.mrb[4].mxu1 %vm915_vm4, %v937_v60  ;;  %v1178_v8 = vmul.f32 %v2992_v0, %v2978_v50  ;;  %v2926_v50 = vld [vmem:[#allocation11 + $0x94] ss:$8 sps:$4 sm:$0xff]  }
 0x6c6   :  { %2706 = vmatpush3.bf16.msra.mxu1 %v3441_v53  ;;  %2656 = vmatprep.mubr.msk.f32.mxu1 %vm915_vm4, %v1177_v4  ;;  %v2911_v53 = vld [vmem:[#allocation11 + $0x4] ss:$8 sps:$4 sm:$0xff]   ;;  %v2193_v0 = vld [vmem:[%s3947_s6 + $0x80] sm:$0xff] }
 0x6c7   :  { %1304 = vmatprep.subr.bf16.mxu1 %v2899_v9  ;;  %v2194_v4 = vld [vmem:[%s3947_s6 + $0x88] sm:$0xff] }
 0x6c8   :  { %v2178_v9 = vld [vmem:[%s3947_s6 + $0x8] sm:$0xff] }
 0x6c9   :  { %2657 = vmatmul.mubr.msk.f32.vlgmr.msra.gmra.mrb[6].mxu1 %vm915_vm4, %v1178_v8  ;;  %v2177_v8 = vld [vmem:[%s3947_s6] sm:$0xff] }
 0x6ca   :  { %1305 = vmatpush1.bf16.msra.mxu1 %v2897_v1  ;;  %1336 = vmatprep.mubr.bf16.mxu1 %v3198_v59  ;;  %v2727_v1 = vpack.c.bf16 %v2194_v4, %v2193_v0  ;;  %v2186_v0 = vld [vmem:[%s3947_s6 + $0x48] sm:$0xff]  ;;  %v2203_v4 = vld [vmem:[%s3947_s6 + $0xd0] sm:$0xff] }
 0x6cb   :  { %1306 = vmatprep.subr.bf16.mxu1 %v2902_v33  ;;  %v2195_v33 = vld [vmem:[%s3947_s6 + $0x90] sm:$0xff] }
 0x6cc   :  { %2728 = vmatprep.subr.bf16.mxu0 %v2727_v1 }
 0x6ce   :  { %1307 = vmatpush1.bf16.msra.mxu1 %v2900_v12  ;;  %v2196_v12 = vld [vmem:[%s3947_s6 + $0x98] sm:$0xff] }
 0x6cf   :  { %1308 = vmatprep.subr.bf16.mxu1 %v2905_v56  ;;  %v2729_v56 = vpack.c.bf16 %v2178_v9, %v2177_v8  ;;  %v2204_v8 = vld [vmem:[%s3947_s6 + $0xd8] sm:$0xff] }
 0x6d0   :  { %v2747_v9 = vpack.c.bf16 %v2204_v8, %v2203_v4 }
 0x6d2   :  { %1309 = vmatpush1.bf16.msra.mxu1 %v2903_v13  ;;  %v2731_v13 = vpack.c.bf16 %v2196_v12, %v2195_v33  ;;  %v2187_v33 = vld [vmem:[%s3947_s6 + $0x50] sm:$0xff]  ;;  %v2188_v12 = vld [vmem:[%s3947_s6 + $0x58] sm:$0xff] }
 0x6d3   :  { %1310 = vmatprep.subr.bf16.mxu1 %v2908_v14  ;;  %v2180_v14 = vld [vmem:[%s3947_s6 + $0x18] sm:$0xff] }
 0x6d6   :  { %1311 = vmatpush1.bf16.msra.mxu1 %v2906_v19  ;;  %v2179_v19 = vld [vmem:[%s3947_s6 + $0x10] sm:$0xff] }
 0x6d7   :  { %1390 = vmatprep.subr.bf16.mxu1 %v2911_v53  ;;  %v2197_v53 = vld [vmem:[%s3947_s6 + $0xa0] sm:$0xff] }
 0x74d   :  { %v1916_v20 = vpop.xlane.xlu0 %1915 }
 0x74e   :  { %2993 = vrcp.f32 %v1916_v20  ;;  %v1913_v2 = vpop.xlane.xlu1 %1912  ;;  %v2733_v20 = vpack.c.bf16 %v2180_v14, %v2179_v19  ;;  %v2749_v19 = vpack.c.bf16 %v2188_v12, %v2187_v33 }
 0x74f   :  { %2995 = vrcp.f32 %v1913_v2 }
 0x758   :  { %v2994_v16 = vpop.eup %2993 }
 0x759   :  { %v2996_v21 = vpop.eup %2995  ;;  %v1920_v24 = vmul.f32 %v2994_v16, %v2982_v23  ;;  %v2181_v16 = vld [vmem:[%s3947_s6 + $0x20] sm:$0xff] }
 0x75a   :  { %v1919_v22 = vmul.f32 %v2996_v21, %v2984_v46  ;;  %v2182_v21 = vld [vmem:[%s3947_s6 + $0x28] sm:$0xff] }
 0x75c   :  { %2684 = vmatprep.mubr.msk.f32.mxu0 %vm915_vm4, %v1919_v22  ;;  %v2737_v22 = vpack.c.bf16 %v2182_v21, %v2181_v16 }
 0x75d   :  { %2685 = vmatmul.mubr.msk.f32.vlgmr.msra.gmra.mrb[14].mxu0 %vm915_vm4, %v1920_v24 }
 0x75e   :  { %2730 = vmatpush3.bf16.msra.mxu0 %v2729_v56  ;;  %v2205_v56 = vld [vmem:[%s3947_s6 + $0xe0] sm:$0xff] }
 0x75f   :  { %2732 = vmatprep.subr.bf16.mxu0 %v2731_v13  ;;  %v2206_v13 = vld [vmem:[%s3947_s6 + $0xe8] sm:$0xff] }
 0x760   :  { %v2751_v14 = vpack.c.bf16 %v2206_v13, %v2205_v56 }
 0x762   :  { %2734 = vmatpush3.bf16.msra.mxu0 %v2733_v20  ;;  %v2207_v20 = vld [vmem:[%s3947_s6 + $0xf0] sm:$0xff] }
 0x798   :  { %v2644_v62 = vpop.f32.mrb[4].mxu1 }
 0x799   :  { %v1010_v28 = vpop.f32.mrb[5].mxu1 }
 0x79a   :  { %v1019_v49 = vpack.c.bf16 %v2644_v62, %v1010_v28 }
 0x79c   :  { %v2658_v15 = vpop.f32.mrb[6].mxu1 }
 0x79d   :  { %v1251_v61 = vpop.f32.mrb[7].mxu1 }
 0x79e   :  { %v1260_v51 = vpack.c.bf16 %v2658_v15, %v1251_v61 }
 0x7a0   :  { %2521 = vmatmul.mubr.msk.bf16.vlgmr.msra.gmra.mrb[8].mxu1 %vm816_vm1, %v1260_v51 }
 0x7a1   :  { %1391 = vmatpush1.bf16.msra.mxu1 %v2909_v45  ;;  %1422 = vmatprep.mubr.bf16.mxu1 %v3198_v59  ;;  %v2113_v45 = vld [vmem:[#allocation7] sm:$0x3] }
 0x7a2   :  { %1392 = vmatprep.subr.bf16.mxu1 %v2914_v52  ;;  %v2118_v51 = vrot.slane %v2113_v45, %v3398_v26  ;;  %v2122_v52 = vrot.slane %v2113_v45, %v3401_v27 }
 0x7a5   :  { %1393 = vmatpush1.bf16.msra.mxu1 %v2912_v29 }
 0x7a6   :  { %1394 = vmatprep.subr.bf16.mxu1 %v2917_v30 }
 0x7a9   :  { %1395 = vmatpush1.bf16.msra.mxu1 %v2915_v31 }
 0x7aa   :  { %1396 = vmatprep.subr.bf16.mxu1 %v2920_v7 }
 0x7ad   :  { %1397 = vmatpush1.bf16.msra.mxu1 %v2918_v5 }
 0x7ae   :  { %1715 = vmatprep.subr.bf16.mxu1 %v2923_v32 }
 0x7b0   :  { %2530 = vmatmul.mubr.msk.bf16.vlgmr.msra.gmra.mrb[8].mxu1 %vm816_vm1, %v1019_v49 }
 0x7b1   :  { %1716 = vmatpush1.bf16.msra.mxu1 %v2921_v34  ;;  %1747 = vmatprep.mubr.bf16.mxu1 %v3198_v59 }
 0x7b2   :  { %1717 = vmatprep.subr.bf16.mxu1 %v2926_v50 }
 0x7b5   :  { %1718 = vmatpush1.bf16.msra.mxu1 %v2924_v18  ;;  %v3017_v18 = vld [vmem:[#allocation2] sm:$0xff] }
 0x7b6   :  { %1719 = vmatprep.subr.bf16.mxu1 %v2929_v37 }
 0x7b9   :  { %1720 = vmatpush1.bf16.msra.mxu1 %v2927_v6  ;;  %v3018_v6 = vld [vmem:[#allocation2 + $0x8] sm:$0xff] }
 0x7ba   :  { %1721 = vmatprep.subr.bf16.mxu1 %v2932_v25 }
 0x7bd   :  { %1722 = vmatpush1.bf16.msra.mxu1 %v2930_v3 }
 0x7be   :  { %2046 = vmatprep.subr.bf16.mxu1 %v2935_v35 }
 0x7c0   :  { %2545 = vmatmul.mubr.msk.bf16.vlgmr.msra.gmra.mrb[8].mxu1 %vm816_vm1, %v1671_v11 }
 0x7c1   :  { %2047 = vmatpush1.bf16.msra.mxu1 %v2933_v17  ;;  %2078 = vmatprep.mubr.bf16.mxu1 %v3198_v59  ;;  %v2198_v59 = vld [vmem:[%s3947_s6 + $0xa8] sm:$0xff] }
 0x7c2   :  { %2048 = vmatprep.subr.bf16.mxu1 %v2938_v36  ;;  %v2735_v2 = vpack.c.bf16 %v2198_v59, %v2197_v53  ;;  %v2189_v53 = vld [vmem:[%s3947_s6 + $0x60] sm:$0xff]  ;;  %v2190_v59 = vld [vmem:[%s3947_s6 + $0x68] sm:$0xff] }
 0x7c3   :  { %v2753_v16 = vpack.c.bf16 %v2190_v59, %v2189_v53 }
 0x7c4   :  { %2736 = vmatprep.subr.bf16.mxu0 %v2735_v2  ;;  %v2208_v2 = vld [vmem:[%s3947_s6 + $0xf8] sm:$0xff] }
 0x7c5   :  { %2049 = vmatpush1.bf16.msra.mxu1 %v2936_v44  ;;  %2738 = vmatpush3.bf16.msra.mxu0 %v2737_v22  ;;  %v3019_v44 = vld [vmem:[#allocation2 + $0x10] sm:$0xff]  ;;  %v2755_v21 = vpack.c.bf16 %v2208_v2, %v2207_v20 }
 0x7c6   :  { %2050 = vmatprep.subr.bf16.mxu1 %v2941_v38  ;;  %v2191_v22 = vld [vmem:[%s3947_s6 + $0x70] sm:$0xff] }
 0x7c9   :  { %2051 = vmatpush1.bf16.msra.mxu1 %v2939_v39  ;;  %v3020_v39 = vld [vmem:[#allocation2 + $0x18] sm:$0xff] }
 0x7ca   :  { %2052 = vmatprep.subr.bf16.mxu1 %v2944_v40 }
 0x7cd   :  { %2053 = vmatpush1.bf16.msra.mxu1 %v2942_v41 }
 0x830   :  { %v2686_v42 = vpop.f32.mrb[14].mxu0 }
 0x831   :  { %v1993_v23 = vpop.f32.mrb[15].mxu0 }
 0x832   :  { %v2002_v46 = vpack.c.bf16 %v2686_v42, %v1993_v23 }
 0x834   :  { %2560 = vmatmul.mubr.msk.bf16.vlgmr.msra.gmra.mrb[8].mxu1 %vm816_vm1, %v2002_v46 }
 0x907   :  { %v2080_v43 = vpop.f32.mrb[8].mxu1 }
 0x908   :  { %v2093_v10 = vmul.f32 %v2080_v43, %v2080_v43  ;;  %v2082_v11 = vpop.f32.mrb[9].mxu1 }
 0x909   :  { %v2094_v47 = vmul.f32 %v2082_v11, %v2082_v11  ;;  %v2084_v54 = vpop.f32.mrb[10].mxu1 }
 0x90a   :  { %v2095_v48 = vmul.f32 %v2084_v54, %v2084_v54  ;;  %v2086_v55 = vpop.f32.mrb[11].mxu1 }
 0x90b   :  { %v2096_v57 = vmul.f32 %v2086_v55, %v2086_v55  ;;  %v2097_v58 = vadd.f32 %v2094_v47, %v2093_v10  ;;  %v2200_v10 = vld [vmem:[%s3947_s6 + $0xb8] sm:$0xff] }
 0x90d   :  { %2098 = vadd.xlane.f32.xlu1 %v2097_v58  ;;  %v2100_v60 = vadd.f32 %v2096_v57, %v2095_v48  ;;  %v2202_v57 = vld [vmem:[%s3947_s6 + $0xc8] sm:$0xff]  ;;  %v2185_v58 = vld [vmem:[%s3947_s6 + $0x40] sm:$0xff] }
 0x90e   :  { %v2745_v1 = vpack.c.bf16 %v2186_v0, %v2185_v58 }
 0x90f   :  { %2101 = vadd.xlane.f32.xlu0 %v2100_v60 }
 0x99a   :  { %v2099_v24 = vpop.xlane.xlu1 %2098 }
 0x99b   :  { %v2103_v62 = vmul.f32 0.00390625, %v2099_v24  ;;  %v2192_v24 = vld [vmem:[%s3947_s6 + $0x78] sm:$0xff] }
 0x99c   :  { %v2102_v28 = vpop.xlane.xlu0 %2101 }
 0x99d   :  { %v2105_v49 = vadd.f32 1e-05, %v2103_v62  ;;  %v2104_v15 = vmul.f32 0.00390625, %v2102_v28  ;;  %v2757_v62 = vpack.c.bf16 %v2192_v24, %v2191_v22 }
 0x99f   :  { %2997 = vrsqrt.f32 %v2105_v49  ;;  %v2106_v61 = vadd.f32 1e-05, %v2104_v15 }
 0x9a1   :  { %2999 = vrsqrt.f32 %v2106_v61 }
 0x9a9   :  { %v2998_v29 = vpop.eup %2997 }
 0x9aa   :  { %v2109_v30 = vmul.f32 %v2998_v29, %v2080_v43  ;;  %v2110_v31 = vmul.f32 %v2998_v29, %v2082_v11  ;;  %v2199_v43 = vld [vmem:[%s3947_s6 + $0xb0] sm:$0xff] }
 0x9ab   :  { %v3000_v7 = vpop.eup %2999  ;;  %v2183_v11 = vld [vmem:[%s3947_s6 + $0x30] sm:$0xff]  ;;  %v2739_v47 = vpack.c.bf16 %v2200_v10, %v2199_v43 }
 0x9ac   :  { %v2125_v5 = vmul.f32 %v2118_v51, %v2109_v30  ;;  %v2126_v32 = vmul.f32 %v2122_v52, %v2110_v31  ;;  %v2111_v34 = vmul.f32 %v3000_v7, %v2084_v54  ;;  %v2112_v50 = vmul.f32 %v3000_v7, %v2086_v55  ;;  %v2184_v54 = vld [vmem:[%s3947_s6 + $0x38] sm:$0xff]  ;;  %v2201_v55 = vld [vmem:[%s3947_s6 + $0xc0] sm:$0xff] }
 0x9ad   :  { %v2741_v48 = vpack.c.bf16 %v2184_v54, %v2183_v11  ;;  %2740 = vmatprep.subr.bf16.mxu0 %v2739_v47  ;;  %v2743_v60 = vpack.c.bf16 %v2202_v57, %v2201_v55 }
 0x9ae   :  { %v3768_v37 = vadd.f32 %v3017_v18, %v2125_v5  ;;  %v3770_v25 = vadd.f32 %v3018_v6, %v2126_v32  ;;  %v2127_v3 = vmul.f32 %v2118_v51, %v2111_v34  ;;  %v2128_v35 = vmul.f32 %v2122_v52, %v2112_v50  ;;  %v2153_v52 = vld [vmem:[#allocation8] sm:$0x3] }
 0x9af   :  { %2742 = vmatpush3.bf16.msra.mxu0 %v2741_v48  ;;  %v2158_v29 = vrot.slane %v2153_v52, %v3398_v26  ;;  %v2162_v30 = vrot.slane %v2153_v52, %v3401_v27 }
 0x9b0   :  { %v2133_v17 = vmul.f32 %v3768_v37, %v3768_v37  ;;  %v2134_v36 = vmul.f32 %v3770_v25, %v3770_v25  ;;  %2169 = vst [vmem:[#allocation13] sm:$0xff] %v3768_v37  ;;  %2170 = vst [vmem:[#allocation13 + $0x8] sm:$0xff] %v3770_v25  ;;  %v3778_v38 = vadd.f32 %v3019_v44, %v2127_v3  ;;  %2744 = vmatprep.subr.bf16.mxu0 %v2743_v60 }
 0x9b1   :  { %v3780_v40 = vadd.f32 %v3020_v39, %v2128_v35 }
 0x9b2   :  { %v2137_v41 = vadd.f32 %v2134_v36, %v2133_v17  ;;  %v2135_v42 = vmul.f32 %v3778_v38, %v3778_v38  ;;  %2171 = vst [vmem:[#allocation13 + $0x10] sm:$0xff] %v3778_v38 }
 0x9b3   :  { %v2136_v23 = vmul.f32 %v3780_v40, %v3780_v40  ;;  %2172 = vst [vmem:[#allocation13 + $0x18] sm:$0xff] %v3780_v40  ;;  %2746 = vmatpush3.bf16.msra.mxu0 %v2745_v1 }
 0x9b4   :  { %2138 = vadd.xlane.f32.xlu1 %v2137_v41  ;;  %2748 = vmatprep.subr.bf16.mxu0 %v2747_v9 }
 0x9b5   :  { %v2140_v46 = vadd.f32 %v2136_v23, %v2135_v42 }
 0x9b7   :  { %2141 = vadd.xlane.f32.xlu0 %v2140_v46  ;;  %2750 = vmatpush3.bf16.msra.mxu0 %v2749_v19 }
 0x9b8   :  { %2752 = vmatprep.subr.bf16.mxu0 %v2751_v14 }
 0x9bb   :  { %2754 = vmatpush3.bf16.msra.mxu0 %v2753_v16 }
 0x9bc   :  { %2756 = vmatprep.subr.bf16.mxu0 %v2755_v21 }
 0x9bf   :  { %2758 = vmatpush3.bf16.msra.mxu0 %v2757_v62 }
 0xa41   :  { %v2139_v28 = vpop.xlane.xlu1 %2138 }
 0xa42   :  { %v2143_v49 = vmul.f32 0.00390625, %v2139_v28 }
 0xa44   :  { %v2142_v15 = vpop.xlane.xlu0 %2141  ;;  %v2145_v61 = vadd.f32 1e-05, %v2143_v49 }
 0xa45   :  { %v2144_v45 = vmul.f32 0.00390625, %v2142_v15 }
 0xa46   :  { %3001 = vrsqrt.f32 %v2145_v61 }
 0xa47   :  { %v2146_v51 = vadd.f32 1e-05, %v2144_v45 }
 0xa49   :  { %3003 = vrsqrt.f32 %v2146_v51 }
 0xa50   :  { %v3002_v31 = vpop.eup %3001 }
 0xa51   :  { %v2150_v7 = vmul.f32 %v3002_v31, %v3770_v25  ;;  %v2149_v5 = vmul.f32 %v3002_v31, %v3768_v37 }
 0xa53   :  { %v3004_v32 = vpop.eup %3003  ;;  %v2166_v34 = vmul.f32 %v2162_v30, %v2150_v7  ;;  %v2165_v50 = vmul.f32 %v2158_v29, %v2149_v5 }
 0xa54   :  { %v2152_v18 = vmul.f32 %v3004_v32, %v3780_v40  ;;  %v2151_v6 = vmul.f32 %v3004_v32, %v3778_v38 }
 0xa55   :  { %2174 = vst [vmem:[%s3950_s9 + $0x8] sm:$0xff] %v2166_v34  ;;  %2273 = vmatprep.mubr.f32.mxu0 %v2166_v34  ;;  %2173 = vst [vmem:[%s3950_s9] sm:$0xff] %v2165_v50 }
 0xa56   :  { %v2168_v26 = vmul.f32 %v2162_v30, %v2152_v18  ;;  %v2167_v27 = vmul.f32 %v2158_v29, %v2151_v6  ;;  %2274 = vmatmul.mubr.f32.vlgmr.msra.gmra.mrb[16].mxu0 %v2165_v50 }
 0xa58   :  { %2176 = vst [vmem:[%s3950_s9 + $0x18] sm:$0xff] %v2168_v26  ;;  %2278 = vmatprep.mubr.f32.mxu0 %v2168_v26  ;;  %2175 = vst [vmem:[%s3950_s9 + $0x10] sm:$0xff] %v2167_v27  ;;  %s3199_s9 = smov [#allocation13]  }
 0xa59   :  { %s2416_s2 = sshll.u32 %s3199_s9, 4  ;;  %s2417_s2 = int_to_ptr.vmem [resolvable:$true] %s2416_s2 }
 0xa5a   :  { %2279 = vmatmul.mubr.f32.gmra.mrb[18].mxu0 %v2167_v27  ;;  %s3153_s8 = scalar_lea.vmem %s2417_s2, 512  ;;  %p3158_p7 = scmp.lt.s32.totalorder %s2417_s2, %s2417_s2 }
 0xa5b   :  { %p3154_p6 = scmp.ne.s32.totalorder %s2417_s2, %s3153_s8  ;;  %p3159_p8 = scmp.lt.s32.totalorder %s3153_s8, %s3153_s8 }
 0xa5d   :  { %p3160_p9 = por %p3159_p8, %p3158_p7 }
 0xa5f   :  { %p3161_p10 = pnand %p3160_p9, %p3154_p6 }
 0xb29   :  { %v2625_v37 = vpop.f32.mrb[16].mxu0 }
 0xb2a   :  { %v2626_v25 = vpop.f32.mrb[17].mxu0 }
 0xb2b   :  { %v2627_v3 = vadd.f32 %v2626_v25, %v2625_v37 }
 0xb2d   :  { %v2284_v35 = vmul.f32 0.033333335, %v2627_v3  ;;  %v2628_v17 = vpop.f32.mrb[18].mxu0 }
 0xb2e   :  { %v2629_v36 = vpop.f32.mrb[19].mxu0 }
 0xb2f   :  { %3005 = vtanh.f32 %v2284_v35  ;;  %v2630_v44 = vadd.f32 %v2629_v36, %v2628_v17 }
 0xb31   :  { %v2285_v38 = vmul.f32 0.033333335, %v2630_v44 }
 0xb33   :  { %3007 = vtanh.f32 %v2285_v38 }
 0xb39   :  { %v3006_v39 = vpop.eup %3005 }
 0xb3a   :  { %v2288_v40 = vmul.f32 30.0, %v3006_v39 }
 0xb3c   :  { %v2291_v41 = vsel %vm2290_vm6, %v2288_v40, -inf }
 0xb3d   :  { %v3008_v42 = vpop.eup %3007  ;;  %2292 = vmax.xlane.f32.xlu1 %v2291_v41 }
 0xb3e   :  { %v2289_v23 = vmul.f32 30.0, %v3008_v42 }
 0xb40   :  { %v2294_v46 = vsel %vm2290_vm6, %v2289_v23, -inf }
 0xb41   :  { %2295 = vmax.xlane.f32.xlu0 %v2294_v46 }
 0xbca   :  { %v2293_v43 = vpop.xlane.xlu1 %2292 }
 0xbcb   :  { %v2297_v10 = vsub.f32 %v2288_v40, %v2293_v43 }
 0xbcd   :  { %v2299_v11 = vmul.f32 1.442695, %v2297_v10 }
 0xbce   :  { %v2296_v47 = vpop.xlane.xlu0 %2295 }
 0xbcf   :  { %3009 = vpow2.f32 %v2299_v11  ;;  %v2298_v54 = vsub.f32 %v2289_v23, %v2296_v47 }
 0xbd1   :  { %v2301_v48 = vmul.f32 1.442695, %v2298_v54 }
 0xbd3   :  { %3011 = vpow2.f32 %v2301_v48 }
 0xbd9   :  { %v3010_v55 = vpop.eup %3009 }
 0xbda   :  { %v2303_v57 = vsel %vm2290_vm6, %v3010_v55, 0.0 }
 0xbdb   :  { %2304 = vadd.xlane.f32.xlu1 %v2303_v57 }
 0xbdd   :  { %v3012_v58 = vpop.eup %3011 }
 0xbde   :  { %v2306_v60 = vsel %vm2290_vm6, %v3012_v58, 0.0 }
 0xbdf   :  { %2307 = vadd.xlane.f32.xlu0 %v2306_v60 }
 0xc68   :  { %v2305_v0 = vpop.xlane.xlu1 %2304 }
 0xc69   :  { %3013 = vrcp.f32 %v2305_v0 }
 0xc6c   :  { %v2308_v4 = vpop.xlane.xlu0 %2307 }
 0xc6d   :  { %3015 = vrcp.f32 %v2308_v4 }
 0xc73   :  { %v3014_v8 = vpop.eup %3013 }
 0xc74   :  { %v3870_v1 = vmul.f32 %v3014_v8, %v3010_v55 }
 0xc76   :  { %v2313_v9 = vsel %vm2290_vm6, %v3870_v1, -inf }
 0xc77   :  { %v3016_v33 = vpop.eup %3015  ;;  %2314 = vmax.xlane.f32.xlu1 %v2313_v9 }
 0xc78   :  { %v3874_v12 = vmul.f32 %v3016_v33, %v3012_v58 }
 0xc7a   :  { %v2316_v56 = vsel %vm2290_vm6, %v3874_v12, -inf }
 0xc7b   :  { %2317 = vmax.xlane.f32.xlu0 %v2316_v56 }
 0xd04   :  { %v2315_v13 = vpop.xlane.xlu1 %2314 }
 0xd05   :  { %vm2319_vm7 = vcmp.ge.f32.partialorder %v3870_v1, %v2315_v13 }
 0xd06   :  { %v2321_v19 = vsel %vm2319_vm7, %v3607_v63, 8 }
 0xd07   :  { %v2323_v14 = vsel %vm2290_vm6, %v2321_v19, 2147483647 }
 0xd08   :  { %v2318_v53 = vpop.xlane.xlu0 %2317  ;;  %v2325_v59 = vshra.s32 %v2323_v14, 16  ;;  %v2324_v24 = vand.u32 65535, %v2323_v14 }
 0xd09   :  { %vm2320_vm8 = vcmp.ge.f32.partialorder %v3874_v12, %v2318_v53 }
 0xd0a   :  { %v2322_v20 = vsel %vm2320_vm8, %v3607_v63, 8  ;;  %v2327_v2 = vcvt.s32.f32 %v2325_v59  ;;  %v2326_v28 = vcvt.s32.f32 %v2324_v24 }
 0xd0b   :  { %v2338_v16 = vsel %vm2290_vm6, %v2322_v20, 2147483647 }
 0xd0c   :  { %2328 = vmin.xlane.f32.xlu1 %v2327_v2  ;;  %v2340_v21 = vshra.s32 %v2338_v16, 16  ;;  %v2339_v49 = vand.u32 65535, %v2338_v16 }
 0xd0e   :  { %v2342_v22 = vcvt.s32.f32 %v2340_v21  ;;  %v2341_v45 = vcvt.s32.f32 %v2339_v49 }
 0xd10   :  { %2343 = vmin.xlane.f32.xlu0 %v2342_v22 }
 0xd99   :  { %v2329_v62 = vpop.xlane.xlu1 %2328 }
 0xd9a   :  { %vm2330_vm9 = vcmp.eq.f32.partialorder %v2327_v2, %v2329_v62  ;;  %v2335_v52 = vcvt.f32.s32 %v2329_v62 }
 0xd9b   :  { %v2331_v15 = vsel %vm2330_vm9, %v2326_v28, inf }
 0xd9c   :  { %2332 = vmin.xlane.f32.xlu1 %v2331_v15  ;;  %v2336_v30 = vshll.u32 %v2335_v52, 16 }
 0xd9d   :  { %v2344_v61 = vpop.xlane.xlu0 %2343 }
 0xd9e   :  { %vm2345_vm10 = vcmp.eq.f32.partialorder %v2342_v22, %v2344_v61  ;;  %v2350_v31 = vcvt.f32.s32 %v2344_v61 }
 0xd9f   :  { %v2346_v51 = vsel %vm2345_vm10, %v2341_v45, inf }
 0xda0   :  { %2347 = vmin.xlane.f32.xlu0 %v2346_v51  ;;  %v2351_v34 = vshll.u32 %v2350_v31, 16 }
 0xe29   :  { %v2333_v29 = vpop.xlane.xlu1 %2332 }
 0xe2a   :  { %v2334_v7 = vcvt.f32.s32 %v2333_v29 }
 0xe2c   :  { %v3884_v5 = vadd.s32 %v2336_v30, %v2334_v7 }
 0xe2d   :  { %v2348_v32 = vpop.xlane.xlu0 %2347 }
 0xe2e   :  { %v2349_v50 = vcvt.f32.s32 %v2348_v32  ;;  %vm2353_vm11 = vcmp.eq.s32.totalorder %v3607_v63, %v3884_v5 }
 0xe2f   :  { %v2359_v18 = vsel %vm2353_vm11, -inf, %v3870_v1 }
 0xe30   :  { %v3892_v6 = vadd.s32 %v2351_v34, %v2349_v50  ;;  %v2361_v26 = vsel %vm2290_vm6, %v2359_v18, -inf }
 0xe31   :  { %2362 = vmax.xlane.f32.xlu1 %v2361_v26 }
 0xe32   :  { %vm2354_vm12 = vcmp.eq.s32.totalorder %v3607_v63, %v3892_v6 }
 0xe33   :  { %v2360_v27 = vsel %vm2354_vm12, -inf, %v3874_v12 }
 0xe34   :  { %v2364_v37 = vsel %vm2290_vm6, %v2360_v27, -inf }
 0xe35   :  { %2365 = vmax.xlane.f32.xlu0 %v2364_v37 }
 0xebe   :  { %v2363_v25 = vpop.xlane.xlu1 %2362 }
 0xebf   :  { %vm2367_vm13 = vcmp.ge.f32.partialorder %v2359_v18, %v2363_v25 }
 0xec0   :  { %v2369_v3 = vsel %vm2367_vm13, %v3607_v63, 8 }
 0xec1   :  { %v2371_v35 = vsel %vm2290_vm6, %v2369_v3, 2147483647 }
 0xec2   :  { %v2366_v17 = vpop.xlane.xlu0 %2365  ;;  %v2373_v36 = vshra.s32 %v2371_v35, 16  ;;  %v2372_v42 = vand.u32 65535, %v2371_v35 }
 0xec3   :  { %vm2368_vm14 = vcmp.ge.f32.partialorder %v2360_v27, %v2366_v17 }
 0xec4   :  { %v2370_v44 = vsel %vm2368_vm14, %v3607_v63, 8  ;;  %v2375_v38 = vcvt.s32.f32 %v2373_v36  ;;  %v2374_v46 = vcvt.s32.f32 %v2372_v42 }
 0xec5   :  { %v2386_v39 = vsel %vm2290_vm6, %v2370_v44, 2147483647 }
 0xec6   :  { %2376 = vmin.xlane.f32.xlu1 %v2375_v38  ;;  %v2388_v40 = vshra.s32 %v2386_v39, 16  ;;  %v2387_v43 = vand.u32 65535, %v2386_v39 }
 0xec8   :  { %v2390_v41 = vcvt.s32.f32 %v2388_v40  ;;  %v2389_v47 = vcvt.s32.f32 %v2387_v43 }
 0xeca   :  { %2391 = vmin.xlane.f32.xlu0 %v2390_v41 }
 0xf53   :  { %v2377_v23 = vpop.xlane.xlu1 %2376 }
 0xf54   :  { %vm2378_vm15 = vcmp.eq.f32.partialorder %v2375_v38, %v2377_v23 }
 0xf55   :  { %v2379_v10 = vsel %vm2378_vm15, %v2374_v46, inf }
 0xf56   :  { %2380 = vmin.xlane.f32.xlu1 %v2379_v10 }
 0xf57   :  { %v2392_v11 = vpop.xlane.xlu0 %2391 }
 0xf58   :  { %vm2393_vm0 = vcmp.eq.f32.partialorder %v2390_v41, %v2392_v11 }
 0xf59   :  { %v2394_v54 = vsel %vm2393_vm0, %v2389_v47, inf }
 0xf5a   :  { %2395 = vmin.xlane.f32.xlu0 %v2394_v54 }
 0xf5b   :  { %3164 = shalt.err (!%p3161_p10)
}
 0xf5c   :  { %s3165_s7 = scalar_lea.hbm %s3951_s10, 512 }
 0xf5d   :  { %p3166_p11 = scmp.ne.s32.totalorder %s3951_s10, %s3165_s7  ;;  %p3169_p12 = scmp.lt.u32.totalorder %s3165_s7, %s3951_s10 }
 0xf5f   :  { %p3171_p13 = pnand %p3169_p12, %p3166_p11 }
 0xf61   :  { %3174 = shalt.err (!%p3171_p13)
}
 0xf62   :  { %2422 = dma.vmem_to_hbm [thread:$0]  %s2417_s2, 512, %s3951_s10, [#allocation4], %s3188_s3, %s3188_s3, %s3189_s20   ;;  %v2383_v48 = vcvt.f32.s32 %v2377_v23  ;;  %v2398_v58 = vcvt.f32.s32 %v2392_v11  ;;  %v2355_v33 = vsel %vm2353_vm11, %v3870_v1, 0.0  ;;  %v2356_v14 = vsel %vm2354_vm12, %v3874_v12, 0.0 }
 0xf64   :  { %v2384_v57 = vshll.u32 %v2383_v48, 16  ;;  %v2399_v8 = vshll.u32 %v2398_v58, 16 }
 0xfe3   :  { %v2381_v55 = vpop.xlane.xlu1 %2380 }
 0xfe4   :  { %v2382_v60 = vcvt.f32.s32 %v2381_v55 }
 0xfe6   :  { %v2385_v0 = vadd.s32 %v2384_v57, %v2382_v60 }
 0xfe7   :  { %v2396_v4 = vpop.xlane.xlu0 %2395 }
 0xfe8   :  { %vm2401_vm1 = vcmp.eq.s32.totalorder %v3607_v63, %v2385_v0  ;;  %v2397_v9 = vcvt.f32.s32 %v2396_v4 }
 0xfe9   :  { %v2403_v56 = vsel %vm2401_vm1, %v3870_v1, 0.0 }
 0xfea   :  { %v2405_v13 = vadd.f32 %v2403_v56, %v2355_v33  ;;  %v2400_v19 = vadd.s32 %v2399_v8, %v2397_v9 }
 0xfec   :  { %2407 = vst.msk [vmem:[%s3952_s11] sm:$0xff] %vm2290_vm6, %v2405_v13  ;;  %vm2402_vm2 = vcmp.eq.s32.totalorder %v3607_v63, %v2400_v19 }
 0xfed   :  { %v2404_v53 = vsel %vm2402_vm2, %v3874_v12, 0.0 }
 0xfee   :  { %v2406_v59 = vadd.f32 %v2404_v53, %v2356_v14 }
 0xff0   :  { %2408 = vst.msk [vmem:[%s3952_s11 + $0x8] sm:$0xff] %vm2290_vm6, %v2406_v59 }
 0xff1   :  { %3183 = dma.done.wait [#allocation4], 512  }
 0xff2   :  { %3184 = vsyncadd [#allocation4], 4294966784 }
 0xff3   :  { %2432 = vsyncpa [#allocation3], 1 }
 0xff4   :  { %2433 = vsyncpa [#allocation6], 1 }
 0xff5   :  { %2434 = vsyncpa [#allocation9], 1 }
 0xff6   :  { %2435 = vsyncpa [#allocation12], 1 }
 0xff7   :  { %2436 = vsyncpa [#allocation4], 1 }

// kernel: grok1_decoder_layer.3
= control target key start
LH: loop header
LB: loop body
LE: loop exit
PB: predicated region body
PF: predicated region fallthrough
CT: control target
= control target key end

     0   :  { %s3702_s0 = inlined_call_operand.vmem [shape: s32[8], index: 0, kind: input, shape index: {}]   ;;  %s3703_s1 = inlined_call_operand.<no memory space> [shape: s32[1], index: 1, kind: input, shape index: {}]   ;;  %s3704_s2 = inlined_call_operand.vmem [shape: f32[16,256], index: 2, kind: input, shape index: {}]   ;;  %s3705_s3 = inlined_call_operand.vmem [shape: f32[16,8], index: 3, kind: input, shape index: {}]   ;;  %s3706_s4 = inlined_call_operand.hbm [shape: bf16[8,256,512], index: 4, kind: input, shape index: {}]   ;;  %s3707_s5 = inlined_call_operand.hbm [shape: bf16[8,256,512], index: 5, kind: input, shape index: {}]   ;;  %s3708_s6 = inlined_call_operand.hbm [shape: bf16[8,512,256], index: 6, kind: input, shape index: {}]   ;;  %s3709_s7 = inlined_call_operand.vmem [shape: f32[2,16,256], index: 7, kind: output, shape index: {}]  }
   0x1   :  { %3725 = sst [smem:[#allocation27_spill]] %s3704_s2  ;;  %s12_s26 = sshll.u32 %s3702_s0, 4  ;;  %s13_s26 = int_to_ptr.vmem [resolvable:$true] %s12_s26 }
   0x2   :  { %3726 = sst [smem:[#allocation28_spill]] %s3705_s3  ;;  %s2731_s29 = scalar_lea.vmem %s13_s26, 16 }
   0x3   :  { %3727 = sst [smem:[#allocation29_spill]] %s3706_s4  ;;  %p2732_p0 = scmp.ne.s32.totalorder %s13_s26, %s2731_s29 }
   0x4   :  { %3728 = sst [smem:[#allocation30_spill]] %s3707_s5  ;;  %p2736_p1 = scmp.lt.s32.totalorder %s13_s26, %s13_s26 }
   0x5   :  { %3729 = sst [smem:[#allocation31_spill]] %s3709_s7  ;;  %p2737_p2 = scmp.lt.s32.totalorder %s2731_s29, %s2731_s29 }
   0x6   :  { %16 = sst [smem:[#allocation4]] %s3703_s1 }
   0x7   :  { %p2738_p3 = por %p2737_p2, %p2736_p1 }
   0x9   :  { %p2739_p4 = pnand %p2738_p3, %p2732_p0 }
   0xb   :  { %2742 = shalt.err (!%p2739_p4)  }
   0xc   :  { %s2959_s30 = smov [#allocation3]  }
   0xd   :  { %15 = dma.vmem_to_smem %s13_s26, 16, %s2959_s30, [#allocation2] }
   0xe   :  { %2889 = dma.done.wait [#allocation2], 16 }
   0xf   :  { %2890 = vsyncadd [#allocation2], 4294967280 }
  0x10   :  { %18 = sfence }
  0x11   :  { %19 = vsyncpa [#allocation6], 0 }
  0x12   :  { %21 = vsyncpa [#allocation6 + $0x1], 0 }
  0x13   :  { %22 = vsyncpa [#allocation8], 0 }
  0x14   :  { %24 = vsyncpa [#allocation8 + $0x1], 0  ;;  %s3014_s0 = smov 0   ;;  %s3016_s1 = smov 0  }
  0x15   :  { %s3018_s8 = smov 0   ;;  %s3020_s9 = smov 0  }
  0x16   :  { %s3022_s10 = smov 0   ;;  %s3024_s11 = smov 0  }
  0x17   :  { %s3026_s12 = smov 0   ;;  %s3028_s13 = smov 0  }
  0x18   :  { %s3030_s14 = smov 0   ;;  %s3032_s15 = smov 0  }
  0x19   :  { %s3034_s16 = smov 0   ;;  %s3036_s17 = smov 0  }
  0x1a   :  { %s3038_s18 = smov 0   ;;  %s3040_s19 = smov 0  }
  0x1b LB: > { %3730 = sst [smem:[#allocation20_spill]] %s2941_s15  ;;  %s39_s20 = sadd.s32 1, %s2949_s17  ;;  %s2957_s19 = sphi %s3040_s19, %s30_s19   ;;  %s2953_s18 = sphi %s3038_s18, %s3777_s18   ;;  %s2949_s17 = sphi %s3036_s17, %s3776_s17   ;;  %s2945_s16 = sphi %s3034_s16, %s3775_s16   ;;  %s2941_s15 = sphi %s3032_s15, %s3774_s15   ;;  %s2937_s14 = sphi %s3030_s14, %s3786_s14   ;;  %s2933_s13 = sphi %s3028_s13, %s3785_s13   ;;  %s2929_s12 = sphi %s3026_s12, %s3784_s12   ;;  %s2925_s11 = sphi %s3024_s11, %s3783_s11   ;;  %s2921_s10 = sphi %s3022_s10, %s3782_s10   ;;  %s2917_s9 = sphi %s3020_s9, %s3781_s9   ;;  %s2913_s8 = sphi %s3018_s8, %s3780_s8   ;;  %s2909_s1 = sphi %s3016_s1, %s3779_s1   ;;  %s2905_s0 = sphi %s3014_s0, %s3778_s0  }
  0x1c   : > { %3731 = sst [smem:[#allocation21_spill]] %s2949_s17  ;;  %p40_p5 = scmp.ge.s32.totalorder %s39_s20, 4 }
  0x1d   : > { %3732 = sst [smem:[#allocation22_spill]] %s2953_s18  ;;  %s42_s21 = sadd.s32 1, %s2953_s18 }
  0x1e   : > { %s3710_s22 = sadd.s32 4294967295, %s2957_s19   ;;  %s2049_s23 = sshll.u32 %s2953_s18, 2 }
  0x1f   : > { %s3788_s20 = smov (%p40_p5, %s39_s20), 0  ;;  %s3790_s21 = smov (!%p40_p5, %s42_s21), %s2953_s18 }
  0x20   : > { %3733 = sst [smem:[#allocation23_spill]] %s3788_s20  ;;  %s3092_s24 = sadd.s32 %s2949_s17, %s2049_s23 }
  0x21   : > { %p3719_p6 = scmp.eq.s32.totalorder %s2957_s19, 0  ;;  %p44_p7 = scmp.ge.s32.totalorder %s3790_s21, 2 }
  0x22   : > { %p3097_p8 = scmp.eq.s32.totalorder %s3710_s22, 0  ;;  %s122_s26 = sld [smem:[#allocation3 + %s3092_s24]] }
  0x23   : > { %p136_p9 = scmp.ne.s32.totalorder %s2925_s11, %s2921_s10  ;;  %s3792_s21 = smov (%p44_p7, %s3790_s21), 0 }
  0x24   : > { %3735 = sst [smem:[#allocation24_spill]] %s3792_s21  ;;  %s129_s27 = sadd.s32 1, %s2925_s11 }
  0x25   : > { %p142_p10 = scmp.ne.s32.totalorder %s2921_s10, %s2917_s9  ;;  %s2050_s28 = sshll.u32 %s3792_s21, 2 }
  0x26   : > { %s3111_s29 = sadd.s32 %s2050_s28, %s3788_s20  ;;  %p3122_p12 = por %p136_p9, %p3719_p6 }
  0x27   : > { %p3115_p11 = por %p142_p10, %p3097_p8  ;;  %s125_s23 = sld [smem:[#allocation3 + %s3111_s29]] }
  0x28   : > { %p3718_p13 = scmp.lt.s32.totalorder %s2957_s19, 8  ;;  %s254_s9 = sand.u32 1, %s2957_s19  }
  0x29   : > { %s3736_s30 = scalar_select %p3115_p11, 1, 0 }
  0x2a   : > { %s256_s28 = sand.u32 1, %s2925_s11   ;;  %p3133_p0 = pnand %p3718_p13, %p3122_p12 }
  0x2b   : > { %s2061_s21 = sshll.u32 %s256_s28, 9  ;;  %p2069_p1 = scmp.ge.s32.totalorder %s2957_s19, 1 }
  0x2c   : > { %s258_s17 = scalar_lea.vmem [#allocation7], %s2061_s21  ;;  %p300_p3 = scmp.lt.s32.totalorder %s2957_s19, 9 }
  0x2d   : > { %s126_s18 = ssub.s32 %s122_s26, %s125_s23  ;;  %s268_s3 = sshll.u32 %s258_s17, 4  ;;  %s3138_s3 = int_to_ptr.vmem [resolvable:$true] %s268_s3 }
  0x2e   : > { %p127_p2 = scmp.eq.s32.totalorder %s126_s18, 0  ;;  %p3155_p4 = pnand %p2069_p1, %p300_p3 }
  0x2f   : > { %s2283_s2 = scalar_select %p3122_p12, [#allocation3], [#allocation11] }
  0x30   : > { %s3143_s28 = scalar_select %p127_p2, %s2925_s11, %s129_s27  }
  0x31   : > { %s2284_s7 = scalar_select %p3122_p12, %s3092_s24, 0 }
  0x32   : > { %3739 = sst [smem:[#allocation25_spill]] %s3143_s28  ;;  %s3794_s2 = smov (!%p3718_p13, %s2283_s2), [#allocation14] }
  0x33   : > { %s3796_s7 = smov (!%p3718_p13, %s2284_s7), 0  ;;  %s3160_s21 = sld [smem:[#allocation3 + %s3092_s24]] }
  0x34   : > { %s261_s26 = sld [smem:[%s3794_s2 + %s3796_s7]]  ;;  %s3170_s2 = scalar_lea.sflag [#allocation8], %s254_s9 }
  0x35   : > { %s3740_s17 = scalar_select %p3155_p4, 1, 0 }
  0x36   : > { %s3741_s5 = sld [smem:[#allocation30_spill]]  ;;  %p2745_p7 = pneg %p3133_p0 }
  0x37   : > { %s3168_s22 = sld [smem:[#allocation3 + %s3111_s29]] }
  0x3a   : > { %s2273_s18 = sshll.u32 %s261_s26, 13 }
  0x3c   : > { %s3165_s27 = scalar_lea.hbm %s3741_s5, %s2273_s18  ;;  %s2748_s18 = scalar_lea.hbm %s3741_s5, 65536 }
  0x3d   : > { %s2743_s7 = scalar_lea.hbm %s3165_s27, 8192  ;;  %p2749_p12 = scmp.lt.u32.totalorder %s3165_s27, %s3741_s5 }
  0x3e   : > { %p2744_p5 = scmp.ne.s32.totalorder %s3165_s27, %s2743_s7  ;;  %p2750_p1 = scmp.lt.u32.totalorder %s2748_s18, %s2743_s7 }
  0x3f   : > { %p2752_p3 = scmp.lt.u32.totalorder %s2743_s7, %s3165_s27 }
  0x40   : > { %p2746_p9 = pnand %p2745_p7, %p2744_p5  ;;  %p2751_p2 = por %p2750_p1, %p2749_p12 }
  0x42   : > { %p2747_p10 = pneg %p2746_p9  ;;  %p2753_p13 = por %p2752_p3, %p2751_p2 }
  0x44   : > { %p2754_p6 = pnand %p2753_p13, %p2747_p10 }
  0x46   : > { %2757 = shalt.err (!%p2754_p6)
}
  0x47   : > { %s2758_s9 = scalar_lea.vmem %s3138_s3, 8192  ;;  %s2960_s26 = smov [#allocation7]  }
  0x48   : > { %p2759_p5 = scmp.ne.s32.totalorder %s3138_s3, %s2758_s9  ;;  %s2763_s15 = sshll.u32 %s2960_s26, 4  ;;  %s2764_s15 = int_to_ptr.vmem [resolvable:$false] %s2763_s15 }
  0x49   : > { %s2765_s28 = scalar_lea.vmem %s2764_s15, 16384  ;;  %p2766_p4 = scmp.lt.s32.totalorder %s3138_s3, %s2764_s15 }
  0x4a   : > { %p2761_p9 = pnand %p2759_p5, %p2745_p7  ;;  %p2767_p12 = scmp.lt.s32.totalorder %s2765_s28, %s2758_s9 }
  0x4c   : > { %p2762_p11 = pneg %p2761_p9  ;;  %p2768_p1 = por %p2767_p12, %p2766_p4 }
  0x4e   : > { %p2769_p2 = pnand %p2768_p1, %p2762_p11 }
  0x50   : > { %2772 = shalt.err (!%p2769_p2)
}
  0x51   : > { %s3721_s7 = smov 256   ;;  %s3722_s18 = smov 16  }
  0x52   : > { %2302 = dma.hbm_to_vmem [thread:$0]  (!%p3133_p0), %s3165_s27, 8192, %s3138_s3, %s3170_s2, %s3721_s7, %s3721_s7, %s3722_s18  }
  0x53   : > { %s3202_s23 = sld [smem:[#allocation3 + %s3111_s29]]  ;;  %p104_p6 = scmp.ne.s32.totalorder %s2937_s14, %s2933_s13 }
  0x54   : > { %p110_p11 = scmp.ne.s32.totalorder %s2933_s13, %s2929_s12  ;;  %s230_s9 = sand.u32 1, %s2937_s14  }
  0x55   : > { %s97_s26 = sadd.s32 1, %s2937_s14  ;;  %p3742_p13 = scmp.eq.s32.totalorder %s2957_s19, 0 }
  0x56   : > { %p3214_p7 = por %p3097_p8, %p110_p11  ;;  %s2057_s3 = sshll.u32 %s230_s9, 9 }
  0x57   : > { %p106_p4 = por %p3742_p13, %p104_p6  ;;  %s94_s29 = ssub.s32 %s3160_s21, %s3168_s22 }
  0x58   : > { %s3743_s20 = scalar_select %p3214_p7, 1, 0 }
  0x59   : > { %p95_p0 = scmp.eq.s32.totalorder %s94_s29, 0  ;;  %p3745_p10 = scmp.lt.s32.totalorder %s2957_s19, 8 }
  0x5a   : > { %s2280_s27 = scalar_select %p106_p4, [#allocation3], [#allocation10] }
  0x5b   : > { %s3221_s12 = scalar_select %p95_p0, %s2937_s14, %s97_s26  }
  0x5c   : > { %s2281_s15 = scalar_select %p106_p4, %s3092_s24, 0 }
  0x5d   : > { %3744 = sst [smem:[#allocation26_spill]] %s3221_s12  ;;  %s3798_s27 = smov (!%p3745_p10, %s2280_s27), [#allocation13] }
  0x5e   : > { %p3746_p3 = pmov %p3745_p10  ;;  %s234_s28 = scalar_lea.vmem [#allocation5], %s2057_s3 }
  0x5f   : > { %s244_s7 = sshll.u32 %s234_s28, 4  ;;  %s3237_s22 = sld [smem:[#allocation3 + %s3092_s24]]  ;;  %s3234_s7 = int_to_ptr.vmem [resolvable:$true] %s244_s7 }
  0x60   : > { %s3800_s15 = smov (!%p3746_p3, %s2281_s15), 0  ;;  %p3747_p5 = pmov %p3746_p3 }
  0x61   : > { %s237_s21 = sld [smem:[%s3798_s27 + %s3800_s15]]  ;;  %p168_p12 = scmp.ne.s32.totalorder %s2913_s8, %s2909_s1 }
  0x62   : > { %p3230_p9 = pnand %p3747_p5, %p106_p4  ;;  %s3749_s4 = sld [smem:[#allocation29_spill]] }
  0x63   : > { %p3750_p2 = pmov %p3742_p13  ;;  %s3255_s15 = scalar_lea.sflag [#allocation6], %s230_s9 }
  0x64   : > { %p2775_p13 = pneg %p3230_p9 }
  0x65   : > { %p3251_p6 = por %p168_p12, %p3750_p2 }
  0x67   : > { %s2272_s26 = sshll.u32 %s237_s21, 13 }
  0x68   : > { %s3247_s3 = scalar_lea.hbm %s3749_s4, %s2272_s26  ;;  %s2778_s21 = scalar_lea.hbm %s3749_s4, 65536 }
  0x69   : > { %s3751_s27 = scalar_select %p3251_p6, 1, 0 }
  0x6a   : > { %s2773_s28 = scalar_lea.hbm %s3247_s3, 8192  ;;  %p2779_p10 = scmp.lt.u32.totalorder %s3247_s3, %s3749_s4 }
  0x6b   : > { %p2774_p11 = scmp.ne.s32.totalorder %s3247_s3, %s2773_s28  ;;  %p2780_p3 = scmp.lt.u32.totalorder %s2778_s21, %s2773_s28 }
  0x6c   : > { %p2782_p12 = scmp.lt.u32.totalorder %s2773_s28, %s3247_s3 }
  0x6d   : > { %p2776_p4 = pnand %p2775_p13, %p2774_p11  ;;  %p2781_p5 = por %p2780_p3, %p2779_p10 }
  0x6f   : > { %p2777_p0 = pneg %p2776_p4  ;;  %p2783_p2 = por %p2782_p12, %p2781_p5 }
  0x71   : > { %p2784_p1 = pnand %p2783_p2, %p2777_p0 }
  0x73   : > { %2787 = shalt.err (!%p2784_p1)
}
  0x74   : > { %s2788_s9 = scalar_lea.vmem %s3234_s7, 8192  ;;  %s2963_s5 = smov [#allocation5]  }
  0x75   : > { %p2789_p11 = scmp.ne.s32.totalorder %s3234_s7, %s2788_s9  ;;  %s2793_s12 = sshll.u32 %s2963_s5, 4  ;;  %s2794_s12 = int_to_ptr.vmem [resolvable:$false] %s2793_s12 }
  0x76   : > { %s2795_s29 = scalar_lea.vmem %s2794_s12, 16384  ;;  %p2796_p6 = scmp.lt.s32.totalorder %s3234_s7, %s2794_s12 }
  0x77   : > { %p2791_p4 = pnand %p2789_p11, %p2775_p13  ;;  %p2797_p10 = scmp.lt.s32.totalorder %s2795_s29, %s2788_s9 }
  0x79   : > { %p2792_p7 = pneg %p2791_p4  ;;  %p2798_p3 = por %p2797_p10, %p2796_p6 }
  0x7b   : > { %p2799_p5 = pnand %p2798_p3, %p2792_p7 }
  0x7d   : > { %2802 = shalt.err (!%p2799_p5)
}
  0x7e   : > { %s3752_s28 = smov 16   ;;  %s3753_s21 = smov 256  }
  0x7f   : > { %2297 = dma.hbm_to_vmem [thread:$0]  (!%p3230_p9), %s3247_s3, 8192, %s3234_s7, %s3255_s15, %s3753_s21, %s3753_s21, %s3752_s28  }
  0x80   : > { %p3754_p7 = scmp.ne.s32.totalorder %s2909_s1, %s2905_s0  ;;  %s3756_s26 = sand.u32 1, %s2913_s8  }
  0x81   : > { %s2065_s9 = sshll.u32 %s3756_s26, 9  ;;  %s158_s5 = ssub.s32 %s3237_s22, %s3202_s23 }
  0x82   : > { %p3291_p1 = por %p3754_p7, %p3097_p8  ;;  %s161_s12 = sadd.s32 1, %s2913_s8 }
  0x83   : > { %p159_p6 = scmp.eq.s32.totalorder %s158_s5, 0  ;;  %p3757_p13 = scmp.ne.s32.totalorder %s3751_s27, 0 }
  0x84   : > { %p3758_p0 = scmp.lt.s32.totalorder %s2957_s19, 8  ;;  %s282_s7 = scalar_lea.vmem [#allocation9], %s2065_s9 }
  0x85   : > { %s2286_s29 = scalar_select %p3757_p13, [#allocation3], [#allocation12] }
  0x86   : > { %s3303_s4 = scalar_select %p159_p6, %s2913_s8, %s161_s12  }
  0x87   : > { %s3802_s24 = smov (!%p3757_p13, %s3092_s24), 0  ;;  %s3804_s29 = smov (!%p3758_p0, %s2286_s29), [#allocation15] }
  0x88   : > { %p3759_p9 = pmov %p3758_p0  ;;  %p3760_p8 = pmov %p3758_p0 }
  0x89   : > { %s292_s23 = sshll.u32 %s282_s7, 4  ;;  %s2808_s26 = scalar_lea.hbm %s3708_s6, 65536  ;;  %s3320_s23 = int_to_ptr.vmem [resolvable:$true] %s292_s23 }
  0x8a   : > { %s3806_s24 = smov (!%p3759_p9, %s3802_s24), 0  ;;  %p3316_p12 = pnand %p3760_p8, %p3757_p13 }
  0x8b   : > { %s285_s25 = sld [smem:[%s3804_s29 + %s3806_s24]] }
  0x8c   : > { %p2805_p11 = pneg %p3316_p12 }
  0x91   : > { %s2274_s22 = sshll.u32 %s285_s25, 13 }
  0x92   : > { %s3325_s28 = scalar_lea.hbm %s3708_s6, %s2274_s22 }
  0x93   : > { %s2803_s27 = scalar_lea.hbm %s3325_s28, 8192  ;;  %p2809_p3 = scmp.lt.u32.totalorder %s3325_s28, %s3708_s6 }
  0x94   : > { %p2804_p2 = scmp.ne.s32.totalorder %s3325_s28, %s2803_s27  ;;  %p2810_p5 = scmp.lt.u32.totalorder %s2808_s26, %s2803_s27 }
  0x95   : > { %p2812_p6 = scmp.lt.u32.totalorder %s2803_s27, %s3325_s28 }
  0x96   : > { %p2806_p4 = pnand %p2805_p11, %p2804_p2  ;;  %p2811_p7 = por %p2810_p5, %p2809_p3 }
  0x98   : > { %p2807_p10 = pneg %p2806_p4  ;;  %p2813_p13 = por %p2812_p6, %p2811_p7 }
  0x9a   : > { %p2814_p0 = pnand %p2813_p13, %p2807_p10 }
  0x9c   : > { %2817 = shalt.err (!%p2814_p0)
}
  0x9d   : > { %s2818_s12 = scalar_lea.vmem %s3320_s23, 8192  ;;  %s2964_s29 = smov [#allocation9]  }
  0x9e   : > { %p2819_p9 = scmp.ne.s32.totalorder %s3320_s23, %s2818_s12  ;;  %s2823_s25 = sshll.u32 %s2964_s29, 4  ;;  %s2824_s25 = int_to_ptr.vmem [resolvable:$false] %s2823_s25 }
  0x9f   : > { %s2825_s7 = scalar_lea.vmem %s2824_s25, 16384  ;;  %p2826_p4 = scmp.lt.s32.totalorder %s3320_s23, %s2824_s25 }
  0xa0   : > { %p2821_p8 = pnand %p2819_p9, %p2805_p11  ;;  %p2827_p3 = scmp.lt.s32.totalorder %s2825_s7, %s2818_s12 }
  0xa2   : > { %p2822_p2 = pneg %p2821_p8  ;;  %p2828_p5 = por %p2827_p3, %p2826_p4 }
  0xa4   : > { %p2829_p7 = pnand %p2828_p5, %p2822_p2 }
  0xa6   : > { %2832 = shalt.err (!%p2829_p7)
}
  0xa7   : > { %s2965_s22 = smov 128   ;;  %s2966_s3 = smov 8  }
  0xa8   : > { %2307 = dma.hbm_to_vmem [thread:$0]  (!%p3316_p12), %s3325_s28, 8192, %s3320_s23, %s3170_s2, %s2965_s22, %s2965_s22, %s2966_s3  }
  0xa9   : > { %p3762_p11 = scmp.ne.s32.totalorder %s3740_s17, 0 }
  0xaa   : > { %s306_s15 = sand.u32 (!%p3762_p11), 1, %s2933_s13   ;;  %p3763_p10 = scmp.ne.s32.totalorder (!%p3762_p11), %s3743_s20, 0 }
  0xab   : > { %304 = sbr.rel (%p3762_p11) target bundleno = 844 (0x34c), region = 40  ;;  %s2070_s27 = sshll.u32 (!%p3762_p11), %s306_s15, 9 }
  0xac   : > { %s307_s24 = scalar_lea.sflag (!%p3762_p11), [#allocation6], %s306_s15  ;;  %s3356_s21 = scalar_lea.vmem (!%p3762_p11), [#allocation5], %s2070_s27 }
  0xb2   : > { %2892 = dma.done.wait (%p3763_p10), %s307_s24, 8192  }
  0xb3   : > { %2894 = vsyncadd (%p3763_p10), %s307_s24, 4294959104  ;;  %s3764_s26 = sadd.s32 4294967295, %s2957_s19   ;;  %s317_s0 = sand.u32 1, %s2921_s10  }
  0xb4   : > { %s315_s2 = sand.u32 1, %s3764_s26   ;;  %s2071_s17 = sshll.u32 %s317_s0, 9 }
  0xb5   : > { %s316_s23 = scalar_lea.sflag [#allocation8], %s315_s2  ;;  %s3365_s28 = scalar_lea.vmem [#allocation7], %s2071_s17 }
  0xb6   : > { %p3765_p12 = scmp.ne.s32.totalorder %s3736_s30, 0 }
  0xb8   : > { %2896 = dma.done.wait (%p3765_p12), %s316_s23, 8192  }
  0xb9   : > { %2898 = vsyncadd (%p3765_p12), %s316_s23, 4294959104  ;;  %s326_s9 = sand.u32 1, %s2909_s1  }
  0xba   : > { %s2072_s20 = sshll.u32 %s326_s9, 9 }
  0xbb   : > { %s3372_s5 = scalar_lea.vmem [#allocation9], %s2072_s20 }
  0xbc   : > { %2900 = dma.done.wait (%p3291_p1), %s316_s23, 8192  }
  0xbd   : > { %2902 = vsyncadd (%p3291_p1), %s316_s23, 4294959104  ;;  %s3766_s12 = sld [smem:[#allocation20_spill]]  ;;  %p374_p6 = scmp.lt.s32.totalorder %s2945_s16, 1 }
  0xbe   : > { %s2075_s29 = sshll.u32 %s2945_s16, 2  ;;  %s3767_s3 = sld [smem:[#allocation31_spill]] }
  0xbf   : > { %s3808_s16 = smov (!%p374_p6, %s2945_s16), 1 }
  0xc0   : > { %s2275_s30 = sshll.u32 %s3808_s16, 5 }
  0xc3   : > { %s3381_s25 = sadd.s32 %s3766_s12, %s2075_s29  ;;  %p2076_p13 = scmp.ne.s32.totalorder %s3766_s12, 0 }
  0xc4   : > { %s3387_s15 = scalar_lea.vmem %s3767_s3, %s2275_s30  ;;  %v2967_v0 = vmov (!%p2076_p13), 0.0  }
  0xc5   : > { %384 = sbr.rel (%p2076_p13) target bundleno = 204 (0xcc), region = 56  ;;  %385 = vst [vmem:[%s3387_s15] sm:$0xff] (!%p2076_p13), %v2967_v0  ;;  %386 = vst [vmem:[%s3387_s15 + $0x8] sm:$0xff] (!%p2076_p13), %v2967_v0 }
  0xc6   : > { %387 = vst [vmem:[%s3387_s15 + $0x10] sm:$0xff] (!%p2076_p13), %v2967_v0  ;;  %388 = vst [vmem:[%s3387_s15 + $0x18] sm:$0xff] (!%p2076_p13), %v2967_v0 }
  0xcc PF: > { %s389_s18 = sld [smem:[#allocation4]] }
  0xd2   : > { %p2077_p1 = scmp.ge.s32.totalorder %s3381_s25, %s389_s18 }
  0xd3   : > { %v2427_v1 = vld [vmem:[%s3356_s21 + $0x4] ss:$16 sps:$4 sm:$0xff] (!%p2077_p1)   ;;  %v2429_v2 = vld [vmem:[%s3356_s21] ss:$16 sps:$4 sm:$0xff] (!%p2077_p1)   ;;  %s3768_s24 = sld [smem:[#allocation27_spill]] (!%p2077_p1)  ;;  %s3769_s12 = sld [smem:[#allocation28_spill]] (!%p2077_p1) }
  0xd4   : > { %393 = sbr.rel (%p2077_p1) target bundleno = 844 (0x34c), region = 60  ;;  %785 = vmatprep.subr.bf16.mxu1 (!%p2077_p1), %v2427_v1  ;;  %v2430_v3 = vld [vmem:[%s3356_s21 + $0x24] ss:$16 sps:$4 sm:$0xff] (!%p2077_p1)   ;;  %v2432_v4 = vld [vmem:[%s3356_s21 + $0x20] ss:$16 sps:$4 sm:$0xff] (!%p2077_p1)   ;;  %vm1903_vm0 = vcmask (!%p2077_p1), 64512  }
  0xd5   : > { %786 = vmatpush1.bf16.msra.mxu1 (!%p2077_p1), %v2429_v2  ;;  %v2433_v5 = vld [vmem:[%s3356_s21 + $0x44] ss:$16 sps:$4 sm:$0xff] (!%p2077_p1)   ;;  %v2435_v6 = vld [vmem:[%s3356_s21 + $0x40] ss:$16 sps:$4 sm:$0xff] (!%p2077_p1)   ;;  %v2506_v1 = vld [vmem:[%s3356_s21 + $0xc] ss:$16 sps:$4 sm:$0xff] (!%p2077_p1)  }
  0xd6   : > { %787 = vmatprep.subr.bf16.mxu1 (!%p2077_p1), %v2430_v3  ;;  %v2436_v7 = vld [vmem:[%s3356_s21 + $0x64] ss:$16 sps:$4 sm:$0xff] (!%p2077_p1)   ;;  %v2438_v9 = vld [vmem:[%s3356_s21 + $0x60] ss:$16 sps:$4 sm:$0xff] (!%p2077_p1)  }
  0xd7   : > { %v2448_v8 = vld [vmem:[%s3365_s28 + $0x4] ss:$16 sps:$4 sm:$0xff] (!%p2077_p1)   ;;  %v2452_v11 = vld [vmem:[%s3365_s28] ss:$16 sps:$4 sm:$0xff] (!%p2077_p1)  }
  0xd8   : > { %v2439_v10 = vld [vmem:[%s3356_s21 + $0x84] ss:$16 sps:$4 sm:$0xff] (!%p2077_p1)   ;;  %1255 = vmatprep.subr.bf16.mxu0 (!%p2077_p1), %v2448_v8  ;;  %v2441_v13 = vld [vmem:[%s3356_s21 + $0x80] ss:$16 sps:$4 sm:$0xff] (!%p2077_p1)  }
  0xd9   : > { %788 = vmatpush1.bf16.msra.mxu1 (!%p2077_p1), %v2432_v4  ;;  %v2454_v12 = vld [vmem:[%s3365_s28 + $0x24] ss:$16 sps:$4 sm:$0xff] (!%p2077_p1)   ;;  %1256 = vmatpush1.bf16.msra.mxu0 (!%p2077_p1), %v2452_v11  ;;  %v2458_v14 = vld [vmem:[%s3365_s28 + $0x20] ss:$16 sps:$4 sm:$0xff] (!%p2077_p1)   ;;  %v396_v34 = vld [vmem:[%s3768_s24 + $0x8] sm:$0xff] (!%p2077_p1)  ;;  %s3770_s29 = smov (!%p2077_p1), %s3769_s12 }
  0xda   : > { %789 = vmatprep.subr.bf16.mxu1 (!%p2077_p1), %v2433_v5  ;;  %1257 = vmatprep.subr.bf16.mxu0 (!%p2077_p1), %v2454_v12  ;;  %v2460_v15 = vld [vmem:[%s3365_s28 + $0x44] ss:$16 sps:$4 sm:$0xff] (!%p2077_p1)   ;;  %v2464_v17 = vld [vmem:[%s3365_s28 + $0x40] ss:$16 sps:$4 sm:$0xff] (!%p2077_p1)   ;;  %v398_v35 = vld [vmem:[%s3768_s24 + $0x18] sm:$0xff] (!%p2077_p1) }
  0xdb   : > { %v2442_v16 = vld [vmem:[%s3356_s21 + $0xa4] ss:$16 sps:$4 sm:$0xff]   ;;  %v2444_v19 = vld [vmem:[%s3356_s21 + $0xa0] ss:$16 sps:$4 sm:$0xff]   ;;  %v3435_v37 = vpack.c.bf16 %v398_v35, %v396_v34  ;;  %v2504_v5 = vld [vmem:[%s3356_s21 + $0x8] ss:$16 sps:$4 sm:$0xff]  }
  0xdc   : > { %v2466_v18 = vld [vmem:[%s3365_s28 + $0x64] ss:$16 sps:$4 sm:$0xff]   ;;  %v2470_v21 = vld [vmem:[%s3365_s28 + $0x60] ss:$16 sps:$4 sm:$0xff]   ;;  %v2516_v12 = vld [vmem:[%s3356_s21 + $0x48] ss:$16 sps:$4 sm:$0xff]  }
  0xdd   : > { %790 = vmatpush1.bf16.msra.mxu1 %v2435_v6  ;;  %1258 = vmatpush1.bf16.msra.mxu0 %v2458_v14  ;;  %v2445_v20 = vld [vmem:[%s3356_s21 + $0xc4] ss:$16 sps:$4 sm:$0xff]   ;;  %v2447_v23 = vld [vmem:[%s3356_s21 + $0xc0] ss:$16 sps:$4 sm:$0xff]   ;;  %v2512_v6 = vld [vmem:[%s3356_s21 + $0x2c] ss:$16 sps:$4 sm:$0xff]  }
  0xde   : > { %791 = vmatprep.subr.bf16.mxu1 %v2436_v7  ;;  %1259 = vmatprep.subr.bf16.mxu0 %v2460_v15  ;;  %v2472_v22 = vld [vmem:[%s3365_s28 + $0x84] ss:$16 sps:$4 sm:$0xff]   ;;  %v2476_v25 = vld [vmem:[%s3365_s28 + $0x80] ss:$16 sps:$4 sm:$0xff]   ;;  %v2522_v14 = vld [vmem:[%s3356_s21 + $0x68] ss:$16 sps:$4 sm:$0xff]  }
  0xdf   : > { %v2450_v24 = vld [vmem:[%s3356_s21 + $0xe4] ss:$16 sps:$4 sm:$0xff]   ;;  %v2453_v27 = vld [vmem:[%s3356_s21 + $0xe0] ss:$16 sps:$4 sm:$0xff]   ;;  %817 = vmatprep.mubr.bf16.mxu1 %v3435_v37  ;;  %1287 = vmatprep.mubr.bf16.mxu0 %v3435_v37  ;;  %v2530_v15 = vld [vmem:[%s3356_s21 + $0x8c] ss:$16 sps:$4 sm:$0xff]  }
  0xe0   : > { %v2478_v26 = vld [vmem:[%s3365_s28 + $0xa4] ss:$16 sps:$4 sm:$0xff]   ;;  %v2482_v29 = vld [vmem:[%s3365_s28 + $0xa0] ss:$16 sps:$4 sm:$0xff]   ;;  %v2550_v34 = vld [vmem:[%s3356_s21 + $0x128] ss:$16 sps:$4 sm:$0xff]  }
  0xe1   : > { %792 = vmatpush1.bf16.msra.mxu1 %v2438_v9  ;;  %1260 = vmatpush1.bf16.msra.mxu0 %v2464_v17  ;;  %v2456_v28 = vld [vmem:[%s3356_s21 + $0x104] ss:$16 sps:$4 sm:$0xff]   ;;  %v2459_v31 = vld [vmem:[%s3356_s21 + $0x100] ss:$16 sps:$4 sm:$0xff]   ;;  %v2510_v9 = vld [vmem:[%s3356_s21 + $0x28] ss:$16 sps:$4 sm:$0xff]  }
  0xe2   : > { %793 = vmatprep.subr.bf16.mxu1 %v2439_v10  ;;  %1261 = vmatprep.subr.bf16.mxu0 %v2466_v18  ;;  %v2484_v30 = vld [vmem:[%s3365_s28 + $0xc4] ss:$16 sps:$4 sm:$0xff]   ;;  %v2488_v33 = vld [vmem:[%s3365_s28 + $0xc0] ss:$16 sps:$4 sm:$0xff]   ;;  %v2518_v10 = vld [vmem:[%s3356_s21 + $0x4c] ss:$16 sps:$4 sm:$0xff]  }
  0xe3   : > { %v2462_v32 = vld [vmem:[%s3356_s21 + $0x124] ss:$16 sps:$4 sm:$0xff]   ;;  %v2465_v38 = vld [vmem:[%s3356_s21 + $0x120] ss:$16 sps:$4 sm:$0xff]   ;;  %v2536_v17 = vld [vmem:[%s3356_s21 + $0xac] ss:$16 sps:$4 sm:$0xff]  }
  0xe4   : > { %v2490_v36 = vld [vmem:[%s3365_s28 + $0xe4] ss:$16 sps:$4 sm:$0xff]   ;;  %v2494_v40 = vld [vmem:[%s3365_s28 + $0xe0] ss:$16 sps:$4 sm:$0xff]   ;;  %v2534_v18 = vld [vmem:[%s3356_s21 + $0xa8] ss:$16 sps:$4 sm:$0xff]  }
  0xe5   : > { %794 = vmatpush1.bf16.msra.mxu1 %v2441_v13  ;;  %1262 = vmatpush1.bf16.msra.mxu0 %v2470_v21  ;;  %v2468_v39 = vld [vmem:[%s3356_s21 + $0x144] ss:$16 sps:$4 sm:$0xff]   ;;  %v2471_v42 = vld [vmem:[%s3356_s21 + $0x140] ss:$16 sps:$4 sm:$0xff]   ;;  %v2524_v13 = vld [vmem:[%s3356_s21 + $0x6c] ss:$16 sps:$4 sm:$0xff]  }
  0xe6   : > { %795 = vmatprep.subr.bf16.mxu1 %v2442_v16  ;;  %1263 = vmatprep.subr.bf16.mxu0 %v2472_v22  ;;  %v2496_v41 = vld [vmem:[%s3365_s28 + $0x104] ss:$16 sps:$4 sm:$0xff]   ;;  %v2500_v44 = vld [vmem:[%s3365_s28 + $0x100] ss:$16 sps:$4 sm:$0xff]   ;;  %v2528_v16 = vld [vmem:[%s3356_s21 + $0x88] ss:$16 sps:$4 sm:$0xff]  }
  0xe7   : > { %v2474_v43 = vld [vmem:[%s3356_s21 + $0x164] ss:$16 sps:$4 sm:$0xff]   ;;  %v2477_v46 = vld [vmem:[%s3356_s21 + $0x160] ss:$16 sps:$4 sm:$0xff]  }
  0xe8   : > { %v2502_v45 = vld [vmem:[%s3365_s28 + $0x124] ss:$16 sps:$4 sm:$0xff]   ;;  %v2507_v48 = vld [vmem:[%s3365_s28 + $0x120] ss:$16 sps:$4 sm:$0xff]  }
  0xe9   : > { %796 = vmatpush1.bf16.msra.mxu1 %v2444_v19  ;;  %1264 = vmatpush1.bf16.msra.mxu0 %v2476_v25  ;;  %v2480_v47 = vld [vmem:[%s3356_s21 + $0x184] ss:$16 sps:$4 sm:$0xff]   ;;  %v2483_v50 = vld [vmem:[%s3356_s21 + $0x180] ss:$16 sps:$4 sm:$0xff]   ;;  %v2542_v19 = vld [vmem:[%s3356_s21 + $0xcc] ss:$16 sps:$4 sm:$0xff]  }
  0xea   : > { %797 = vmatprep.subr.bf16.mxu1 %v2445_v20  ;;  %1265 = vmatprep.subr.bf16.mxu0 %v2478_v26  ;;  %v2508_v49 = vld [vmem:[%s3365_s28 + $0x144] ss:$16 sps:$4 sm:$0xff]   ;;  %v2513_v52 = vld [vmem:[%s3365_s28 + $0x140] ss:$16 sps:$4 sm:$0xff]   ;;  %v2540_v20 = vld [vmem:[%s3356_s21 + $0xc8] ss:$16 sps:$4 sm:$0xff]  }
  0xeb   : > { %v2486_v51 = vld [vmem:[%s3356_s21 + $0x1a4] ss:$16 sps:$4 sm:$0xff]   ;;  %v2489_v54 = vld [vmem:[%s3356_s21 + $0x1a0] ss:$16 sps:$4 sm:$0xff]   ;;  %v2544_v26 = vld [vmem:[%s3356_s21 + $0xe8] ss:$16 sps:$4 sm:$0xff]  }
  0xec   : > { %v2514_v53 = vld [vmem:[%s3365_s28 + $0x164] ss:$16 sps:$4 sm:$0xff]   ;;  %v2519_v56 = vld [vmem:[%s3365_s28 + $0x160] ss:$16 sps:$4 sm:$0xff]  }
  0xed   : > { %798 = vmatpush1.bf16.msra.mxu1 %v2447_v23  ;;  %1266 = vmatpush1.bf16.msra.mxu0 %v2482_v29  ;;  %v2492_v55 = vld [vmem:[%s3356_s21 + $0x1c4] ss:$16 sps:$4 sm:$0xff]   ;;  %v2495_v58 = vld [vmem:[%s3356_s21 + $0x1c0] ss:$16 sps:$4 sm:$0xff]   ;;  %v2546_v23 = vld [vmem:[%s3356_s21 + $0xec] ss:$16 sps:$4 sm:$0xff]  }
  0xee   : > { %799 = vmatprep.subr.bf16.mxu1 %v2450_v24  ;;  %1267 = vmatprep.subr.bf16.mxu0 %v2484_v30  ;;  %v2520_v57 = vld [vmem:[%s3365_s28 + $0x184] ss:$16 sps:$4 sm:$0xff]   ;;  %v2525_v60 = vld [vmem:[%s3365_s28 + $0x180] ss:$16 sps:$4 sm:$0xff]   ;;  %v2547_v29 = vld [vmem:[%s3356_s21 + $0x108] ss:$16 sps:$4 sm:$0xff]  }
  0xef   : > { %v2498_v59 = vld [vmem:[%s3356_s21 + $0x1e4] ss:$16 sps:$4 sm:$0xff]   ;;  %v2501_v61 = vld [vmem:[%s3356_s21 + $0x1e0] ss:$16 sps:$4 sm:$0xff]  }
  0xf0   : > { %v2526_v62 = vld [vmem:[%s3365_s28 + $0x1a4] ss:$16 sps:$4 sm:$0xff]   ;;  %v2531_v2 = vld [vmem:[%s3365_s28 + $0x1a0] ss:$16 sps:$4 sm:$0xff]  }
  0xf1   : > { %800 = vmatpush1.bf16.msra.mxu1 %v2453_v27  ;;  %1268 = vmatpush1.bf16.msra.mxu0 %v2488_v33  ;;  %v395_v63 = vld [vmem:[%s3768_s24] sm:$0xff]  ;;  %v397_v0 = vld [vmem:[%s3768_s24 + $0x10] sm:$0xff] }
  0xf2   : > { %801 = vmatprep.subr.bf16.mxu1 %v2456_v28  ;;  %1269 = vmatprep.subr.bf16.mxu0 %v2490_v36  ;;  %v3472_v3 = vpack.c.bf16 %v397_v0, %v395_v63  ;;  %v2532_v4 = vld [vmem:[%s3365_s28 + $0x1c4] ss:$16 sps:$4 sm:$0xff]   ;;  %v2537_v7 = vld [vmem:[%s3365_s28 + $0x1c0] ss:$16 sps:$4 sm:$0xff]   ;;  %v2549_v28 = vld [vmem:[%s3356_s21 + $0x10c] ss:$16 sps:$4 sm:$0xff]  }
  0xf3   : > { %v2538_v8 = vld [vmem:[%s3365_s28 + $0x1e4] ss:$16 sps:$4 sm:$0xff]   ;;  %v2543_v11 = vld [vmem:[%s3365_s28 + $0x1e0] ss:$16 sps:$4 sm:$0xff]   ;;  %v2555_v36 = vld [vmem:[%s3356_s21 + $0x14c] ss:$16 sps:$4 sm:$0xff]  }
  0xf4   : > { %v2619_v21 = vld [vmem:[%s3372_s5] ss:$8 sps:$4 sm:$0xff]   ;;  %v2621_v22 = vld [vmem:[%s3372_s5 + $0x4] ss:$8 sps:$4 sm:$0xff]   ;;  %v2624_v24 = vld [vmem:[%s3372_s5 + $0x14] ss:$8 sps:$4 sm:$0xff]  }
  0xf5   : > { %802 = vmatpush1.bf16.msra.mxu1 %v2459_v31  ;;  %1270 = vmatpush1.bf16.msra.mxu0 %v2494_v40  ;;  %v2622_v25 = vld [vmem:[%s3372_s5 + $0x10] ss:$8 sps:$4 sm:$0xff]   ;;  %v2627_v27 = vld [vmem:[%s3372_s5 + $0x24] ss:$8 sps:$4 sm:$0xff]   ;;  %v2625_v30 = vld [vmem:[%s3372_s5 + $0x20] ss:$8 sps:$4 sm:$0xff]  }
  0xf6   : > { %803 = vmatprep.subr.bf16.mxu1 %v2462_v32  ;;  %1271 = vmatprep.subr.bf16.mxu0 %v2496_v41  ;;  %v2552_v31 = vld [vmem:[%s3356_s21 + $0x12c] ss:$16 sps:$4 sm:$0xff]   ;;  %v2628_v33 = vld [vmem:[%s3372_s5 + $0x30] ss:$8 sps:$4 sm:$0xff]  }
  0xf7   : > { %v2630_v32 = vld [vmem:[%s3372_s5 + $0x34] ss:$8 sps:$4 sm:$0xff]   ;;  %v2633_v35 = vld [vmem:[%s3372_s5 + $0x44] ss:$8 sps:$4 sm:$0xff]   ;;  %v2583_v63 = vld [vmem:[%s3365_s28 + $0x88] ss:$16 sps:$4 sm:$0xff]  }
  0xf8   : > { %v2636_v40 = vld [vmem:[%s3372_s5 + $0x54] ss:$8 sps:$4 sm:$0xff]   ;;  %v2586_v0 = vld [vmem:[%s3365_s28 + $0xa8] ss:$16 sps:$4 sm:$0xff]  }
  0xf9   : > { %804 = vmatpush1.bf16.msra.mxu1 %v2465_v38  ;;  %1272 = vmatpush1.bf16.msra.mxu0 %v2500_v44  ;;  %v2631_v38 = vld [vmem:[%s3372_s5 + $0x40] ss:$8 sps:$4 sm:$0xff]   ;;  %v2558_v41 = vld [vmem:[%s3356_s21 + $0x16c] ss:$16 sps:$4 sm:$0xff]  }
  0xfa   : > { %805 = vmatprep.subr.bf16.mxu1 %v2468_v39  ;;  %1273 = vmatprep.subr.bf16.mxu0 %v2502_v45  ;;  %v2553_v39 = vld [vmem:[%s3356_s21 + $0x148] ss:$16 sps:$4 sm:$0xff]   ;;  %v2639_v44 = vld [vmem:[%s3372_s5 + $0x64] ss:$8 sps:$4 sm:$0xff]  }
  0xfb   : > { %v2561_v45 = vld [vmem:[%s3356_s21 + $0x18c] ss:$16 sps:$4 sm:$0xff]  }
  0xfd   : > { %806 = vmatpush1.bf16.msra.mxu1 %v2471_v42  ;;  %1274 = vmatpush1.bf16.msra.mxu0 %v2507_v48  ;;  %v2634_v42 = vld [vmem:[%s3372_s5 + $0x50] ss:$8 sps:$4 sm:$0xff]   ;;  %v2564_v48 = vld [vmem:[%s3356_s21 + $0x1ac] ss:$16 sps:$4 sm:$0xff]  }
  0xfe   : > { %807 = vmatprep.subr.bf16.mxu1 %v2474_v43  ;;  %1275 = vmatprep.subr.bf16.mxu0 %v2508_v49  ;;  %v2556_v43 = vld [vmem:[%s3356_s21 + $0x168] ss:$16 sps:$4 sm:$0xff]  }
  0xff   : > { %v2562_v49 = vld [vmem:[%s3356_s21 + $0x1a8] ss:$16 sps:$4 sm:$0xff]  }
 0x101   : > { %808 = vmatpush1.bf16.msra.mxu1 %v2477_v46  ;;  %1276 = vmatpush1.bf16.msra.mxu0 %v2513_v52  ;;  %v2637_v46 = vld [vmem:[%s3372_s5 + $0x60] ss:$8 sps:$4 sm:$0xff]   ;;  %v2570_v52 = vld [vmem:[%s3356_s21 + $0x1ec] ss:$16 sps:$4 sm:$0xff]  }
 0x102   : > { %809 = vmatprep.subr.bf16.mxu1 %v2480_v47  ;;  %1277 = vmatprep.subr.bf16.mxu0 %v2514_v53  ;;  %v2559_v47 = vld [vmem:[%s3356_s21 + $0x188] ss:$16 sps:$4 sm:$0xff]  }
 0x103   : > { %v2568_v53 = vld [vmem:[%s3356_s21 + $0x1e8] ss:$16 sps:$4 sm:$0xff]  }
 0x105   : > { %810 = vmatpush1.bf16.msra.mxu1 %v2483_v50  ;;  %1278 = vmatpush1.bf16.msra.mxu0 %v2519_v56  ;;  %v2567_v50 = vld [vmem:[%s3356_s21 + $0x1cc] ss:$16 sps:$4 sm:$0xff]  }
 0x106   : > { %811 = vmatprep.subr.bf16.mxu1 %v2486_v51  ;;  %1279 = vmatprep.subr.bf16.mxu0 %v2520_v57  ;;  %v2565_v51 = vld [vmem:[%s3356_s21 + $0x1c8] ss:$16 sps:$4 sm:$0xff]   ;;  %v2576_v56 = vld [vmem:[%s3365_s28 + $0x2c] ss:$16 sps:$4 sm:$0xff]   ;;  %s394_s21 = sld [smem:[#allocation3 + %s3381_s25]] }
 0x107   : > { %v2574_v57 = vld [vmem:[%s3365_s28 + $0x28] ss:$16 sps:$4 sm:$0xff]  }
 0x109   : > { %812 = vmatpush1.bf16.msra.mxu1 %v2489_v54  ;;  %1280 = vmatpush1.bf16.msra.mxu0 %v2525_v60  ;;  %v2573_v54 = vld [vmem:[%s3365_s28 + $0xc] ss:$16 sps:$4 sm:$0xff]  }
 0x10a   : > { %813 = vmatprep.subr.bf16.mxu1 %v2492_v55  ;;  %1281 = vmatprep.subr.bf16.mxu0 %v2526_v62  ;;  %v2571_v55 = vld [vmem:[%s3365_s28 + $0x8] ss:$16 sps:$4 sm:$0xff]   ;;  %v2582_v60 = vld [vmem:[%s3365_s28 + $0x6c] ss:$16 sps:$4 sm:$0xff]  }
 0x10b   : > { %v2585_v62 = vld [vmem:[%s3365_s28 + $0x8c] ss:$16 sps:$4 sm:$0xff]  }
 0x10d   : > { %814 = vmatpush1.bf16.msra.mxu1 %v2495_v58  ;;  %1282 = vmatpush1.bf16.msra.mxu0 %v2531_v2  ;;  %v2579_v58 = vld [vmem:[%s3365_s28 + $0x4c] ss:$16 sps:$4 sm:$0xff]  }
 0x10e   : > { %815 = vmatprep.subr.bf16.mxu1 %v2498_v59  ;;  %1283 = vmatprep.subr.bf16.mxu0 %v2532_v4  ;;  %v2577_v59 = vld [vmem:[%s3365_s28 + $0x48] ss:$16 sps:$4 sm:$0xff]   ;;  %v2591_v2 = vld [vmem:[%s3365_s28 + $0xcc] ss:$16 sps:$4 sm:$0xff]  }
 0x10f   : > { %v2640_v4 = vld [vmem:[%s3372_s5 + $0x70] ss:$8 sps:$4 sm:$0xff]  }
 0x111   : > { %816 = vmatpush1.bf16.msra.mxu1 %v2501_v61  ;;  %1284 = vmatpush1.bf16.msra.mxu0 %v2537_v7  ;;  %v2580_v61 = vld [vmem:[%s3365_s28 + $0x68] ss:$16 sps:$4 sm:$0xff]   ;;  %v2594_v7 = vld [vmem:[%s3365_s28 + $0xec] ss:$16 sps:$4 sm:$0xff]  }
 0x112   : > { %828 = vmatprep.subr.bf16.mxu1 %v2506_v1  ;;  %1285 = vmatprep.subr.bf16.mxu0 %v2538_v8  ;;  %v2642_v1 = vld [vmem:[%s3372_s5 + $0x74] ss:$8 sps:$4 sm:$0xff]   ;;  %v2643_v8 = vld [vmem:[%s3372_s5 + $0x80] ss:$8 sps:$4 sm:$0xff]  }
 0x114   : > { %818 = vmatmul.mubr.bf16.vlgmr.msra.gmra.mrb[0].mxu1 %v3472_v3 }
 0x115   : > { %829 = vmatpush1.bf16.msra.mxu1 %v2504_v5  ;;  %860 = vmatprep.mubr.bf16.mxu1 %v3435_v37  ;;  %v2589_v5 = vld [vmem:[%s3365_s28 + $0xc8] ss:$16 sps:$4 sm:$0xff]  }
 0x116   : > { %830 = vmatprep.subr.bf16.mxu1 %v2512_v6  ;;  %1286 = vmatpush1.bf16.msra.mxu0 %v2543_v11  ;;  %v2645_v6 = vld [vmem:[%s3372_s5 + $0x84] ss:$8 sps:$4 sm:$0xff]  }
 0x117   : > { %1809 = vmatprep.subr.bf16.mxu0 %v2621_v22  ;;  %v2597_v11 = vld [vmem:[%s3365_s28 + $0x10c] ss:$16 sps:$4 sm:$0xff]   ;;  %v2655_v22 = vld [vmem:[%s3372_s5 + $0xc0] ss:$8 sps:$4 sm:$0xff]  }
 0x119   : > { %831 = vmatpush1.bf16.msra.mxu1 %v2510_v9  ;;  %1288 = vmatmul.mubr.bf16.vlgmr.msra.gmra.mrb[0].mxu0 %v3472_v3  ;;  %v2592_v9 = vld [vmem:[%s3365_s28 + $0xe8] ss:$16 sps:$4 sm:$0xff]  }
 0x11a   : > { %832 = vmatprep.subr.bf16.mxu1 %v2518_v10  ;;  %1810 = vmatpush1.bf16.msra.mxu0 %v2619_v21  ;;  %v2648_v10 = vld [vmem:[%s3372_s5 + $0x94] ss:$8 sps:$4 sm:$0xff]   ;;  %v2657_v21 = vld [vmem:[%s3372_s5 + $0xc4] ss:$8 sps:$4 sm:$0xff]  }
 0x11b   : > { %1811 = vmatprep.subr.bf16.mxu0 %v2624_v24  ;;  %v2660_v24 = vld [vmem:[%s3372_s5 + $0xd4] ss:$8 sps:$4 sm:$0xff]  }
 0x11d   : > { %833 = vmatpush1.bf16.msra.mxu1 %v2516_v12  ;;  %v2646_v12 = vld [vmem:[%s3372_s5 + $0x90] ss:$8 sps:$4 sm:$0xff]  }
 0x11e   : > { %834 = vmatprep.subr.bf16.mxu1 %v2524_v13  ;;  %1812 = vmatpush1.bf16.msra.mxu0 %v2622_v25  ;;  %v2595_v13 = vld [vmem:[%s3365_s28 + $0x108] ss:$16 sps:$4 sm:$0xff]   ;;  %v2606_v25 = vld [vmem:[%s3365_s28 + $0x16c] ss:$16 sps:$4 sm:$0xff]  }
 0x11f   : > { %1813 = vmatprep.subr.bf16.mxu0 %v2627_v27  ;;  %v2604_v27 = vld [vmem:[%s3365_s28 + $0x168] ss:$16 sps:$4 sm:$0xff]  }
 0x121   : > { %835 = vmatpush1.bf16.msra.mxu1 %v2522_v14  ;;  %v2651_v14 = vld [vmem:[%s3372_s5 + $0xa4] ss:$8 sps:$4 sm:$0xff]  }
 0x122   : > { %836 = vmatprep.subr.bf16.mxu1 %v2530_v15  ;;  %1814 = vmatpush1.bf16.msra.mxu0 %v2625_v30  ;;  %v2600_v15 = vld [vmem:[%s3365_s28 + $0x12c] ss:$16 sps:$4 sm:$0xff]  }
 0x123   : > { %1815 = vmatprep.subr.bf16.mxu0 %v2630_v32  ;;  %v2663_v30 = vld [vmem:[%s3372_s5 + $0xe4] ss:$8 sps:$4 sm:$0xff]   ;;  %v2661_v32 = vld [vmem:[%s3372_s5 + $0xe0] ss:$8 sps:$4 sm:$0xff]  }
 0x125   : > { %837 = vmatpush1.bf16.msra.mxu1 %v2528_v16  ;;  %v2649_v16 = vld [vmem:[%s3372_s5 + $0xa0] ss:$8 sps:$4 sm:$0xff]  }
 0x126   : > { %838 = vmatprep.subr.bf16.mxu1 %v2536_v17  ;;  %1816 = vmatpush1.bf16.msra.mxu0 %v2628_v33  ;;  %v2598_v17 = vld [vmem:[%s3365_s28 + $0x128] ss:$16 sps:$4 sm:$0xff]  }
 0x127   : > { %1817 = vmatprep.subr.bf16.mxu0 %v2633_v35  ;;  %v2610_v33 = vld [vmem:[%s3365_s28 + $0x1a8] ss:$16 sps:$4 sm:$0xff]   ;;  %v2615_v35 = vld [vmem:[%s3365_s28 + $0x1cc] ss:$16 sps:$4 sm:$0xff]  }
 0x129   : > { %839 = vmatpush1.bf16.msra.mxu1 %v2534_v18  ;;  %v2652_v18 = vld [vmem:[%s3372_s5 + $0xb0] ss:$8 sps:$4 sm:$0xff]  }
 0x12a   : > { %840 = vmatprep.subr.bf16.mxu1 %v2542_v19  ;;  %1818 = vmatpush1.bf16.msra.mxu0 %v2631_v38  ;;  %v2654_v19 = vld [vmem:[%s3372_s5 + $0xb4] ss:$8 sps:$4 sm:$0xff]   ;;  %v2613_v38 = vld [vmem:[%s3365_s28 + $0x1c8] ss:$16 sps:$4 sm:$0xff]  }
 0x12b   : > { %1819 = vmatprep.subr.bf16.mxu0 %v2636_v40  ;;  %v2616_v40 = vld [vmem:[%s3365_s28 + $0x1e8] ss:$16 sps:$4 sm:$0xff]  }
 0x12d   : > { %841 = vmatpush1.bf16.msra.mxu1 %v2540_v20  ;;  %v2603_v20 = vld [vmem:[%s3365_s28 + $0x14c] ss:$16 sps:$4 sm:$0xff]  }
 0x12e   : > { %842 = vmatprep.subr.bf16.mxu1 %v2546_v23  ;;  %1820 = vmatpush1.bf16.msra.mxu0 %v2634_v42  ;;  %v2601_v23 = vld [vmem:[%s3365_s28 + $0x148] ss:$16 sps:$4 sm:$0xff]  }
 0x12f   : > { %1821 = vmatprep.subr.bf16.mxu0 %v2639_v44 }
 0x131   : > { %843 = vmatpush1.bf16.msra.mxu1 %v2544_v26  ;;  %v2658_v26 = vld [vmem:[%s3372_s5 + $0xd0] ss:$8 sps:$4 sm:$0xff]  }
 0x132   : > { %844 = vmatprep.subr.bf16.mxu1 %v2549_v28  ;;  %1822 = vmatpush1.bf16.msra.mxu0 %v2637_v46  ;;  %v2609_v28 = vld [vmem:[%s3365_s28 + $0x18c] ss:$16 sps:$4 sm:$0xff]  }
 0x133   : > { %1823 = vmatprep.subr.bf16.mxu0 %v2642_v1 }
 0x135   : > { %845 = vmatpush1.bf16.msra.mxu1 %v2547_v29  ;;  %v2607_v29 = vld [vmem:[%s3365_s28 + $0x188] ss:$16 sps:$4 sm:$0xff]  }
 0x136   : > { %846 = vmatprep.subr.bf16.mxu1 %v2552_v31  ;;  %1824 = vmatpush1.bf16.msra.mxu0 %v2640_v4  ;;  %v2612_v31 = vld [vmem:[%s3365_s28 + $0x1ac] ss:$16 sps:$4 sm:$0xff]  }
 0x137   : > { %1825 = vmatprep.subr.bf16.mxu0 %v2645_v6 }
 0x139   : > { %847 = vmatpush1.bf16.msra.mxu1 %v2550_v34  ;;  %v2666_v34 = vld [vmem:[%s3372_s5 + $0xf4] ss:$8 sps:$4 sm:$0xff]  }
 0x13a   : > { %848 = vmatprep.subr.bf16.mxu1 %v2555_v36  ;;  %1826 = vmatpush1.bf16.msra.mxu0 %v2643_v8  ;;  %v2664_v36 = vld [vmem:[%s3372_s5 + $0xf0] ss:$8 sps:$4 sm:$0xff]   ;;  %v1900_v8 = vld [vmem:[%s3770_s29 + $0x8] sm:$0xff] }
 0x13b   : > { %1827 = vmatprep.subr.bf16.mxu0 %v2648_v10 }
 0x13d   : > { %849 = vmatpush1.bf16.msra.mxu1 %v2553_v39  ;;  %v2618_v39 = vld [vmem:[%s3365_s28 + $0x1ec] ss:$16 sps:$4 sm:$0xff]  }
 0x13e   : > { %850 = vmatprep.subr.bf16.mxu1 %v2558_v41  ;;  %1828 = vmatpush1.bf16.msra.mxu0 %v2646_v12  ;;  %v2669_v41 = vld [vmem:[%s3372_s5 + $0x104] ss:$8 sps:$4 sm:$0xff]  }
 0x13f   : > { %1829 = vmatprep.subr.bf16.mxu0 %v2651_v14 }
 0x141   : > { %851 = vmatpush1.bf16.msra.mxu1 %v2556_v43 }
 0x142   : > { %852 = vmatprep.subr.bf16.mxu1 %v2561_v45  ;;  %1830 = vmatpush1.bf16.msra.mxu0 %v2649_v16 }
 0x143   : > { %1831 = vmatprep.subr.bf16.mxu0 %v2654_v19 }
 0x145   : > { %853 = vmatpush1.bf16.msra.mxu1 %v2559_v47 }
 0x146   : > { %854 = vmatprep.subr.bf16.mxu1 %v2564_v48  ;;  %1832 = vmatpush1.bf16.msra.mxu0 %v2652_v18 }
 0x147   : > { %1833 = vmatprep.subr.bf16.mxu0 %v2657_v21 }
 0x149   : > { %855 = vmatpush1.bf16.msra.mxu1 %v2562_v49 }
 0x14a   : > { %856 = vmatprep.subr.bf16.mxu1 %v2567_v50  ;;  %1834 = vmatpush1.bf16.msra.mxu0 %v2655_v22 }
 0x14b   : > { %1835 = vmatprep.subr.bf16.mxu0 %v2660_v24 }
 0x14d   : > { %857 = vmatpush1.bf16.msra.mxu1 %v2565_v51 }
 0x14e   : > { %858 = vmatprep.subr.bf16.mxu1 %v2570_v52  ;;  %1836 = vmatpush1.bf16.msra.mxu0 %v2658_v26 }
 0x14f   : > { %1837 = vmatprep.subr.bf16.mxu0 %v2663_v30 }
 0x151   : > { %859 = vmatpush1.bf16.msra.mxu1 %v2568_v53 }
 0x152   : > { %1298 = vmatprep.subr.bf16.mxu1 %v2573_v54  ;;  %1838 = vmatpush1.bf16.msra.mxu0 %v2661_v32 }
 0x153   : > { %1839 = vmatprep.subr.bf16.mxu0 %v2666_v34 }
 0x154   : > { %861 = vmatmul.mubr.bf16.vlgmr.msra.gmra.mrb[4].mxu1 %v3472_v3 }
 0x155   : > { %1299 = vmatpush1.bf16.msra.mxu1 %v2571_v55  ;;  %1330 = vmatprep.mubr.bf16.mxu1 %v3435_v37  ;;  %v2588_v37 = vld [vmem:[%s3365_s28 + $0xac] ss:$16 sps:$4 sm:$0xff]  }
 0x156   : > { %1300 = vmatprep.subr.bf16.mxu1 %v2576_v56  ;;  %1840 = vmatpush1.bf16.msra.mxu0 %v2664_v36  ;;  %v2667_v36 = vld [vmem:[%s3372_s5 + $0x100] ss:$8 sps:$4 sm:$0xff]  }
 0x157   : > { %1852 = vmatprep.subr.bf16.mxu0 %v2669_v41  ;;  %v2673_v41 = vld [vmem:[%s3372_s5 + $0x120] ss:$8 sps:$4 sm:$0xff]  }
 0x159   : > { %1301 = vmatpush1.bf16.msra.mxu1 %v2574_v57 }
 0x15a   : > { %1302 = vmatprep.subr.bf16.mxu1 %v2579_v58 }
 0x15d   : > { %1303 = vmatpush1.bf16.msra.mxu1 %v2577_v59 }
 0x15e   : > { %1304 = vmatprep.subr.bf16.mxu1 %v2582_v60 }
 0x161   : > { %1305 = vmatpush1.bf16.msra.mxu1 %v2580_v61  ;;  %v1895_v61 = vlaneseq }
 0x162   : > { %1306 = vmatprep.subr.bf16.mxu1 %v2585_v62 }
 0x165   : > { %1307 = vmatpush1.bf16.msra.mxu1 %v2583_v63 }
 0x166   : > { %1308 = vmatprep.subr.bf16.mxu1 %v2588_v37 }
 0x169   : > { %1309 = vmatpush1.bf16.msra.mxu1 %v2586_v0 }
 0x16a   : > { %1310 = vmatprep.subr.bf16.mxu1 %v2591_v2 }
 0x16d   : > { %1311 = vmatpush1.bf16.msra.mxu1 %v2589_v5  ;;  %v1896_v5 = vand.u32 127, %v1895_v61  ;;  %v2702_v61 = vld [vmem:[%s3372_s5 + $0x1b4] ss:$8 sps:$4 sm:$0xff]  }
 0x16e   : > { %1312 = vmatprep.subr.bf16.mxu1 %v2594_v7  ;;  %v1899_v7 = vld [vmem:[%s3769_s12] sm:$0xff] }
 0x171   : > { %1313 = vmatpush1.bf16.msra.mxu1 %v2592_v9  ;;  %v1897_v9 = vstv %s394_s21 }
 0x172   : > { %1314 = vmatprep.subr.bf16.mxu1 %v2597_v11  ;;  %vm1898_vm1 = vcmp.eq.s32.totalorder %v1896_v5, %v1897_v9 }
 0x173   : > { %v1901_v10 = vsel %vm1898_vm1, %v1899_v7, 0.0  ;;  %v1902_v11 = vsel %vm1898_vm1, %v1900_v8, 0.0  ;;  %v2709_v8 = vld [vmem:[%s3372_s5 + $0x1e0] ss:$8 sps:$4 sm:$0xff]  }
 0x174   : > { %v1904_v12 = vsel %vm1903_vm0, %v1901_v10, 0.0  ;;  %v2714_v10 = vld [vmem:[%s3372_s5 + $0x1f4] ss:$8 sps:$4 sm:$0xff]  }
 0x175   : > { %1315 = vmatpush1.bf16.msra.mxu1 %v2595_v13  ;;  %1905 = vadd.xlane.f32.xlu0 %v1904_v12  ;;  %v1907_v13 = vsel %vm1903_vm0, %v1902_v11, 0.0 }
 0x176   : > { %1316 = vmatprep.subr.bf16.mxu1 %v2600_v15 }
 0x179   : > { %1317 = vmatpush1.bf16.msra.mxu1 %v2598_v17  ;;  %1908 = vadd.xlane.f32.xlu0 %v1907_v13 }
 0x17a   : > { %1318 = vmatprep.subr.bf16.mxu1 %v2603_v20 }
 0x17d   : > { %1319 = vmatpush1.bf16.msra.mxu1 %v2601_v23 }
 0x17e   : > { %1320 = vmatprep.subr.bf16.mxu1 %v2606_v25 }
 0x181   : > { %1321 = vmatpush1.bf16.msra.mxu1 %v2604_v27 }
 0x182   : > { %1322 = vmatprep.subr.bf16.mxu1 %v2609_v28 }
 0x185   : > { %1323 = vmatpush1.bf16.msra.mxu1 %v2607_v29 }
 0x186   : > { %1324 = vmatprep.subr.bf16.mxu1 %v2612_v31 }
 0x189   : > { %1325 = vmatpush1.bf16.msra.mxu1 %v2610_v33 }
 0x18a   : > { %1326 = vmatprep.subr.bf16.mxu1 %v2615_v35 }
 0x18d   : > { %1327 = vmatpush1.bf16.msra.mxu1 %v2613_v38  ;;  %v2672_v38 = vld [vmem:[%s3372_s5 + $0x114] ss:$8 sps:$4 sm:$0xff]  }
 0x18e   : > { %1328 = vmatprep.subr.bf16.mxu1 %v2618_v39  ;;  %v2670_v39 = vld [vmem:[%s3372_s5 + $0x110] ss:$8 sps:$4 sm:$0xff]  }
 0x191   : > { %1329 = vmatpush1.bf16.msra.mxu1 %v2616_v40  ;;  %v2675_v40 = vld [vmem:[%s3372_s5 + $0x124] ss:$8 sps:$4 sm:$0xff]  }
 0x194   : > { %1331 = vmatmul.mubr.bf16.vlgmr.msra.gmra.mrb[8].mxu1 %v3472_v3 }
 0x1e7   : > { %v819_v42 = vpop.f32.mrb[0].mxu1 }
 0x1e8   : > { %v1341_v43 = vmul.f32 %v819_v42, %v819_v42  ;;  %v821_v44 = vpop.f32.mrb[1].mxu1 }
 0x1e9   : > { %v1342_v45 = vmul.f32 %v821_v44, %v821_v44  ;;  %v823_v46 = vpop.f32.mrb[2].mxu1 }
 0x1ea   : > { %v1349_v47 = vmul.f32 %v1341_v43, %v819_v42  ;;  %v1345_v48 = vmul.f32 %v823_v46, %v823_v46  ;;  %v825_v49 = vpop.f32.mrb[3].mxu1  ;;  %v2676_v43 = vld [vmem:[%s3372_s5 + $0x130] ss:$8 sps:$4 sm:$0xff]  }
 0x1eb   : > { %v1350_v50 = vmul.f32 %v1342_v45, %v821_v44  ;;  %v1346_v51 = vmul.f32 %v825_v49, %v825_v49  ;;  %v2679_v45 = vld [vmem:[%s3372_s5 + $0x140] ss:$8 sps:$4 sm:$0xff]  }
 0x1ec   : > { %v1357_v52 = vmul.f32 0.044715, %v1349_v47  ;;  %v1353_v53 = vmul.f32 %v1345_v48, %v823_v46  ;;  %v1289_v37 = vpop.f32.mrb[0].mxu0  ;;  %v2682_v47 = vld [vmem:[%s3372_s5 + $0x150] ss:$8 sps:$4 sm:$0xff]  }
 0x1ed   : > { %v1358_v54 = vmul.f32 0.044715, %v1350_v50  ;;  %v1354_v55 = vmul.f32 %v1346_v51, %v825_v49  ;;  %v1291_v1 = vpop.f32.mrb[1].mxu0  ;;  %v2687_v48 = vld [vmem:[%s3372_s5 + $0x164] ss:$8 sps:$4 sm:$0xff]  }
 0x1ee   : > { %v1365_v56 = vadd.f32 %v1357_v52, %v819_v42  ;;  %v1361_v57 = vmul.f32 0.044715, %v1353_v53  ;;  %v1293_v4 = vpop.f32.mrb[2].mxu0  ;;  %v2690_v50 = vld [vmem:[%s3372_s5 + $0x174] ss:$8 sps:$4 sm:$0xff]  }
 0x1ef   : > { %v1366_v3 = vadd.f32 %v1358_v54, %v821_v44  ;;  %v1362_v58 = vmul.f32 0.044715, %v1354_v55  ;;  %v1295_v6 = vpop.f32.mrb[3].mxu0  ;;  %v2688_v51 = vld [vmem:[%s3372_s5 + $0x170] ss:$8 sps:$4 sm:$0xff]  }
 0x1f0   : > { %v1373_v59 = vmul.f32 0.7978846, %v1365_v56  ;;  %v1369_v60 = vadd.f32 %v1361_v57, %v823_v46  ;;  %v2693_v52 = vld [vmem:[%s3372_s5 + $0x184] ss:$8 sps:$4 sm:$0xff]   ;;  %v2691_v55 = vld [vmem:[%s3372_s5 + $0x180] ss:$8 sps:$4 sm:$0xff]  }
 0x1f1   : > { %v1374_v62 = vmul.f32 0.7978846, %v1366_v3  ;;  %v1370_v63 = vadd.f32 %v1362_v58, %v825_v49  ;;  %v2696_v57 = vld [vmem:[%s3372_s5 + $0x194] ss:$8 sps:$4 sm:$0xff]   ;;  %v2694_v58 = vld [vmem:[%s3372_s5 + $0x190] ss:$8 sps:$4 sm:$0xff]  }
 0x1f2   : > { %2715 = vtanh.f32 %v1373_v59  ;;  %v1377_v0 = vmul.f32 0.7978846, %v1369_v60  ;;  %v2699_v59 = vld [vmem:[%s3372_s5 + $0x1a4] ss:$8 sps:$4 sm:$0xff]   ;;  %v2697_v60 = vld [vmem:[%s3372_s5 + $0x1a0] ss:$8 sps:$4 sm:$0xff]  }
 0x1f3   : > { %2717 = vtanh.f32 %v1374_v62  ;;  %v1378_v2 = vmul.f32 0.7978846, %v1370_v63  ;;  %v2700_v62 = vld [vmem:[%s3372_s5 + $0x1b0] ss:$8 sps:$4 sm:$0xff]   ;;  %v2705_v63 = vld [vmem:[%s3372_s5 + $0x1c4] ss:$8 sps:$4 sm:$0xff]  }
 0x1f4   : > { %2719 = vtanh.f32 %v1377_v0  ;;  %v2708_v0 = vld [vmem:[%s3372_s5 + $0x1d4] ss:$8 sps:$4 sm:$0xff]  }
 0x1f5   : > { %2721 = vtanh.f32 %v1378_v2 }
 0x1fc   : > { %v2716_v14 = vpop.eup %2715 }
 0x1fd   : > { %v2718_v15 = vpop.eup %2717  ;;  %v1389_v16 = vadd.f32 1.0, %v2716_v14  ;;  %v2712_v14 = vld [vmem:[%s3372_s5 + $0x1f0] ss:$8 sps:$4 sm:$0xff]  }
 0x1fe   : > { %v2720_v17 = vpop.eup %2719  ;;  %v1390_v18 = vadd.f32 1.0, %v2718_v15 }
 0x1ff   : > { %v2722_v19 = vpop.eup %2721  ;;  %v1397_v20 = vmul.f32 0.5, %v1389_v16  ;;  %v1393_v21 = vadd.f32 1.0, %v2720_v17 }
 0x200   : > { %v1398_v22 = vmul.f32 0.5, %v1390_v18  ;;  %v1394_v23 = vadd.f32 1.0, %v2722_v19 }
 0x201   : > { %v1405_v24 = vmul.f32 %v1397_v20, %v819_v42  ;;  %v1401_v25 = vmul.f32 0.5, %v1393_v21  ;;  %v2678_v42 = vld [vmem:[%s3372_s5 + $0x134] ss:$8 sps:$4 sm:$0xff]  }
 0x202   : > { %v1406_v26 = vmul.f32 %v1398_v22, %v821_v44  ;;  %v1402_v27 = vmul.f32 0.5, %v1394_v23  ;;  %v2681_v44 = vld [vmem:[%s3372_s5 + $0x144] ss:$8 sps:$4 sm:$0xff]  }
 0x203   : > { %v1413_v28 = vmul.f32 %v1405_v24, %v1289_v37  ;;  %v1409_v29 = vmul.f32 %v1401_v25, %v823_v46  ;;  %v2684_v46 = vld [vmem:[%s3372_s5 + $0x154] ss:$8 sps:$4 sm:$0xff]   ;;  %v2703_v37 = vld [vmem:[%s3372_s5 + $0x1c0] ss:$8 sps:$4 sm:$0xff]  }
 0x204   : > { %v1414_v30 = vmul.f32 %v1406_v26, %v1291_v1  ;;  %v1410_v31 = vmul.f32 %v1402_v27, %v825_v49  ;;  %v2685_v49 = vld [vmem:[%s3372_s5 + $0x160] ss:$8 sps:$4 sm:$0xff]   ;;  %v2706_v1 = vld [vmem:[%s3372_s5 + $0x1d0] ss:$8 sps:$4 sm:$0xff]  }
 0x205   : > { %v1417_v32 = vmul.f32 %v1409_v29, %v1293_v4  ;;  %v2711_v4 = vld [vmem:[%s3372_s5 + $0x1e4] ss:$8 sps:$4 sm:$0xff]  }
 0x206   : > { %v1418_v33 = vmul.f32 %v1410_v31, %v1295_v6 }
 0x207   : > { %v1421_v34 = vpack.c.bf16 %v1417_v32, %v1413_v28 }
 0x208   : > { %v1422_v35 = vpack.c.bf16 %v1418_v33, %v1414_v30 }
 0x20a   : > { %1841 = vmatprep.mubr.bf16.mxu0 %v1422_v35 }
 0x20b   : > { %1842 = vmatmul.mubr.bf16.vlgmr.msra.gmra.mrb[4].mxu0 %v1421_v34 }
 0x20c   : > { %1853 = vmatpush1.bf16.msra.mxu0 %v2667_v36 }
 0x20d   : > { %1854 = vmatprep.subr.bf16.mxu0 %v2672_v38 }
 0x210   : > { %1855 = vmatpush1.bf16.msra.mxu0 %v2670_v39 }
 0x211   : > { %1856 = vmatprep.subr.bf16.mxu0 %v2675_v40 }
 0x214   : > { %1857 = vmatpush1.bf16.msra.mxu0 %v2673_v41 }
 0x215   : > { %1858 = vmatprep.subr.bf16.mxu0 %v2678_v42 }
 0x218   : > { %1859 = vmatpush1.bf16.msra.mxu0 %v2676_v43 }
 0x219   : > { %1860 = vmatprep.subr.bf16.mxu0 %v2681_v44 }
 0x21c   : > { %1861 = vmatpush1.bf16.msra.mxu0 %v2679_v45 }
 0x21d   : > { %1862 = vmatprep.subr.bf16.mxu0 %v2684_v46 }
 0x220   : > { %1863 = vmatpush1.bf16.msra.mxu0 %v2682_v47 }
 0x221   : > { %1864 = vmatprep.subr.bf16.mxu0 %v2687_v48 }
 0x224   : > { %1865 = vmatpush1.bf16.msra.mxu0 %v2685_v49 }
 0x225   : > { %1866 = vmatprep.subr.bf16.mxu0 %v2690_v50 }
 0x227   : > { %v3603_v53 = vpop.f32.mrb[4].mxu1 }
 0x228   : > { %v3605_v54 = vpop.f32.mrb[5].mxu1  ;;  %1867 = vmatpush1.bf16.msra.mxu0 %v2688_v51  ;;  %v1343_v2 = vmul.f32 %v3603_v53, %v3603_v53 }
 0x229   : > { %v3608_v56 = vpop.f32.mrb[6].mxu1  ;;  %1868 = vmatprep.subr.bf16.mxu0 %v2693_v52  ;;  %v1344_v5 = vmul.f32 %v3605_v54, %v3605_v54 }
 0x22a   : > { %v3611_v3 = vpop.f32.mrb[7].mxu1  ;;  %v1347_v6 = vmul.f32 %v3608_v56, %v3608_v56  ;;  %v1351_v9 = vmul.f32 %v1343_v2, %v3603_v53 }
 0x22b   : > { %v1348_v7 = vmul.f32 %v3611_v3, %v3611_v3  ;;  %v1352_v11 = vmul.f32 %v1344_v5, %v3605_v54 }
 0x22c   : > { %1869 = vmatpush1.bf16.msra.mxu0 %v2691_v55  ;;  %v1355_v12 = vmul.f32 %v1347_v6, %v3608_v56  ;;  %v1359_v15 = vmul.f32 0.044715, %v1351_v9 }
 0x22d   : > { %1870 = vmatprep.subr.bf16.mxu0 %v2696_v57  ;;  %v1356_v13 = vmul.f32 %v1348_v7, %v3611_v3  ;;  %v1360_v16 = vmul.f32 0.044715, %v1352_v11  ;;  %v1910_v57 = vld [vmem:[%s3387_s15] sm:$0xff] }
 0x22e   : > { %v1363_v17 = vmul.f32 0.044715, %v1355_v12  ;;  %v1367_v19 = vadd.f32 %v1359_v15, %v3603_v53 }
 0x22f   : > { %v1364_v18 = vmul.f32 0.044715, %v1356_v13  ;;  %v1368_v20 = vadd.f32 %v1360_v16, %v3605_v54 }
 0x230   : > { %1871 = vmatpush1.bf16.msra.mxu0 %v2694_v58  ;;  %v1371_v21 = vadd.f32 %v1363_v17, %v3608_v56  ;;  %v1375_v23 = vmul.f32 0.7978846, %v1367_v19 }
 0x231   : > { %1872 = vmatprep.subr.bf16.mxu0 %v2699_v59  ;;  %v1372_v22 = vadd.f32 %v1364_v18, %v3611_v3  ;;  %v1376_v24 = vmul.f32 0.7978846, %v1368_v20 }
 0x232   : > { %v1379_v25 = vmul.f32 0.7978846, %v1371_v21  ;;  %2723 = vtanh.f32 %v1375_v23 }
 0x233   : > { %v1380_v26 = vmul.f32 0.7978846, %v1372_v22  ;;  %2725 = vtanh.f32 %v1376_v24 }
 0x234   : > { %1873 = vmatpush1.bf16.msra.mxu0 %v2697_v60  ;;  %2727 = vtanh.f32 %v1379_v25 }
 0x235   : > { %1874 = vmatprep.subr.bf16.mxu0 %v2702_v61  ;;  %2729 = vtanh.f32 %v1380_v26 }
 0x238   : > { %1875 = vmatpush1.bf16.msra.mxu0 %v2700_v62  ;;  %v1912_v62 = vld [vmem:[%s3387_s15 + $0x10] sm:$0xff] }
 0x239   : > { %1876 = vmatprep.subr.bf16.mxu0 %v2705_v63 }
 0x23c   : > { %1877 = vmatpush1.bf16.msra.mxu0 %v2703_v37  ;;  %v2724_v27 = vpop.eup %2723 }
 0x23d   : > { %1878 = vmatprep.subr.bf16.mxu0 %v2708_v0  ;;  %v2726_v28 = vpop.eup %2725  ;;  %v1391_v31 = vadd.f32 1.0, %v2724_v27 }
 0x23e   : > { %v2728_v29 = vpop.eup %2727  ;;  %v1392_v32 = vadd.f32 1.0, %v2726_v28 }
 0x23f   : > { %v2730_v30 = vpop.eup %2729  ;;  %v1395_v33 = vadd.f32 1.0, %v2728_v29  ;;  %v1399_v35 = vmul.f32 0.5, %v1391_v31 }
 0x240   : > { %1879 = vmatpush1.bf16.msra.mxu0 %v2706_v1  ;;  %v1396_v34 = vadd.f32 1.0, %v2730_v30  ;;  %v1400_v36 = vmul.f32 0.5, %v1392_v32  ;;  %v1913_v1 = vld [vmem:[%s3387_s15 + $0x18] sm:$0xff] }
 0x241   : > { %1880 = vmatprep.subr.bf16.mxu0 %v2711_v4  ;;  %v1403_v38 = vmul.f32 0.5, %v1395_v33  ;;  %v1407_v40 = vmul.f32 %v1399_v35, %v3603_v53  ;;  %v1906_v53 = vpop.xlane.xlu0 %1905 }
 0x242   : > { %v1404_v39 = vmul.f32 0.5, %v1396_v34  ;;  %v1408_v42 = vmul.f32 %v1400_v36, %v3605_v54 }
 0x243   : > { %v1411_v45 = vmul.f32 %v1403_v38, %v3608_v56 }
 0x244   : > { %1881 = vmatpush1.bf16.msra.mxu0 %v2709_v8  ;;  %v1412_v48 = vmul.f32 %v1404_v39, %v3611_v3  ;;  %v1911_v3 = vld [vmem:[%s3387_s15 + $0x8] sm:$0xff] }
 0x245   : > { %1882 = vmatprep.subr.bf16.mxu0 %v2714_v10  ;;  %v1909_v56 = vpop.xlane.xlu0 %1908 }
 0x248   : > { %1883 = vmatpush1.bf16.msra.mxu0 %v2712_v14 }
 0x267   : > { %v1332_v41 = vpop.f32.mrb[8].mxu1 }
 0x268   : > { %v1415_v43 = vmul.f32 %v1407_v40, %v1332_v41  ;;  %v1334_v44 = vpop.f32.mrb[9].mxu1 }
 0x269   : > { %v1416_v46 = vmul.f32 %v1408_v42, %v1334_v44  ;;  %v1336_v47 = vpop.f32.mrb[10].mxu1 }
 0x26a   : > { %v1419_v49 = vmul.f32 %v1411_v45, %v1336_v47  ;;  %v1338_v50 = vpop.f32.mrb[11].mxu1 }
 0x26b   : > { %v1420_v51 = vmul.f32 %v1412_v48, %v1338_v50 }
 0x26c   : > { %v1423_v52 = vpack.c.bf16 %v1419_v49, %v1415_v43 }
 0x26d   : > { %v1424_v55 = vpack.c.bf16 %v1420_v51, %v1416_v46 }
 0x26f   : > { %1884 = vmatprep.mubr.bf16.mxu0 %v1424_v55 }
 0x270   : > { %1885 = vmatmul.mubr.bf16.vlgmr.msra.gmra.mrb[4].mxu0 %v1423_v52 }
 0x343   : > { %v1886_v54 = vpop.f32.mrb[4].mxu0 }
 0x344   : > { %v1914_v58 = vmul.f32 %v1906_v53, %v1886_v54  ;;  %v1888_v59 = vpop.f32.mrb[5].mxu0 }
 0x345   : > { %v1915_v60 = vmul.f32 %v1906_v53, %v1888_v59  ;;  %v1890_v61 = vpop.f32.mrb[6].mxu0 }
 0x346   : > { %v1918_v63 = vadd.f32 %v1914_v58, %v1910_v57  ;;  %v1916_v37 = vmul.f32 %v1909_v56, %v1890_v61  ;;  %v1892_v0 = vpop.f32.mrb[7].mxu0 }
 0x347   : > { %v1919_v2 = vadd.f32 %v1915_v60, %v1911_v3  ;;  %v1917_v4 = vmul.f32 %v1909_v56, %v1892_v0 }
 0x348   : > { %1922 = vst [vmem:[%s3387_s15] sm:$0xff] %v1918_v63  ;;  %v1920_v5 = vadd.f32 %v1916_v37, %v1912_v62 }
 0x349   : > { %1923 = vst [vmem:[%s3387_s15 + $0x8] sm:$0xff] %v1919_v2  ;;  %v1921_v6 = vadd.f32 %v1917_v4, %v1913_v1 }
 0x34a   : > { %1924 = vst [vmem:[%s3387_s15 + $0x10] sm:$0xff] %v1920_v5 }
 0x34b   : > { %1925 = vst [vmem:[%s3387_s15 + $0x18] sm:$0xff] %v1921_v6 }
 0x34c PF: > { %s30_s19 = sadd.s32 1, %s2957_s19   ;;  %s3772_s7 = sld [smem:[#allocation25_spill]] }
 0x34d   : > { %p3655_p0 = scmp.ge.s32.totalorder %s30_s19, 10   ;;  %s3773_s22 = sld [smem:[#allocation26_spill]] }
 0x34e   : > { %s3774_s15 = sld [smem:[#allocation21_spill]]  ;;  %s3775_s16 = sld [smem:[#allocation22_spill]] }
 0x34f   : > { %s3776_s17 = sld [smem:[#allocation23_spill]]  ;;  %s3777_s18 = sld [smem:[#allocation24_spill]] }
 0x350   : > { %s3778_s0 = smov %s2909_s1  ;;  %s3779_s1 = smov %s2913_s8 }
 0x351   : > { %s3780_s8 = smov %s3303_s4  ;;  %s3781_s9 = smov %s2921_s10 }
 0x352   : > { %s3782_s10 = smov %s2925_s11  ;;  %s3783_s11 = smov %s3772_s7 }
 0x353   : > { %s3784_s12 = smov %s2933_s13  ;;  %s3785_s13 = smov %s2937_s14 }
 0x354   : > { %s3786_s14 = smov %s3773_s22  ;;  %29 = sbr.rel (!%p3655_p0) target bundleno = 27 (0x1b), region = 112 }
 0x35b   :  { %1947 = vsyncpa [#allocation6], 1 }
 0x35c   :  { %1949 = vsyncpa [#allocation6 + $0x1], 1 }
 0x35d   :  { %1950 = vsyncpa [#allocation8], 1 }
 0x35e   :  { %1952 = vsyncpa [#allocation8 + $0x1], 1 }

</bundles_post_ra>
